<compile_context>
chip_gen: v7x
topology: tpu7x:2x2x1
jax: 0.10.0
libtpu: 0.0.40
codegen_flags: <defaults>
</compile_context>

<pallas_src>
import functools
import math

import jax
import jax.numpy as jnp
from jax.experimental import pallas as pl
from jax.experimental.pallas import tpu as pltpu


# ----------------------------------------------------------------------------
# Generation-aware VMEM budget (128 MiB on v5e/v6e, 64 MiB on v7x)
# ----------------------------------------------------------------------------
def _vmem_limit_bytes():
    try:
        cap = int(pltpu.get_tpu_info().vmem_capacity_bytes)
    except Exception:
        cap = 64 * 1024 * 1024          # conservative (v7x) fallback
    return min(int(cap * 3 // 4), 112 * 1024 * 1024)


_VMEM_LIMIT = _vmem_limit_bytes()


# ----------------------------------------------------------------------------
# Tiling helpers
# ----------------------------------------------------------------------------
def _round_up(n, m):
    return ((n + m - 1) // m) * m


def _pick_row_tile(rows):
    """Row tile + padded row count for row-parallel (matmul / LN) kernels.

    Keeps tiles large (HBM-bound roofline) while guaranteeing >=2 grid steps
    whenever possible so v7x's two TensorCores both get work.
    """
    if rows <= 8:
        return 8, 8
    if rows <= 1024:
        rp = _round_up(rows, 16)
        return rp // 2, rp              # 2 grid steps
    rp = _round_up(rows, 1024)
    return 512, rp


def _pick_seq_tile(n, cap=1024):
    """Tile + padded length for the attention query / key axes."""
    np_ = _round_up(n, 8)
    if np_ <= cap:
        return np_, np_
    np_ = _round_up(n, 512)
    return 512, np_


# ----------------------------------------------------------------------------
# Kernel bodies
# ----------------------------------------------------------------------------
def _layer1(x, w1_ref, b1_ref):
    """First MLP layer.  For tiny input dims (the AttnCNP default Din=1) this
    is a VPU broadcast multiply instead of a degenerate K=1 MXU matmul (and it
    avoids zero-padding x's feature dim to 128 in the wrapper)."""
    din = x.shape[1]
    if din <= 16:
        h = b1_ref[...].astype(jnp.float32)                       # (1, E)
        for d in range(din):
            h = h + x[:, d:d + 1].astype(jnp.float32) * \
                w1_ref[d:d + 1, :].astype(jnp.float32)            # -> (tr, E)
        return h
    return jnp.dot(x, w1_ref[...], preferred_element_type=jnp.float32) + b1_ref[...]


def _mlp_proj_kernel(x_ref, w1_ref, b1_ref, w2_ref, b2_ref, wp_ref, proj_ref):
    """Fused BatchMLP + bias-free projection (context/key path: only the
    projected output is needed downstream)."""
    h = jnp.maximum(_layer1(x_ref[...], w1_ref, b1_ref), 0.0)
    e = jnp.dot(h.astype(w2_ref.dtype), w2_ref[...],
                preferred_element_type=jnp.float32) + b2_ref[...]
    proj_ref[...] = jnp.dot(e.astype(wp_ref.dtype), wp_ref[...],
                            preferred_element_type=jnp.float32).astype(proj_ref.dtype)


def _mlp_emb_proj_kernel(x_ref, w1_ref, b1_ref, w2_ref, b2_ref, wp_ref,
                         emb_ref, proj_ref):
    """Fused BatchMLP + projection (target/query path: the embedding is also
    emitted because it feeds the residual connection)."""
    h = jnp.maximum(_layer1(x_ref[...], w1_ref, b1_ref), 0.0)
    e = jnp.dot(h.astype(w2_ref.dtype), w2_ref[...],
                preferred_element_type=jnp.float32) + b2_ref[...]
    emb_ref[...] = e.astype(emb_ref.dtype)
    proj_ref[...] = jnp.dot(e.astype(wp_ref.dtype), wp_ref[...],
                            preferred_element_type=jnp.float32).astype(proj_ref.dtype)


def _linear_kernel(x_ref, w_ref, o_ref):
    o_ref[...] = jnp.dot(x_ref[...], w_ref[...],
                         preferred_element_type=jnp.float32).astype(o_ref.dtype)


def _attn_kernel(q_ref, k_ref, v_ref, o_ref, qs_sc, m_sc, l_sc, acc_sc, *,
                 scale, num_heads, head_size, nk, tk, needs_mask):
    """Flash-style multi-head attention for one (batch, q-tile, kv-tile) step.

    All heads of a batch element are processed inside the kernel so the HBM
    output block is the merged-head (tq, num_heads*head_size) slab — the final
    store is lane-dense and no split/merge-head transposes are needed."""
    ki = pl.program_id(2)

    @pl.when(ki == 0)
    def _():
        # Fold 1/sqrt(head_size) into q once per q tile (resident across kv).
        qs_sc[...] = q_ref[0].astype(jnp.float32) * scale
        m_sc[...] = jnp.full(m_sc.shape, -jnp.inf, m_sc.dtype)
        l_sc[...] = jnp.zeros(l_sc.shape, l_sc.dtype)
        acc_sc[...] = jnp.zeros(acc_sc.shape, acc_sc.dtype)

    k = k_ref[0]
    v = v_ref[0]

    if needs_mask:
        idx = ki * tk + jax.lax.broadcasted_iota(jnp.int32, (1, tk), 1)
        key_valid = idx < nk

    for h in range(num_heads):
        sl = slice(h * head_size, (h + 1) * head_size)
        qh = qs_sc[:, sl]                                  # (tq, hs), f32
        kh = k[:, sl].astype(jnp.float32)                  # (tk, hs)
        s = jax.lax.dot_general(qh, kh, (((1,), (1,)), ((), ())),
                                preferred_element_type=jnp.float32)  # (tq, tk)
        if needs_mask:
            s = jnp.where(key_valid, s, -jnp.inf)

        m_prev = m_sc[:, h:h + 1]
        m_new = jnp.maximum(m_prev, jnp.max(s, axis=-1, keepdims=True))
        alpha = jnp.exp(m_prev - m_new)
        p = jnp.exp(s - m_new)
        l_sc[:, h:h + 1] = alpha * l_sc[:, h:h + 1] + jnp.sum(p, axis=-1,
                                                              keepdims=True)
        pv = jnp.dot(p.astype(v.dtype), v[:, sl],
                     preferred_element_type=jnp.float32)   # (tq, hs)
        acc_sc[:, sl] = alpha * acc_sc[:, sl] + pv
        m_sc[:, h:h + 1] = m_new

    @pl.when(ki == pl.num_programs(2) - 1)
    def _():
        inv_l = pl.reciprocal(l_sc[...], approx=True)      # EUP, (tq, H)
        outs = [acc_sc[:, h * head_size:(h + 1) * head_size] * inv_l[:, h:h + 1]
                for h in range(num_heads)]
        # Single lane-dense store of the merged-head output block.
        o_ref[0] = jnp.concatenate(outs, axis=1).astype(o_ref.dtype)


def _layernorm(x, g, b, eps=1e-5):
    mean = jnp.mean(x, axis=-1, keepdims=True)
    xc = x - mean
    var = jnp.mean(xc * xc, axis=-1, keepdims=True)
    return xc * jax.lax.rsqrt(var + eps) * g + b


def _epilogue_kernel(attn_ref, qemb_ref, wc_ref, bc_ref, wf_ref, bf_ref,
                     g1_ref, be1_ref, g2_ref, be2_ref, o_ref):
    # head_combine + residual + LN1 + ff + residual + LN2, fused per row tile.
    a = jnp.dot(attn_ref[...], wc_ref[...],
                preferred_element_type=jnp.float32) + bc_ref[...]
    out1 = _layernorm(a + qemb_ref[...].astype(jnp.float32),
                      g1_ref[...], be1_ref[...])
    f = jnp.dot(out1.astype(wf_ref.dtype), wf_ref[...],
                preferred_element_type=jnp.float32) + bf_ref[...]
    out2 = _layernorm(out1 + f, g2_ref[...], be2_ref[...])
    o_ref[...] = out2.astype(o_ref.dtype)


# ----------------------------------------------------------------------------
# Pallas wrappers
# ----------------------------------------------------------------------------
def _rowwise_pallas(kernel, row_inputs, bcast_inputs, out_dims, out_dtype):
    """Run `kernel` over row tiles: row_inputs (R, Di) are tiled on rows,
    bcast_inputs (all 2-D) stay fully resident every step.  `out_dims` may be
    an int (single output) or a tuple of ints (multiple outputs)."""
    R = row_inputs[0].shape[0]
    tr, Rp = _pick_row_tile(R)
    padded = [jnp.pad(x, ((0, Rp - R), (0, 0))) if Rp != R else x
              for x in row_inputs]
    in_specs = [pl.BlockSpec((tr, x.shape[1]), lambda i: (i, 0)) for x in padded]
    in_specs += [pl.BlockSpec(b.shape, lambda i: (0, 0)) for b in bcast_inputs]

    multi = isinstance(out_dims, (tuple, list))
    dims = tuple(out_dims) if multi else (out_dims,)
    out_shapes = tuple(jax.ShapeDtypeStruct((Rp, d), out_dtype) for d in dims)
    out_specs = tuple(pl.BlockSpec((tr, d), lambda i: (i, 0)) for d in dims)

    outs = pl.pallas_call(
        kernel,
        out_shape=out_shapes if multi else out_shapes[0],
        grid_spec=pltpu.PrefetchScalarGridSpec(
            num_scalar_prefetch=0,
            grid=(Rp // tr,),
            in_specs=in_specs,
            out_specs=list(out_specs) if multi else out_specs[0],
        ),
        compiler_params=pltpu.CompilerParams(
            dimension_semantics=("parallel",),
            vmem_limit_bytes=_VMEM_LIMIT),
    )(*padded, *bcast_inputs)
    if multi:
        return tuple(o[:R] for o in outs)
    return outs[:R]


def batch_mlp_key_proj(x, w1, b1, w2, b2, wk):
    """BatchMLP + key projection on (B, N, Din) -> (B, N, E)."""
    B, N, _ = x.shape
    E = w2.shape[1]
    out = _rowwise_pallas(
        _mlp_proj_kernel, [x.reshape(B * N, -1)],
        [w1, b1.reshape(1, -1), w2, b2.reshape(1, -1), wk], E, x.dtype)
    return out.reshape(B, N, E)


def batch_mlp_emb_query_proj(x, w1, b1, w2, b2, wq):
    """BatchMLP + query projection; also returns the embedding (residual)."""
    B, N, _ = x.shape
    E = w2.shape[1]
    emb, proj = _rowwise_pallas(
        _mlp_emb_proj_kernel, [x.reshape(B * N, -1)],
        [w1, b1.reshape(1, -1), w2, b2.reshape(1, -1), wq], (E, E), x.dtype)
    return emb.reshape(B, N, E), proj.reshape(B, N, E)


def batch_linear(x, w):
    """Bias-free BatchLinear: (B, N, Din) @ (Din, Dout) -> (B, N, Dout)."""
    B, N, _ = x.shape
    Dout = w.shape[1]
    out = _rowwise_pallas(_linear_kernel, [x.reshape(B * N, -1)], [w],
                          Dout, x.dtype)
    return out.reshape(B, N, Dout)


def mha_core(q_proj, k_proj, v_proj, *, num_heads):
    """Multi-head scaled dot-product attention; inputs/outputs stay in the
    merged-head (B, N, E) layout (heads are handled inside the kernel)."""
    B, Nq, E = q_proj.shape
    Nk = k_proj.shape[1]
    hs = E // num_heads
    scale = 1.0 / math.sqrt(hs)

    tq, Nqp = _pick_seq_tile(Nq)
    tk, Nkp = _pick_seq_tile(Nk)
    needs_mask = Nkp != Nk

    q, k, v = q_proj, k_proj, v_proj
    if Nqp != Nq:                       # padded query rows sliced away below
        q = jnp.pad(q, ((0, 0), (0, Nqp - Nq), (0, 0)))
    if needs_mask:                      # padded keys masked to -inf in-kernel
        pad = ((0, 0), (0, Nkp - Nk), (0, 0))
        k, v = jnp.pad(k, pad), jnp.pad(v, pad)

    grid = (B, Nqp // tq, Nkp // tk)
    itemsize = jnp.dtype(q.dtype).itemsize
    cost = pl.CostEstimate(
        flops=int(2 * B * Nqp * Nkp * 2 * E),
        transcendentals=int(B * Nqp * Nkp * num_heads),
        bytes_accessed=int(itemsize * (q.size + (Nqp // tq) * (k.size + v.size)
                                       + B * Nqp * E)),
    )

    out = pl.pallas_call(
        functools.partial(_attn_kernel, scale=scale, num_heads=num_heads,
                          head_size=hs, nk=Nk, tk=tk, needs_mask=needs_mask),
        out_shape=jax.ShapeDtypeStruct((B, Nqp, E), q.dtype),
        grid_spec=pltpu.PrefetchScalarGridSpec(
            num_scalar_prefetch=0,
            grid=grid,
            in_specs=[
                pl.BlockSpec((1, tq, E), lambda b, qi, ki: (b, qi, 0)),
                pl.BlockSpec((1, tk, E), lambda b, qi, ki: (b, ki, 0)),
                pl.BlockSpec((1, tk, E), lambda b, qi, ki: (b, ki, 0)),
            ],
            out_specs=pl.BlockSpec((1, tq, E), lambda b, qi, ki: (b, qi, 0)),
            scratch_shapes=[
                pltpu.VMEM((tq, E), jnp.float32),          # scaled q (staged)
                pltpu.VMEM((tq, num_heads), jnp.float32),  # running max
                pltpu.VMEM((tq, num_heads), jnp.float32),  # running denom
                pltpu.VMEM((tq, E), jnp.float32),          # f32 accumulator
            ],
        ),
        compiler_params=pltpu.CompilerParams(
            dimension_semantics=("parallel", "parallel", "arbitrary"),
            vmem_limit_bytes=_VMEM_LIMIT),
        cost_estimate=cost,
    )(q, k, v)
    return out[:, :Nq, :]


def cross_attn_epilogue(attn, q_emb, wc, bc, wf, bf, g1, be1, g2, be2):
    B, N, E = attn.shape
    out = _rowwise_pallas(
        _epilogue_kernel,
        [attn.reshape(B * N, E), q_emb.reshape(B * N, E)],
        [wc, bc.reshape(1, -1), wf, bf.reshape(1, -1),
         g1.reshape(1, -1), be1.reshape(1, -1),
         g2.reshape(1, -1), be2.reshape(1, -1)],
        E, attn.dtype)
    return out.reshape(B, N, E)


# ----------------------------------------------------------------------------
# Full CrossAttention forward
# ----------------------------------------------------------------------------
def cross_attention_forward(params, h, x_context, x_target, *, num_heads):
    """Pallas forward pass of CrossAttention(h, x_context, x_target)."""
    # Embedding MLP fused with the bias-free key / query projections.
    k_proj = batch_mlp_key_proj(x_context, params["w1"], params["b1"],
                                params["w2"], params["b2"], params["wk"])
    q_emb, q_proj = batch_mlp_emb_query_proj(x_target, params["w1"],
                                             params["b1"], params["w2"],
                                             params["b2"], params["wq"])
    v_proj = batch_linear(h, params["wv"])

    # Multi-head attention (heads handled inside the kernel; merged layout).
    attn = mha_core(q_proj, k_proj, v_proj, num_heads=num_heads)

    # head_combine + residual + LN1 + ff + residual + LN2 (fused epilogue).
    # TODO(synk): DotProdAttention's optional linear_transform=True path is not
    # exercised by CrossAttention (MultiHeadAttention uses linear_transform=False).
    return cross_attn_epilogue(attn, q_emb,
                               params["wc"], params["bc"],
                               params["wf"], params["bf"],
                               params["g1"], params["be1"],
                               params["g2"], params["be2"])


# ----------------------------------------------------------------------------
# Pure-JAX reference (mirrors the PyTorch math)
# ----------------------------------------------------------------------------
def _reference_forward(params, h, x_context, x_target, *, num_heads):
    def mlp(x):
        y = jnp.maximum(x @ params["w1"] + params["b1"], 0.0)
        return y @ params["w2"] + params["b2"]

    def ln(x, g, b, eps=1e-5):
        mean = jnp.mean(x, axis=-1, keepdims=True)
        var = jnp.mean((x - mean) ** 2, axis=-1, keepdims=True)
        return (x - mean) / jnp.sqrt(var + eps) * g + b

    def split(o):                       # (B, N, E) -> (B, H, N, hs)
        B, N, E = o.shape
        hs = E // num_heads
        return o.reshape(B, N, num_heads, hs).transpose(0, 2, 1, 3)

    keys = mlp(x_context)
    queries = mlp(x_target)
    qh = split(queries @ params["wq"])
    kh = split(keys @ params["wk"])
    vh = split(h @ params["wv"])
    hs = qh.shape[-1]
    logits = jnp.einsum("bhqd,bhkd->bhqk", qh, kh) / jnp.sqrt(jnp.float32(hs))
    w = jax.nn.softmax(logits, axis=-1)
    attn = jnp.einsum("bhqk,bhkd->bhqd", w, vh)
    B, H, Nq, _ = attn.shape
    attn = attn.transpose(0, 2, 1, 3).reshape(B, Nq, H * hs)
    attn = attn @ params["wc"] + params["bc"]
    out1 = ln(attn + queries, params["g1"], params["be1"])
    return ln(out1 + (out1 @ params["wf"] + params["bf"]),
              params["g2"], params["be2"])


if __name__ == "__main__":
    # Shapes implied by CrossAttention defaults: input_dim=1, embedding_dim=128,
    # values_dim=128, num_heads=8; small batch / point counts for the demo.
    B, Nc, Nt = 2, 8, 8
    input_dim, E, H = 1, 128, 8

    key = jax.random.PRNGKey(0)
    ks = jax.random.split(key, 20)
    dt = jnp.float32
    h = jax.random.normal(ks[0], (B, Nc, E), dt)
    x_context = jax.random.normal(ks[1], (B, Nc, input_dim), dt)
    x_target = jax.random.normal(ks[2], (B, Nt, input_dim), dt)

    s = 0.1
    params = {
        "w1": s * jax.random.normal(ks[3], (input_dim, E), dt),
        "b1": s * jax.random.normal(ks[4], (E,), dt),
        "w2": s * jax.random.normal(ks[5], (E, E), dt),
        "b2": s * jax.random.normal(ks[6], (E,), dt),
        "wk": s * jax.random.normal(ks[7], (E, E), dt),
        "wq": s * jax.random.normal(ks[8], (E, E), dt),
        "wv": s * jax.random.normal(ks[9], (E, E), dt),
        "wc": s * jax.random.normal(ks[10], (E, E), dt),
        "bc": s * jax.random.normal(ks[11], (E,), dt),
        "wf": s * jax.random.normal(ks[12], (E, E), dt),
        "bf": s * jax.random.normal(ks[13], (E,), dt),
        "g1": 1.0 + s * jax.random.normal(ks[14], (E,), dt),
        "be1": s * jax.random.normal(ks[15], (E,), dt),
        "g2": 1.0 + s * jax.random.normal(ks[16], (E,), dt),
        "be2": s * jax.random.normal(ks[17], (E,), dt),
    }

    fwd = jax.jit(functools.partial(cross_attention_forward, num_heads=H))
    out = jax.block_until_ready(fwd(params, h, x_context, x_target))

    ref = _reference_forward(params, h, x_context, x_target, num_heads=H)
    assert out.shape == (B, Nt, E)
    # approx reciprocal (EUP) in the softmax denominator loosens exactness
    # slightly vs the all-f32 reference; everything else accumulates in f32.
    assert jnp.allclose(out, ref, atol=1e-2, rtol=1e-2), "mismatch vs reference"
    print("KERNEL_OK")
</pallas_src>

<mosaic_0001>
module attributes {stable_mosaic.version = 11 : i64} {
  func.func @_mlp_proj_kernel(%arg0: i32, %arg1: memref<8x1xf32, #tpu.memory_space<vmem>>, %arg2: memref<1x128xf32, #tpu.memory_space<vmem>>, %arg3: memref<1x128xf32, #tpu.memory_space<vmem>>, %arg4: memref<128x128xf32, #tpu.memory_space<vmem>>, %arg5: memref<1x128xf32, #tpu.memory_space<vmem>>, %arg6: memref<128x128xf32, #tpu.memory_space<vmem>>, %arg7: memref<8x128xf32, #tpu.memory_space<vmem>>) attributes {dimension_semantics = [#tpu.dimension_semantics<parallel>], iteration_bounds = array<i64: 2>, scalar_prefetch = 0 : i64, scratch_operands = 0 : i64, tpu.core_type = #tpu.core_type<tc>, window_params = [{transform_indices = @transform_0, window_bounds = array<i64: 8, 1>}, {pipeline_mode = #tpu.pipeline_mode<synchronous>, transform_indices = @transform_1, window_bounds = array<i64: 1, 128>}, {pipeline_mode = #tpu.pipeline_mode<synchronous>, transform_indices = @transform_2, window_bounds = array<i64: 1, 128>}, {pipeline_mode = #tpu.pipeline_mode<synchronous>, transform_indices = @transform_3, window_bounds = array<i64: 128, 128>}, {pipeline_mode = #tpu.pipeline_mode<synchronous>, transform_indices = @transform_4, window_bounds = array<i64: 1, 128>}, {pipeline_mode = #tpu.pipeline_mode<synchronous>, transform_indices = @transform_5, window_bounds = array<i64: 128, 128>}, {transform_indices = @transform_6, window_bounds = array<i64: 8, 128>}]} {
    %c0 = arith.constant 0 : index
    %c0_0 = arith.constant 0 : index
    %0 = vector.load %arg1[%c0, %c0_0] : memref<8x1xf32, #tpu.memory_space<vmem>>, vector<8x1xf32>
    %c0_1 = arith.constant 0 : index
    %c0_2 = arith.constant 0 : index
    %1 = vector.load %arg3[%c0_1, %c0_2] : memref<1x128xf32, #tpu.memory_space<vmem>>, vector<1x128xf32>
    %c0_3 = arith.constant 0 : index
    %c0_4 = arith.constant 0 : index
    %2 = vector.load %arg2[%c0_3, %c0_4] : memref<1x128xf32, #tpu.memory_space<vmem>>, vector<1x128xf32>
    %3 = vector.broadcast %0 : vector<8x1xf32> to vector<8x128xf32>
    %4 = vector.broadcast %2 : vector<1x128xf32> to vector<8x128xf32>
    %5 = arith.mulf %3, %4 : vector<8x128xf32>
    %6 = vector.broadcast %1 : vector<1x128xf32> to vector<8x128xf32>
    %7 = arith.addf %6, %5 : vector<8x128xf32>
    %cst = arith.constant 0.000000e+00 : f32
    %8 = vector.broadcast %cst : f32 to vector<8x128xf32>
    %9 = arith.maximumf %7, %8 : vector<8x128xf32>
    %c0_5 = arith.constant 0 : index
    %c0_6 = arith.constant 0 : index
    %10 = vector.load %arg4[%c0_5, %c0_6] : memref<128x128xf32, #tpu.memory_space<vmem>>, vector<128x128xf32>
    %cst_7 = arith.constant dense<0.000000e+00> : vector<8x128xf32>
    %11 = tpu.matmul %9, %10, %cst_7 {dimension_numbers = #tpu.dot_dimension_numbers<[1], [0], [0], [1], [0, 0, 1, 1], [], []>} : vector<8x128xf32>, vector<128x128xf32>, vector<8x128xf32> -> vector<8x128xf32>
    %c0_8 = arith.constant 0 : index
    %c0_9 = arith.constant 0 : index
    %12 = vector.load %arg5[%c0_8, %c0_9] : memref<1x128xf32, #tpu.memory_space<vmem>>, vector<1x128xf32>
    %13 = vector.broadcast %12 : vector<1x128xf32> to vector<8x128xf32>
    %14 = arith.addf %11, %13 : vector<8x128xf32>
    %c0_10 = arith.constant 0 : index
    %c0_11 = arith.constant 0 : index
    %15 = vector.load %arg6[%c0_10, %c0_11] : memref<128x128xf32, #tpu.memory_space<vmem>>, vector<128x128xf32>
    %cst_12 = arith.constant dense<0.000000e+00> : vector<8x128xf32>
    %16 = tpu.matmul %14, %15, %cst_12 {dimension_numbers = #tpu.dot_dimension_numbers<[1], [0], [0], [1], [0, 0, 1, 1], [], []>} : vector<8x128xf32>, vector<128x128xf32>, vector<8x128xf32> -> vector<8x128xf32>
    %c0_13 = arith.constant 0 : index
    %c0_14 = arith.constant 0 : index
    %17 = vector.load %arg7[%c0_13, %c0_14] : memref<8x128xf32, #tpu.memory_space<vmem>>, vector<8x128xf32>
    tpu.vector_store %arg7[%c0_13, %c0_14], %16 {strides = array<i32>} : memref<8x128xf32, #tpu.memory_space<vmem>>, vector<8x128xf32>,
    return
  }
  func.func @transform_0(%arg0: i32) -> (i32, i32) {
    %c0_i32 = arith.constant 0 : i32
    %c0_i32_0 = arith.constant 0 : i32
    return %arg0, %c0_i32 : i32, i32
  }
  func.func @transform_1(%arg0: i32) -> (i32, i32) {
    %c0_i32 = arith.constant 0 : i32
    %c0_i32_0 = arith.constant 0 : i32
    %c0_i32_1 = arith.constant 0 : i32
    return %c0_i32, %c0_i32_0 : i32, i32
  }
  func.func @transform_2(%arg0: i32) -> (i32, i32) {
    %c0_i32 = arith.constant 0 : i32
    %c0_i32_0 = arith.constant 0 : i32
    %c0_i32_1 = arith.constant 0 : i32
    return %c0_i32, %c0_i32_0 : i32, i32
  }
  func.func @transform_3(%arg0: i32) -> (i32, i32) {
    %c0_i32 = arith.constant 0 : i32
    %c0_i32_0 = arith.constant 0 : i32
    %c0_i32_1 = arith.constant 0 : i32
    return %c0_i32, %c0_i32_0 : i32, i32
  }
  func.func @transform_4(%arg0: i32) -> (i32, i32) {
    %c0_i32 = arith.constant 0 : i32
    %c0_i32_0 = arith.constant 0 : i32
    %c0_i32_1 = arith.constant 0 : i32
    return %c0_i32, %c0_i32_0 : i32, i32
  }
  func.func @transform_5(%arg0: i32) -> (i32, i32) {
    %c0_i32 = arith.constant 0 : i32
    %c0_i32_0 = arith.constant 0 : i32
    %c0_i32_1 = arith.constant 0 : i32
    return %c0_i32, %c0_i32_0 : i32, i32
  }
  func.func @transform_6(%arg0: i32) -> (i32, i32) {
    %c0_i32 = arith.constant 0 : i32
    %c0_i32_0 = arith.constant 0 : i32
    return %arg0, %c0_i32 : i32, i32
  }
}

module attributes {stable_mosaic.version = 11 : i64} {
  func.func @_linear_kernel(%arg0: i32, %arg1: memref<8x128xf32, #tpu.memory_space<vmem>>, %arg2: memref<128x128xf32, #tpu.memory_space<vmem>>, %arg3: memref<8x128xf32, #tpu.memory_space<vmem>>) attributes {dimension_semantics = [#tpu.dimension_semantics<parallel>], iteration_bounds = array<i64: 2>, scalar_prefetch = 0 : i64, scratch_operands = 0 : i64, tpu.core_type = #tpu.core_type<tc>, window_params = [{transform_indices = @transform_0, window_bounds = array<i64: 8, 128>}, {pipeline_mode = #tpu.pipeline_mode<synchronous>, transform_indices = @transform_1, window_bounds = array<i64: 128, 128>}, {transform_indices = @transform_2, window_bounds = array<i64: 8, 128>}]} {
    %c0 = arith.constant 0 : index
    %c0_0 = arith.constant 0 : index
    %0 = vector.load %arg1[%c0, %c0_0] : memref<8x128xf32, #tpu.memory_space<vmem>>, vector<8x128xf32>
    %c0_1 = arith.constant 0 : index
    %c0_2 = arith.constant 0 : index
    %1 = vector.load %arg2[%c0_1, %c0_2] : memref<128x128xf32, #tpu.memory_space<vmem>>, vector<128x128xf32>
    %cst = arith.constant dense<0.000000e+00> : vector<8x128xf32>
    %2 = tpu.matmul %0, %1, %cst {dimension_numbers = #tpu.dot_dimension_numbers<[1], [0], [0], [1], [0, 0, 1, 1], [], []>} : vector<8x128xf32>, vector<128x128xf32>, vector<8x128xf32> -> vector<8x128xf32>
    %c0_3 = arith.constant 0 : index
    %c0_4 = arith.constant 0 : index
    %3 = vector.load %arg3[%c0_3, %c0_4] : memref<8x128xf32, #tpu.memory_space<vmem>>, vector<8x128xf32>
    tpu.vector_store %arg3[%c0_3, %c0_4], %2 {strides = array<i32>} : memref<8x128xf32, #tpu.memory_space<vmem>>, vector<8x128xf32>,
    return
  }
  func.func @transform_0(%arg0: i32) -> (i32, i32) {
    %c0_i32 = arith.constant 0 : i32
    %c0_i32_0 = arith.constant 0 : i32
    return %arg0, %c0_i32 : i32, i32
  }
  func.func @transform_1(%arg0: i32) -> (i32, i32) {
    %c0_i32 = arith.constant 0 : i32
    %c0_i32_0 = arith.constant 0 : i32
    %c0_i32_1 = arith.constant 0 : i32
    return %c0_i32, %c0_i32_0 : i32, i32
  }
  func.func @transform_2(%arg0: i32) -> (i32, i32) {
    %c0_i32 = arith.constant 0 : i32
    %c0_i32_0 = arith.constant 0 : i32
    return %arg0, %c0_i32 : i32, i32
  }
}

module attributes {stable_mosaic.version = 11 : i64} {
  func.func @_mlp_emb_proj_kernel(%arg0: i32, %arg1: memref<8x1xf32, #tpu.memory_space<vmem>>, %arg2: memref<1x128xf32, #tpu.memory_space<vmem>>, %arg3: memref<1x128xf32, #tpu.memory_space<vmem>>, %arg4: memref<128x128xf32, #tpu.memory_space<vmem>>, %arg5: memref<1x128xf32, #tpu.memory_space<vmem>>, %arg6: memref<128x128xf32, #tpu.memory_space<vmem>>, %arg7: memref<8x128xf32, #tpu.memory_space<vmem>>, %arg8: memref<8x128xf32, #tpu.memory_space<vmem>>) attributes {dimension_semantics = [#tpu.dimension_semantics<parallel>], iteration_bounds = array<i64: 2>, scalar_prefetch = 0 : i64, scratch_operands = 0 : i64, tpu.core_type = #tpu.core_type<tc>, window_params = [{transform_indices = @transform_0, window_bounds = array<i64: 8, 1>}, {pipeline_mode = #tpu.pipeline_mode<synchronous>, transform_indices = @transform_1, window_bounds = array<i64: 1, 128>}, {pipeline_mode = #tpu.pipeline_mode<synchronous>, transform_indices = @transform_2, window_bounds = array<i64: 1, 128>}, {pipeline_mode = #tpu.pipeline_mode<synchronous>, transform_indices = @transform_3, window_bounds = array<i64: 128, 128>}, {pipeline_mode = #tpu.pipeline_mode<synchronous>, transform_indices = @transform_4, window_bounds = array<i64: 1, 128>}, {pipeline_mode = #tpu.pipeline_mode<synchronous>, transform_indices = @transform_5, window_bounds = array<i64: 128, 128>}, {transform_indices = @transform_6, window_bounds = array<i64: 8, 128>}, {transform_indices = @transform_7, window_bounds = array<i64: 8, 128>}]} {
    %c0 = arith.constant 0 : index
    %c0_0 = arith.constant 0 : index
    %0 = vector.load %arg1[%c0, %c0_0] : memref<8x1xf32, #tpu.memory_space<vmem>>, vector<8x1xf32>
    %c0_1 = arith.constant 0 : index
    %c0_2 = arith.constant 0 : index
    %1 = vector.load %arg3[%c0_1, %c0_2] : memref<1x128xf32, #tpu.memory_space<vmem>>, vector<1x128xf32>
    %c0_3 = arith.constant 0 : index
    %c0_4 = arith.constant 0 : index
    %2 = vector.load %arg2[%c0_3, %c0_4] : memref<1x128xf32, #tpu.memory_space<vmem>>, vector<1x128xf32>
    %3 = vector.broadcast %0 : vector<8x1xf32> to vector<8x128xf32>
    %4 = vector.broadcast %2 : vector<1x128xf32> to vector<8x128xf32>
    %5 = arith.mulf %3, %4 : vector<8x128xf32>
    %6 = vector.broadcast %1 : vector<1x128xf32> to vector<8x128xf32>
    %7 = arith.addf %6, %5 : vector<8x128xf32>
    %cst = arith.constant 0.000000e+00 : f32
    %8 = vector.broadcast %cst : f32 to vector<8x128xf32>
    %9 = arith.maximumf %7, %8 : vector<8x128xf32>
    %c0_5 = arith.constant 0 : index
    %c0_6 = arith.constant 0 : index
    %10 = vector.load %arg4[%c0_5, %c0_6] : memref<128x128xf32, #tpu.memory_space<vmem>>, vector<128x128xf32>
    %cst_7 = arith.constant dense<0.000000e+00> : vector<8x128xf32>
    %11 = tpu.matmul %9, %10, %cst_7 {dimension_numbers = #tpu.dot_dimension_numbers<[1], [0], [0], [1], [0, 0, 1, 1], [], []>} : vector<8x128xf32>, vector<128x128xf32>, vector<8x128xf32> -> vector<8x128xf32>
    %c0_8 = arith.constant 0 : index
    %c0_9 = arith.constant 0 : index
    %12 = vector.load %arg5[%c0_8, %c0_9] : memref<1x128xf32, #tpu.memory_space<vmem>>, vector<1x128xf32>
    %13 = vector.broadcast %12 : vector<1x128xf32> to vector<8x128xf32>
    %14 = arith.addf %11, %13 : vector<8x128xf32>
    %c0_10 = arith.constant 0 : index
    %c0_11 = arith.constant 0 : index
    %15 = vector.load %arg7[%c0_10, %c0_11] : memref<8x128xf32, #tpu.memory_space<vmem>>, vector<8x128xf32>
    tpu.vector_store %arg7[%c0_10, %c0_11], %14 {strides = array<i32>} : memref<8x128xf32, #tpu.memory_space<vmem>>, vector<8x128xf32>,
    %c0_12 = arith.constant 0 : index
    %c0_13 = arith.constant 0 : index
    %16 = vector.load %arg6[%c0_12, %c0_13] : memref<128x128xf32, #tpu.memory_space<vmem>>, vector<128x128xf32>
    %cst_14 = arith.constant dense<0.000000e+00> : vector<8x128xf32>
    %17 = tpu.matmul %14, %16, %cst_14 {dimension_numbers = #tpu.dot_dimension_numbers<[1], [0], [0], [1], [0, 0, 1, 1], [], []>} : vector<8x128xf32>, vector<128x128xf32>, vector<8x128xf32> -> vector<8x128xf32>
    %c0_15 = arith.constant 0 : index
    %c0_16 = arith.constant 0 : index
    %18 = vector.load %arg8[%c0_15, %c0_16] : memref<8x128xf32, #tpu.memory_space<vmem>>, vector<8x128xf32>
    tpu.vector_store %arg8[%c0_15, %c0_16], %17 {strides = array<i32>} : memref<8x128xf32, #tpu.memory_space<vmem>>, vector<8x128xf32>,
    return
  }
  func.func @transform_0(%arg0: i32) -> (i32, i32) {
    %c0_i32 = arith.constant 0 : i32
    %c0_i32_0 = arith.constant 0 : i32
    return %arg0, %c0_i32 : i32, i32
  }
  func.func @transform_1(%arg0: i32) -> (i32, i32) {
    %c0_i32 = arith.constant 0 : i32
    %c0_i32_0 = arith.constant 0 : i32
    %c0_i32_1 = arith.constant 0 : i32
    return %c0_i32, %c0_i32_0 : i32, i32
  }
  func.func @transform_2(%arg0: i32) -> (i32, i32) {
    %c0_i32 = arith.constant 0 : i32
    %c0_i32_0 = arith.constant 0 : i32
    %c0_i32_1 = arith.constant 0 : i32
    return %c0_i32, %c0_i32_0 : i32, i32
  }
  func.func @transform_3(%arg0: i32) -> (i32, i32) {
    %c0_i32 = arith.constant 0 : i32
    %c0_i32_0 = arith.constant 0 : i32
    %c0_i32_1 = arith.constant 0 : i32
    return %c0_i32, %c0_i32_0 : i32, i32
  }
  func.func @transform_4(%arg0: i32) -> (i32, i32) {
    %c0_i32 = arith.constant 0 : i32
    %c0_i32_0 = arith.constant 0 : i32
    %c0_i32_1 = arith.constant 0 : i32
    return %c0_i32, %c0_i32_0 : i32, i32
  }
  func.func @transform_5(%arg0: i32) -> (i32, i32) {
    %c0_i32 = arith.constant 0 : i32
    %c0_i32_0 = arith.constant 0 : i32
    %c0_i32_1 = arith.constant 0 : i32
    return %c0_i32, %c0_i32_0 : i32, i32
  }
  func.func @transform_6(%arg0: i32) -> (i32, i32) {
    %c0_i32 = arith.constant 0 : i32
    %c0_i32_0 = arith.constant 0 : i32
    return %arg0, %c0_i32 : i32, i32
  }
  func.func @transform_7(%arg0: i32) -> (i32, i32) {
    %c0_i32 = arith.constant 0 : i32
    %c0_i32_0 = arith.constant 0 : i32
    return %arg0, %c0_i32 : i32, i32
  }
}

module attributes {stable_mosaic.version = 11 : i64} {
  func.func @_attn_kernel(%arg0: i32, %arg1: i32, %arg2: i32, %arg3: memref<1x8x128xf32, #tpu.memory_space<vmem>>, %arg4: memref<1x8x128xf32, #tpu.memory_space<vmem>>, %arg5: memref<1x8x128xf32, #tpu.memory_space<vmem>>, %arg6: memref<1x8x128xf32, #tpu.memory_space<vmem>>, %arg7: memref<8x128xf32, #tpu.memory_space<vmem>>, %arg8: memref<8x8xf32, #tpu.memory_space<vmem>>, %arg9: memref<8x8xf32, #tpu.memory_space<vmem>>, %arg10: memref<8x128xf32, #tpu.memory_space<vmem>>) attributes {dimension_semantics = [#tpu.dimension_semantics<parallel>, #tpu.dimension_semantics<parallel>, #tpu.dimension_semantics<arbitrary>], iteration_bounds = array<i64: 2, 1, 1>, scalar_prefetch = 0 : i64, scratch_operands = 4 : i64, tpu.core_type = #tpu.core_type<tc>, window_params = [{transform_indices = @transform_0, window_bounds = array<i64: 1, 8, 128>}, {transform_indices = @transform_1, window_bounds = array<i64: 1, 8, 128>}, {transform_indices = @transform_2, window_bounds = array<i64: 1, 8, 128>}, {transform_indices = @transform_3, window_bounds = array<i64: 1, 8, 128>}]} {
    %c0_i32 = arith.constant 0 : i32
    %0 = arith.cmpi eq, %arg2, %c0_i32 : i32
    %1 = arith.extui %0 : i1 to i32
    %c0_i32_0 = arith.constant 0 : i32
    %2 = arith.cmpi ne, %1, %c0_i32_0 : i32
    scf.if %2 {
      %c0_137 = arith.constant 0 : index
      %c0_138 = arith.constant 0 : index
      %c0_139 = arith.constant 0 : index
      %218 = vector.load %arg3[%c0_137, %c0_138, %c0_139] : memref<1x8x128xf32, #tpu.memory_space<vmem>>, vector<1x8x128xf32>
      %219 = vector.shape_cast %218 : vector<1x8x128xf32> to vector<8x128xf32>
      %cst_140 = arith.constant 2.500000e-01 : f32
      %220 = vector.broadcast %cst_140 : f32 to vector<8x128xf32>
      %221 = arith.mulf %219, %220 : vector<8x128xf32>
      %c0_141 = arith.constant 0 : index
      %c0_142 = arith.constant 0 : index
      %222 = vector.load %arg7[%c0_141, %c0_142] : memref<8x128xf32, #tpu.memory_space<vmem>>, vector<8x128xf32>
      tpu.vector_store %arg7[%c0_141, %c0_142], %221 {strides = array<i32>} : memref<8x128xf32, #tpu.memory_space<vmem>>, vector<8x128xf32>,
      %cst_143 = arith.constant 0xFF800000 : f32
      %223 = vector.broadcast %cst_143 : f32 to vector<8x8xf32>
      %c0_144 = arith.constant 0 : index
      %c0_145 = arith.constant 0 : index
      %224 = vector.load %arg8[%c0_144, %c0_145] : memref<8x8xf32, #tpu.memory_space<vmem>>, vector<8x8xf32>
      tpu.vector_store %arg8[%c0_144, %c0_145], %223 {strides = array<i32>} : memref<8x8xf32, #tpu.memory_space<vmem>>, vector<8x8xf32>,
      %cst_146 = arith.constant 0.000000e+00 : f32
      %225 = vector.broadcast %cst_146 : f32 to vector<8x8xf32>
      %c0_147 = arith.constant 0 : index
      %c0_148 = arith.constant 0 : index
      %226 = vector.load %arg9[%c0_147, %c0_148] : memref<8x8xf32, #tpu.memory_space<vmem>>, vector<8x8xf32>
      tpu.vector_store %arg9[%c0_147, %c0_148], %225 {strides = array<i32>} : memref<8x8xf32, #tpu.memory_space<vmem>>, vector<8x8xf32>,
      %cst_149 = arith.constant 0.000000e+00 : f32
      %227 = vector.broadcast %cst_149 : f32 to vector<8x128xf32>
      %c0_150 = arith.constant 0 : index
      %c0_151 = arith.constant 0 : index
      %228 = vector.load %arg10[%c0_150, %c0_151] : memref<8x128xf32, #tpu.memory_space<vmem>>, vector<8x128xf32>
      tpu.vector_store %arg10[%c0_150, %c0_151], %227 {strides = array<i32>} : memref<8x128xf32, #tpu.memory_space<vmem>>, vector<8x128xf32>,
    } else {
    }
    %c0 = arith.constant 0 : index
    %c0_1 = arith.constant 0 : index
    %c0_2 = arith.constant 0 : index
    %3 = vector.load %arg4[%c0, %c0_1, %c0_2] : memref<1x8x128xf32, #tpu.memory_space<vmem>>, vector<1x8x128xf32>
    %4 = vector.shape_cast %3 : vector<1x8x128xf32> to vector<8x128xf32>
    %c0_3 = arith.constant 0 : index
    %c0_4 = arith.constant 0 : index
    %c0_5 = arith.constant 0 : index
    %5 = vector.load %arg5[%c0_3, %c0_4, %c0_5] : memref<1x8x128xf32, #tpu.memory_space<vmem>>, vector<1x8x128xf32>
    %6 = vector.shape_cast %5 : vector<1x8x128xf32> to vector<8x128xf32>
    %c0_6 = arith.constant 0 : index
    %c0_7 = arith.constant 0 : index
    %7 = vector.load %arg7[%c0_6, %c0_7] : memref<8x128xf32, #tpu.memory_space<vmem>>, vector<8x16xf32>
    %8 = vector.extract_strided_slice %4 {offsets = [0, 0], sizes = [8, 16], strides = [1, 1]} : vector<8x128xf32> to vector<8x16xf32>
    %cst = arith.constant dense<0.000000e+00> : vector<8x8xf32>
    %9 = tpu.matmul %7, %8, %cst {dimension_numbers = #tpu.dot_dimension_numbers<[1], [1], [0], [0], [0, 0, 1, 0], [], []>} : vector<8x16xf32>, vector<8x16xf32>, vector<8x8xf32> -> vector<8x8xf32>
    %c0_8 = arith.constant 0 : index
    %c0_9 = arith.constant 0 : index
    %10 = vector.load %arg8[%c0_8, %c0_9] : memref<8x8xf32, #tpu.memory_space<vmem>>, vector<8x1xf32>
    %cst_10 = arith.constant dense<0xFF800000> : vector<8xf32>
    %11 = vector.multi_reduction <maximumf>, %9, %cst_10 [1] : vector<8x8xf32> to vector<8xf32>
    %12 = vector.shape_cast %11 : vector<8xf32> to vector<8x1xf32>
    %13 = arith.maximumf %10, %12 : vector<8x1xf32>
    %14 = arith.subf %10, %13 : vector<8x1xf32>
    %15 = math.exp %14 : vector<8x1xf32>
    %16 = vector.broadcast %13 : vector<8x1xf32> to vector<8x8xf32>
    %17 = arith.subf %9, %16 : vector<8x8xf32>
    %18 = math.exp %17 : vector<8x8xf32>
    %c0_11 = arith.constant 0 : index
    %c0_12 = arith.constant 0 : index
    %19 = vector.load %arg9[%c0_11, %c0_12] : memref<8x8xf32, #tpu.memory_space<vmem>>, vector<8x1xf32>
    %20 = arith.mulf %15, %19 : vector<8x1xf32>
    %cst_13 = arith.constant dense<0.000000e+00> : vector<8xf32>
    %21 = vector.multi_reduction <add>, %18, %cst_13 [1] : vector<8x8xf32> to vector<8xf32>
    %22 = vector.shape_cast %21 : vector<8xf32> to vector<8x1xf32>
    %23 = arith.addf %20, %22 : vector<8x1xf32>
    %c0_14 = arith.constant 0 : index
    %c0_15 = arith.constant 0 : index
    %24 = vector.load %arg9[%c0_14, %c0_15] : memref<8x8xf32, #tpu.memory_space<vmem>>, vector<8x1xf32>
    tpu.vector_store %arg9[%c0_14, %c0_15], %23 {strides = array<i32>} : memref<8x8xf32, #tpu.memory_space<vmem>>, vector<8x1xf32>,
    %25 = vector.extract_strided_slice %6 {offsets = [0, 0], sizes = [8, 16], strides = [1, 1]} : vector<8x128xf32> to vector<8x16xf32>
    %cst_16 = arith.constant dense<0.000000e+00> : vector<8x16xf32>
    %26 = tpu.matmul %18, %25, %cst_16 {dimension_numbers = #tpu.dot_dimension_numbers<[1], [0], [0], [1], [0, 0, 1, 1], [], []>} : vector<8x8xf32>, vector<8x16xf32>, vector<8x16xf32> -> vector<8x16xf32>
    %c0_17 = arith.constant 0 : index
    %c0_18 = arith.constant 0 : index
    %27 = vector.load %arg10[%c0_17, %c0_18] : memref<8x128xf32, #tpu.memory_space<vmem>>, vector<8x16xf32>
    %28 = vector.broadcast %15 : vector<8x1xf32> to vector<8x16xf32>
    %29 = arith.mulf %28, %27 : vector<8x16xf32>
    %30 = arith.addf %29, %26 : vector<8x16xf32>
    %c0_19 = arith.constant 0 : index
    %c0_20 = arith.constant 0 : index
    %31 = vector.load %arg10[%c0_19, %c0_20] : memref<8x128xf32, #tpu.memory_space<vmem>>, vector<8x16xf32>
    tpu.vector_store %arg10[%c0_19, %c0_20], %30 {strides = array<i32>} : memref<8x128xf32, #tpu.memory_space<vmem>>, vector<8x16xf32>,
    %c0_21 = arith.constant 0 : index
    %c0_22 = arith.constant 0 : index
    %32 = vector.load %arg8[%c0_21, %c0_22] : memref<8x8xf32, #tpu.memory_space<vmem>>, vector<8x1xf32>
    tpu.vector_store %arg8[%c0_21, %c0_22], %13 {strides = array<i32>} : memref<8x8xf32, #tpu.memory_space<vmem>>, vector<8x1xf32>,
    %c0_23 = arith.constant 0 : index
    %c16 = arith.constant 16 : index
    %33 = vector.load %arg7[%c0_23, %c16] : memref<8x128xf32, #tpu.memory_space<vmem>>, vector<8x16xf32>
    %34 = vector.extract_strided_slice %4 {offsets = [0, 16], sizes = [8, 16], strides = [1, 1]} : vector<8x128xf32> to vector<8x16xf32>
    %cst_24 = arith.constant dense<0.000000e+00> : vector<8x8xf32>
    %35 = tpu.matmul %33, %34, %cst_24 {dimension_numbers = #tpu.dot_dimension_numbers<[1], [1], [0], [0], [0, 0, 1, 0], [], []>} : vector<8x16xf32>, vector<8x16xf32>, vector<8x8xf32> -> vector<8x8xf32>
    %c0_25 = arith.constant 0 : index
    %c1 = arith.constant 1 : index
    %36 = vector.load %arg8[%c0_25, %c1] : memref<8x8xf32, #tpu.memory_space<vmem>>, vector<8x1xf32>
    %cst_26 = arith.constant dense<0xFF800000> : vector<8xf32>
    %37 = vector.multi_reduction <maximumf>, %35, %cst_26 [1] : vector<8x8xf32> to vector<8xf32>
    %38 = vector.shape_cast %37 : vector<8xf32> to vector<8x1xf32>
    %39 = arith.maximumf %36, %38 : vector<8x1xf32>
    %40 = arith.subf %36, %39 : vector<8x1xf32>
    %41 = math.exp %40 : vector<8x1xf32>
    %42 = vector.broadcast %39 : vector<8x1xf32> to vector<8x8xf32>
    %43 = arith.subf %35, %42 : vector<8x8xf32>
    %44 = math.exp %43 : vector<8x8xf32>
    %c0_27 = arith.constant 0 : index
    %c1_28 = arith.constant 1 : index
    %45 = vector.load %arg9[%c0_27, %c1_28] : memref<8x8xf32, #tpu.memory_space<vmem>>, vector<8x1xf32>
    %46 = arith.mulf %41, %45 : vector<8x1xf32>
    %cst_29 = arith.constant dense<0.000000e+00> : vector<8xf32>
    %47 = vector.multi_reduction <add>, %44, %cst_29 [1] : vector<8x8xf32> to vector<8xf32>
    %48 = vector.shape_cast %47 : vector<8xf32> to vector<8x1xf32>
    %49 = arith.addf %46, %48 : vector<8x1xf32>
    %c0_30 = arith.constant 0 : index
    %c1_31 = arith.constant 1 : index
    %50 = vector.load %arg9[%c0_30, %c1_31] : memref<8x8xf32, #tpu.memory_space<vmem>>, vector<8x1xf32>
    tpu.vector_store %arg9[%c0_30, %c1_31], %49 {strides = array<i32>} : memref<8x8xf32, #tpu.memory_space<vmem>>, vector<8x1xf32>,
    %51 = vector.extract_strided_slice %6 {offsets = [0, 16], sizes = [8, 16], strides = [1, 1]} : vector<8x128xf32> to vector<8x16xf32>
    %cst_32 = arith.constant dense<0.000000e+00> : vector<8x16xf32>
    %52 = tpu.matmul %44, %51, %cst_32 {dimension_numbers = #tpu.dot_dimension_numbers<[1], [0], [0], [1], [0, 0, 1, 1], [], []>} : vector<8x8xf32>, vector<8x16xf32>, vector<8x16xf32> -> vector<8x16xf32>
    %c0_33 = arith.constant 0 : index
    %c16_34 = arith.constant 16 : index
    %53 = vector.load %arg10[%c0_33, %c16_34] : memref<8x128xf32, #tpu.memory_space<vmem>>, vector<8x16xf32>
    %54 = vector.broadcast %41 : vector<8x1xf32> to vector<8x16xf32>
    %55 = arith.mulf %54, %53 : vector<8x16xf32>
    %56 = arith.addf %55, %52 : vector<8x16xf32>
    %c0_35 = arith.constant 0 : index
    %c16_36 = arith.constant 16 : index
    %57 = vector.load %arg10[%c0_35, %c16_36] : memref<8x128xf32, #tpu.memory_space<vmem>>, vector<8x16xf32>
    tpu.vector_store %arg10[%c0_35, %c16_36], %56 {strides = array<i32>} : memref<8x128xf32, #tpu.memory_space<vmem>>, vector<8x16xf32>,
    %c0_37 = arith.constant 0 : index
    %c1_38 = arith.constant 1 : index
    %58 = vector.load %arg8[%c0_37, %c1_38] : memref<8x8xf32, #tpu.memory_space<vmem>>, vector<8x1xf32>
    tpu.vector_store %arg8[%c0_37, %c1_38], %39 {strides = array<i32>} : memref<8x8xf32, #tpu.memory_space<vmem>>, vector<8x1xf32>,
    %c0_39 = arith.constant 0 : index
    %c32 = arith.constant 32 : index
    %59 = vector.load %arg7[%c0_39, %c32] : memref<8x128xf32, #tpu.memory_space<vmem>>, vector<8x16xf32>
    %60 = vector.extract_strided_slice %4 {offsets = [0, 32], sizes = [8, 16], strides = [1, 1]} : vector<8x128xf32> to vector<8x16xf32>
    %cst_40 = arith.constant dense<0.000000e+00> : vector<8x8xf32>
    %61 = tpu.matmul %59, %60, %cst_40 {dimension_numbers = #tpu.dot_dimension_numbers<[1], [1], [0], [0], [0, 0, 1, 0], [], []>} : vector<8x16xf32>, vector<8x16xf32>, vector<8x8xf32> -> vector<8x8xf32>
    %c0_41 = arith.constant 0 : index
    %c2 = arith.constant 2 : index
    %62 = vector.load %arg8[%c0_41, %c2] : memref<8x8xf32, #tpu.memory_space<vmem>>, vector<8x1xf32>
    %cst_42 = arith.constant dense<0xFF800000> : vector<8xf32>
    %63 = vector.multi_reduction <maximumf>, %61, %cst_42 [1] : vector<8x8xf32> to vector<8xf32>
    %64 = vector.shape_cast %63 : vector<8xf32> to vector<8x1xf32>
    %65 = arith.maximumf %62, %64 : vector<8x1xf32>
    %66 = arith.subf %62, %65 : vector<8x1xf32>
    %67 = math.exp %66 : vector<8x1xf32>
    %68 = vector.broadcast %65 : vector<8x1xf32> to vector<8x8xf32>
    %69 = arith.subf %61, %68 : vector<8x8xf32>
    %70 = math.exp %69 : vector<8x8xf32>
    %c0_43 = arith.constant 0 : index
    %c2_44 = arith.constant 2 : index
    %71 = vector.load %arg9[%c0_43, %c2_44] : memref<8x8xf32, #tpu.memory_space<vmem>>, vector<8x1xf32>
    %72 = arith.mulf %67, %71 : vector<8x1xf32>
    %cst_45 = arith.constant dense<0.000000e+00> : vector<8xf32>
    %73 = vector.multi_reduction <add>, %70, %cst_45 [1] : vector<8x8xf32> to vector<8xf32>
    %74 = vector.shape_cast %73 : vector<8xf32> to vector<8x1xf32>
    %75 = arith.addf %72, %74 : vector<8x1xf32>
    %c0_46 = arith.constant 0 : index
    %c2_47 = arith.constant 2 : index
    %76 = vector.load %arg9[%c0_46, %c2_47] : memref<8x8xf32, #tpu.memory_space<vmem>>, vector<8x1xf32>
    tpu.vector_store %arg9[%c0_46, %c2_47], %75 {strides = array<i32>} : memref<8x8xf32, #tpu.memory_space<vmem>>, vector<8x1xf32>,
    %77 = vector.extract_strided_slice %6 {offsets = [0, 32], sizes = [8, 16], strides = [1, 1]} : vector<8x128xf32> to vector<8x16xf32>
    %cst_48 = arith.constant dense<0.000000e+00> : vector<8x16xf32>
    %78 = tpu.matmul %70, %77, %cst_48 {dimension_numbers = #tpu.dot_dimension_numbers<[1], [0], [0], [1], [0, 0, 1, 1], [], []>} : vector<8x8xf32>, vector<8x16xf32>, vector<8x16xf32> -> vector<8x16xf32>
    %c0_49 = arith.constant 0 : index
    %c32_50 = arith.constant 32 : index
    %79 = vector.load %arg10[%c0_49, %c32_50] : memref<8x128xf32, #tpu.memory_space<vmem>>, vector<8x16xf32>
    %80 = vector.broadcast %67 : vector<8x1xf32> to vector<8x16xf32>
    %81 = arith.mulf %80, %79 : vector<8x16xf32>
    %82 = arith.addf %81, %78 : vector<8x16xf32>
    %c0_51 = arith.constant 0 : index
    %c32_52 = arith.constant 32 : index
    %83 = vector.load %arg10[%c0_51, %c32_52] : memref<8x128xf32, #tpu.memory_space<vmem>>, vector<8x16xf32>
    tpu.vector_store %arg10[%c0_51, %c32_52], %82 {strides = array<i32>} : memref<8x128xf32, #tpu.memory_space<vmem>>, vector<8x16xf32>,
    %c0_53 = arith.constant 0 : index
    %c2_54 = arith.constant 2 : index
    %84 = vector.load %arg8[%c0_53, %c2_54] : memref<8x8xf32, #tpu.memory_space<vmem>>, vector<8x1xf32>
    tpu.vector_store %arg8[%c0_53, %c2_54], %65 {strides = array<i32>} : memref<8x8xf32, #tpu.memory_space<vmem>>, vector<8x1xf32>,
    %c0_55 = arith.constant 0 : index
    %c48 = arith.constant 48 : index
    %85 = vector.load %arg7[%c0_55, %c48] : memref<8x128xf32, #tpu.memory_space<vmem>>, vector<8x16xf32>
    %86 = vector.extract_strided_slice %4 {offsets = [0, 48], sizes = [8, 16], strides = [1, 1]} : vector<8x128xf32> to vector<8x16xf32>
    %cst_56 = arith.constant dense<0.000000e+00> : vector<8x8xf32>
    %87 = tpu.matmul %85, %86, %cst_56 {dimension_numbers = #tpu.dot_dimension_numbers<[1], [1], [0], [0], [0, 0, 1, 0], [], []>} : vector<8x16xf32>, vector<8x16xf32>, vector<8x8xf32> -> vector<8x8xf32>
    %c0_57 = arith.constant 0 : index
    %c3 = arith.constant 3 : index
    %88 = vector.load %arg8[%c0_57, %c3] : memref<8x8xf32, #tpu.memory_space<vmem>>, vector<8x1xf32>
    %cst_58 = arith.constant dense<0xFF800000> : vector<8xf32>
    %89 = vector.multi_reduction <maximumf>, %87, %cst_58 [1] : vector<8x8xf32> to vector<8xf32>
    %90 = vector.shape_cast %89 : vector<8xf32> to vector<8x1xf32>
    %91 = arith.maximumf %88, %90 : vector<8x1xf32>
    %92 = arith.subf %88, %91 : vector<8x1xf32>
    %93 = math.exp %92 : vector<8x1xf32>
    %94 = vector.broadcast %91 : vector<8x1xf32> to vector<8x8xf32>
    %95 = arith.subf %87, %94 : vector<8x8xf32>
    %96 = math.exp %95 : vector<8x8xf32>
    %c0_59 = arith.constant 0 : index
    %c3_60 = arith.constant 3 : index
    %97 = vector.load %arg9[%c0_59, %c3_60] : memref<8x8xf32, #tpu.memory_space<vmem>>, vector<8x1xf32>
    %98 = arith.mulf %93, %97 : vector<8x1xf32>
    %cst_61 = arith.constant dense<0.000000e+00> : vector<8xf32>
    %99 = vector.multi_reduction <add>, %96, %cst_61 [1] : vector<8x8xf32> to vector<8xf32>
    %100 = vector.shape_cast %99 : vector<8xf32> to vector<8x1xf32>
    %101 = arith.addf %98, %100 : vector<8x1xf32>
    %c0_62 = arith.constant 0 : index
    %c3_63 = arith.constant 3 : index
    %102 = vector.load %arg9[%c0_62, %c3_63] : memref<8x8xf32, #tpu.memory_space<vmem>>, vector<8x1xf32>
    tpu.vector_store %arg9[%c0_62, %c3_63], %101 {strides = array<i32>} : memref<8x8xf32, #tpu.memory_space<vmem>>, vector<8x1xf32>,
    %103 = vector.extract_strided_slice %6 {offsets = [0, 48], sizes = [8, 16], strides = [1, 1]} : vector<8x128xf32> to vector<8x16xf32>
    %cst_64 = arith.constant dense<0.000000e+00> : vector<8x16xf32>
    %104 = tpu.matmul %96, %103, %cst_64 {dimension_numbers = #tpu.dot_dimension_numbers<[1], [0], [0], [1], [0, 0, 1, 1], [], []>} : vector<8x8xf32>, vector<8x16xf32>, vector<8x16xf32> -> vector<8x16xf32>
    %c0_65 = arith.constant 0 : index
    %c48_66 = arith.constant 48 : index
    %105 = vector.load %arg10[%c0_65, %c48_66] : memref<8x128xf32, #tpu.memory_space<vmem>>, vector<8x16xf32>
    %106 = vector.broadcast %93 : vector<8x1xf32> to vector<8x16xf32>
    %107 = arith.mulf %106, %105 : vector<8x16xf32>
    %108 = arith.addf %107, %104 : vector<8x16xf32>
    %c0_67 = arith.constant 0 : index
    %c48_68 = arith.constant 48 : index
    %109 = vector.load %arg10[%c0_67, %c48_68] : memref<8x128xf32, #tpu.memory_space<vmem>>, vector<8x16xf32>
    tpu.vector_store %arg10[%c0_67, %c48_68], %108 {strides = array<i32>} : memref<8x128xf32, #tpu.memory_space<vmem>>, vector<8x16xf32>,
    %c0_69 = arith.constant 0 : index
    %c3_70 = arith.constant 3 : index
    %110 = vector.load %arg8[%c0_69, %c3_70] : memref<8x8xf32, #tpu.memory_space<vmem>>, vector<8x1xf32>
    tpu.vector_store %arg8[%c0_69, %c3_70], %91 {strides = array<i32>} : memref<8x8xf32, #tpu.memory_space<vmem>>, vector<8x1xf32>,
    %c0_71 = arith.constant 0 : index
    %c64 = arith.constant 64 : index
    %111 = vector.load %arg7[%c0_71, %c64] : memref<8x128xf32, #tpu.memory_space<vmem>>, vector<8x16xf32>
    %112 = vector.extract_strided_slice %4 {offsets = [0, 64], sizes = [8, 16], strides = [1, 1]} : vector<8x128xf32> to vector<8x16xf32>
    %cst_72 = arith.constant dense<0.000000e+00> : vector<8x8xf32>
    %113 = tpu.matmul %111, %112, %cst_72 {dimension_numbers = #tpu.dot_dimension_numbers<[1], [1], [0], [0], [0, 0, 1, 0], [], []>} : vector<8x16xf32>, vector<8x16xf32>, vector<8x8xf32> -> vector<8x8xf32>
    %c0_73 = arith.constant 0 : index
    %c4 = arith.constant 4 : index
    %114 = vector.load %arg8[%c0_73, %c4] : memref<8x8xf32, #tpu.memory_space<vmem>>, vector<8x1xf32>
    %cst_74 = arith.constant dense<0xFF800000> : vector<8xf32>
    %115 = vector.multi_reduction <maximumf>, %113, %cst_74 [1] : vector<8x8xf32> to vector<8xf32>
    %116 = vector.shape_cast %115 : vector<8xf32> to vector<8x1xf32>
    %117 = arith.maximumf %114, %116 : vector<8x1xf32>
    %118 = arith.subf %114, %117 : vector<8x1xf32>
    %119 = math.exp %118 : vector<8x1xf32>
    %120 = vector.broadcast %117 : vector<8x1xf32> to vector<8x8xf32>
    %121 = arith.subf %113, %120 : vector<8x8xf32>
    %122 = math.exp %121 : vector<8x8xf32>
    %c0_75 = arith.constant 0 : index
    %c4_76 = arith.constant 4 : index
    %123 = vector.load %arg9[%c0_75, %c4_76] : memref<8x8xf32, #tpu.memory_space<vmem>>, vector<8x1xf32>
    %124 = arith.mulf %119, %123 : vector<8x1xf32>
    %cst_77 = arith.constant dense<0.000000e+00> : vector<8xf32>
    %125 = vector.multi_reduction <add>, %122, %cst_77 [1] : vector<8x8xf32> to vector<8xf32>
    %126 = vector.shape_cast %125 : vector<8xf32> to vector<8x1xf32>
    %127 = arith.addf %124, %126 : vector<8x1xf32>
    %c0_78 = arith.constant 0 : index
    %c4_79 = arith.constant 4 : index
    %128 = vector.load %arg9[%c0_78, %c4_79] : memref<8x8xf32, #tpu.memory_space<vmem>>, vector<8x1xf32>
    tpu.vector_store %arg9[%c0_78, %c4_79], %127 {strides = array<i32>} : memref<8x8xf32, #tpu.memory_space<vmem>>, vector<8x1xf32>,
    %129 = vector.extract_strided_slice %6 {offsets = [0, 64], sizes = [8, 16], strides = [1, 1]} : vector<8x128xf32> to vector<8x16xf32>
    %cst_80 = arith.constant dense<0.000000e+00> : vector<8x16xf32>
    %130 = tpu.matmul %122, %129, %cst_80 {dimension_numbers = #tpu.dot_dimension_numbers<[1], [0], [0], [1], [0, 0, 1, 1], [], []>} : vector<8x8xf32>, vector<8x16xf32>, vector<8x16xf32> -> vector<8x16xf32>
    %c0_81 = arith.constant 0 : index
    %c64_82 = arith.constant 64 : index
    %131 = vector.load %arg10[%c0_81, %c64_82] : memref<8x128xf32, #tpu.memory_space<vmem>>, vector<8x16xf32>
    %132 = vector.broadcast %119 : vector<8x1xf32> to vector<8x16xf32>
    %133 = arith.mulf %132, %131 : vector<8x16xf32>
    %134 = arith.addf %133, %130 : vector<8x16xf32>
    %c0_83 = arith.constant 0 : index
    %c64_84 = arith.constant 64 : index
    %135 = vector.load %arg10[%c0_83, %c64_84] : memref<8x128xf32, #tpu.memory_space<vmem>>, vector<8x16xf32>
    tpu.vector_store %arg10[%c0_83, %c64_84], %134 {strides = array<i32>} : memref<8x128xf32, #tpu.memory_space<vmem>>, vector<8x16xf32>,
    %c0_85 = arith.constant 0 : index
    %c4_86 = arith.constant 4 : index
    %136 = vector.load %arg8[%c0_85, %c4_86] : memref<8x8xf32, #tpu.memory_space<vmem>>, vector<8x1xf32>
    tpu.vector_store %arg8[%c0_85, %c4_86], %117 {strides = array<i32>} : memref<8x8xf32, #tpu.memory_space<vmem>>, vector<8x1xf32>,
    %c0_87 = arith.constant 0 : index
    %c80 = arith.constant 80 : index
    %137 = vector.load %arg7[%c0_87, %c80] : memref<8x128xf32, #tpu.memory_space<vmem>>, vector<8x16xf32>
    %138 = vector.extract_strided_slice %4 {offsets = [0, 80], sizes = [8, 16], strides = [1, 1]} : vector<8x128xf32> to vector<8x16xf32>
    %cst_88 = arith.constant dense<0.000000e+00> : vector<8x8xf32>
    %139 = tpu.matmul %137, %138, %cst_88 {dimension_numbers = #tpu.dot_dimension_numbers<[1], [1], [0], [0], [0, 0, 1, 0], [], []>} : vector<8x16xf32>, vector<8x16xf32>, vector<8x8xf32> -> vector<8x8xf32>
    %c0_89 = arith.constant 0 : index
    %c5 = arith.constant 5 : index
    %140 = vector.load %arg8[%c0_89, %c5] : memref<8x8xf32, #tpu.memory_space<vmem>>, vector<8x1xf32>
    %cst_90 = arith.constant dense<0xFF800000> : vector<8xf32>
    %141 = vector.multi_reduction <maximumf>, %139, %cst_90 [1] : vector<8x8xf32> to vector<8xf32>
    %142 = vector.shape_cast %141 : vector<8xf32> to vector<8x1xf32>
    %143 = arith.maximumf %140, %142 : vector<8x1xf32>
    %144 = arith.subf %140, %143 : vector<8x1xf32>
    %145 = math.exp %144 : vector<8x1xf32>
    %146 = vector.broadcast %143 : vector<8x1xf32> to vector<8x8xf32>
    %147 = arith.subf %139, %146 : vector<8x8xf32>
    %148 = math.exp %147 : vector<8x8xf32>
    %c0_91 = arith.constant 0 : index
    %c5_92 = arith.constant 5 : index
    %149 = vector.load %arg9[%c0_91, %c5_92] : memref<8x8xf32, #tpu.memory_space<vmem>>, vector<8x1xf32>
    %150 = arith.mulf %145, %149 : vector<8x1xf32>
    %cst_93 = arith.constant dense<0.000000e+00> : vector<8xf32>
    %151 = vector.multi_reduction <add>, %148, %cst_93 [1] : vector<8x8xf32> to vector<8xf32>
    %152 = vector.shape_cast %151 : vector<8xf32> to vector<8x1xf32>
    %153 = arith.addf %150, %152 : vector<8x1xf32>
    %c0_94 = arith.constant 0 : index
    %c5_95 = arith.constant 5 : index
    %154 = vector.load %arg9[%c0_94, %c5_95] : memref<8x8xf32, #tpu.memory_space<vmem>>, vector<8x1xf32>
    tpu.vector_store %arg9[%c0_94, %c5_95], %153 {strides = array<i32>} : memref<8x8xf32, #tpu.memory_space<vmem>>, vector<8x1xf32>,
    %155 = vector.extract_strided_slice %6 {offsets = [0, 80], sizes = [8, 16], strides = [1, 1]} : vector<8x128xf32> to vector<8x16xf32>
    %cst_96 = arith.constant dense<0.000000e+00> : vector<8x16xf32>
    %156 = tpu.matmul %148, %155, %cst_96 {dimension_numbers = #tpu.dot_dimension_numbers<[1], [0], [0], [1], [0, 0, 1, 1], [], []>} : vector<8x8xf32>, vector<8x16xf32>, vector<8x16xf32> -> vector<8x16xf32>
    %c0_97 = arith.constant 0 : index
    %c80_98 = arith.constant 80 : index
    %157 = vector.load %arg10[%c0_97, %c80_98] : memref<8x128xf32, #tpu.memory_space<vmem>>, vector<8x16xf32>
    %158 = vector.broadcast %145 : vector<8x1xf32> to vector<8x16xf32>
    %159 = arith.mulf %158, %157 : vector<8x16xf32>
    %160 = arith.addf %159, %156 : vector<8x16xf32>
    %c0_99 = arith.constant 0 : index
    %c80_100 = arith.constant 80 : index
    %161 = vector.load %arg10[%c0_99, %c80_100] : memref<8x128xf32, #tpu.memory_space<vmem>>, vector<8x16xf32>
    tpu.vector_store %arg10[%c0_99, %c80_100], %160 {strides = array<i32>} : memref<8x128xf32, #tpu.memory_space<vmem>>, vector<8x16xf32>,
    %c0_101 = arith.constant 0 : index
    %c5_102 = arith.constant 5 : index
    %162 = vector.load %arg8[%c0_101, %c5_102] : memref<8x8xf32, #tpu.memory_space<vmem>>, vector<8x1xf32>
    tpu.vector_store %arg8[%c0_101, %c5_102], %143 {strides = array<i32>} : memref<8x8xf32, #tpu.memory_space<vmem>>, vector<8x1xf32>,
    %c0_103 = arith.constant 0 : index
    %c96 = arith.constant 96 : index
    %163 = vector.load %arg7[%c0_103, %c96] : memref<8x128xf32, #tpu.memory_space<vmem>>, vector<8x16xf32>
    %164 = vector.extract_strided_slice %4 {offsets = [0, 96], sizes = [8, 16], strides = [1, 1]} : vector<8x128xf32> to vector<8x16xf32>
    %cst_104 = arith.constant dense<0.000000e+00> : vector<8x8xf32>
    %165 = tpu.matmul %163, %164, %cst_104 {dimension_numbers = #tpu.dot_dimension_numbers<[1], [1], [0], [0], [0, 0, 1, 0], [], []>} : vector<8x16xf32>, vector<8x16xf32>, vector<8x8xf32> -> vector<8x8xf32>
    %c0_105 = arith.constant 0 : index
    %c6 = arith.constant 6 : index
    %166 = vector.load %arg8[%c0_105, %c6] : memref<8x8xf32, #tpu.memory_space<vmem>>, vector<8x1xf32>
    %cst_106 = arith.constant dense<0xFF800000> : vector<8xf32>
    %167 = vector.multi_reduction <maximumf>, %165, %cst_106 [1] : vector<8x8xf32> to vector<8xf32>
    %168 = vector.shape_cast %167 : vector<8xf32> to vector<8x1xf32>
    %169 = arith.maximumf %166, %168 : vector<8x1xf32>
    %170 = arith.subf %166, %169 : vector<8x1xf32>
    %171 = math.exp %170 : vector<8x1xf32>
    %172 = vector.broadcast %169 : vector<8x1xf32> to vector<8x8xf32>
    %173 = arith.subf %165, %172 : vector<8x8xf32>
    %174 = math.exp %173 : vector<8x8xf32>
    %c0_107 = arith.constant 0 : index
    %c6_108 = arith.constant 6 : index
    %175 = vector.load %arg9[%c0_107, %c6_108] : memref<8x8xf32, #tpu.memory_space<vmem>>, vector<8x1xf32>
    %176 = arith.mulf %171, %175 : vector<8x1xf32>
    %cst_109 = arith.constant dense<0.000000e+00> : vector<8xf32>
    %177 = vector.multi_reduction <add>, %174, %cst_109 [1] : vector<8x8xf32> to vector<8xf32>
    %178 = vector.shape_cast %177 : vector<8xf32> to vector<8x1xf32>
    %179 = arith.addf %176, %178 : vector<8x1xf32>
    %c0_110 = arith.constant 0 : index
    %c6_111 = arith.constant 6 : index
    %180 = vector.load %arg9[%c0_110, %c6_111] : memref<8x8xf32, #tpu.memory_space<vmem>>, vector<8x1xf32>
    tpu.vector_store %arg9[%c0_110, %c6_111], %179 {strides = array<i32>} : memref<8x8xf32, #tpu.memory_space<vmem>>, vector<8x1xf32>,
    %181 = vector.extract_strided_slice %6 {offsets = [0, 96], sizes = [8, 16], strides = [1, 1]} : vector<8x128xf32> to vector<8x16xf32>
    %cst_112 = arith.constant dense<0.000000e+00> : vector<8x16xf32>
    %182 = tpu.matmul %174, %181, %cst_112 {dimension_numbers = #tpu.dot_dimension_numbers<[1], [0], [0], [1], [0, 0, 1, 1], [], []>} : vector<8x8xf32>, vector<8x16xf32>, vector<8x16xf32> -> vector<8x16xf32>
    %c0_113 = arith.constant 0 : index
    %c96_114 = arith.constant 96 : index
    %183 = vector.load %arg10[%c0_113, %c96_114] : memref<8x128xf32, #tpu.memory_space<vmem>>, vector<8x16xf32>
    %184 = vector.broadcast %171 : vector<8x1xf32> to vector<8x16xf32>
    %185 = arith.mulf %184, %183 : vector<8x16xf32>
    %186 = arith.addf %185, %182 : vector<8x16xf32>
    %c0_115 = arith.constant 0 : index
    %c96_116 = arith.constant 96 : index
    %187 = vector.load %arg10[%c0_115, %c96_116] : memref<8x128xf32, #tpu.memory_space<vmem>>, vector<8x16xf32>
    tpu.vector_store %arg10[%c0_115, %c96_116], %186 {strides = array<i32>} : memref<8x128xf32, #tpu.memory_space<vmem>>, vector<8x16xf32>,
    %c0_117 = arith.constant 0 : index
    %c6_118 = arith.constant 6 : index
    %188 = vector.load %arg8[%c0_117, %c6_118] : memref<8x8xf32, #tpu.memory_space<vmem>>, vector<8x1xf32>
    tpu.vector_store %arg8[%c0_117, %c6_118], %169 {strides = array<i32>} : memref<8x8xf32, #tpu.memory_space<vmem>>, vector<8x1xf32>,
    %c0_119 = arith.constant 0 : index
    %c112 = arith.constant 112 : index
    %189 = vector.load %arg7[%c0_119, %c112] : memref<8x128xf32, #tpu.memory_space<vmem>>, vector<8x16xf32>
    %190 = vector.extract_strided_slice %4 {offsets = [0, 112], sizes = [8, 16], strides = [1, 1]} : vector<8x128xf32> to vector<8x16xf32>
    %cst_120 = arith.constant dense<0.000000e+00> : vector<8x8xf32>
    %191 = tpu.matmul %189, %190, %cst_120 {dimension_numbers = #tpu.dot_dimension_numbers<[1], [1], [0], [0], [0, 0, 1, 0], [], []>} : vector<8x16xf32>, vector<8x16xf32>, vector<8x8xf32> -> vector<8x8xf32>
    %c0_121 = arith.constant 0 : index
    %c7 = arith.constant 7 : index
    %192 = vector.load %arg8[%c0_121, %c7] : memref<8x8xf32, #tpu.memory_space<vmem>>, vector<8x1xf32>
    %cst_122 = arith.constant dense<0xFF800000> : vector<8xf32>
    %193 = vector.multi_reduction <maximumf>, %191, %cst_122 [1] : vector<8x8xf32> to vector<8xf32>
    %194 = vector.shape_cast %193 : vector<8xf32> to vector<8x1xf32>
    %195 = arith.maximumf %192, %194 : vector<8x1xf32>
    %196 = arith.subf %192, %195 : vector<8x1xf32>
    %197 = math.exp %196 : vector<8x1xf32>
    %198 = vector.broadcast %195 : vector<8x1xf32> to vector<8x8xf32>
    %199 = arith.subf %191, %198 : vector<8x8xf32>
    %200 = math.exp %199 : vector<8x8xf32>
    %c0_123 = arith.constant 0 : index
    %c7_124 = arith.constant 7 : index
    %201 = vector.load %arg9[%c0_123, %c7_124] : memref<8x8xf32, #tpu.memory_space<vmem>>, vector<8x1xf32>
    %202 = arith.mulf %197, %201 : vector<8x1xf32>
    %cst_125 = arith.constant dense<0.000000e+00> : vector<8xf32>
    %203 = vector.multi_reduction <add>, %200, %cst_125 [1] : vector<8x8xf32> to vector<8xf32>
    %204 = vector.shape_cast %203 : vector<8xf32> to vector<8x1xf32>
    %205 = arith.addf %202, %204 : vector<8x1xf32>
    %c0_126 = arith.constant 0 : index
    %c7_127 = arith.constant 7 : index
    %206 = vector.load %arg9[%c0_126, %c7_127] : memref<8x8xf32, #tpu.memory_space<vmem>>, vector<8x1xf32>
    tpu.vector_store %arg9[%c0_126, %c7_127], %205 {strides = array<i32>} : memref<8x8xf32, #tpu.memory_space<vmem>>, vector<8x1xf32>,
    %207 = vector.extract_strided_slice %6 {offsets = [0, 112], sizes = [8, 16], strides = [1, 1]} : vector<8x128xf32> to vector<8x16xf32>
    %cst_128 = arith.constant dense<0.000000e+00> : vector<8x16xf32>
    %208 = tpu.matmul %200, %207, %cst_128 {dimension_numbers = #tpu.dot_dimension_numbers<[1], [0], [0], [1], [0, 0, 1, 1], [], []>} : vector<8x8xf32>, vector<8x16xf32>, vector<8x16xf32> -> vector<8x16xf32>
    %c0_129 = arith.constant 0 : index
    %c112_130 = arith.constant 112 : index
    %209 = vector.load %arg10[%c0_129, %c112_130] : memref<8x128xf32, #tpu.memory_space<vmem>>, vector<8x16xf32>
    %210 = vector.broadcast %197 : vector<8x1xf32> to vector<8x16xf32>
    %211 = arith.mulf %210, %209 : vector<8x16xf32>
    %212 = arith.addf %211, %208 : vector<8x16xf32>
    %c0_131 = arith.constant 0 : index
    %c112_132 = arith.constant 112 : index
    %213 = vector.load %arg10[%c0_131, %c112_132] : memref<8x128xf32, #tpu.memory_space<vmem>>, vector<8x16xf32>
    tpu.vector_store %arg10[%c0_131, %c112_132], %212 {strides = array<i32>} : memref<8x128xf32, #tpu.memory_space<vmem>>, vector<8x16xf32>,
    %c0_133 = arith.constant 0 : index
    %c7_134 = arith.constant 7 : index
    %214 = vector.load %arg8[%c0_133, %c7_134] : memref<8x8xf32, #tpu.memory_space<vmem>>, vector<8x1xf32>
    tpu.vector_store %arg8[%c0_133, %c7_134], %195 {strides = array<i32>} : memref<8x8xf32, #tpu.memory_space<vmem>>, vector<8x1xf32>,
    %c0_i32_135 = arith.constant 0 : i32
    %215 = arith.cmpi eq, %arg2, %c0_i32_135 : i32
    %216 = arith.extui %215 : i1 to i32
    %c0_i32_136 = arith.constant 0 : i32
    %217 = arith.cmpi ne, %216, %c0_i32_136 : i32
    scf.if %217 {
      %c0_137 = arith.constant 0 : index
      %c0_138 = arith.constant 0 : index
      %218 = vector.load %arg9[%c0_137, %c0_138] : memref<8x8xf32, #tpu.memory_space<vmem>>, vector<8x8xf32>
      %219 = tpu.reciprocal %218 {approx = true} : vector<8x8xf32> -> vector<8x8xf32>
      %c0_139 = arith.constant 0 : index
      %c0_140 = arith.constant 0 : index
      %220 = vector.load %arg10[%c0_139, %c0_140] : memref<8x128xf32, #tpu.memory_space<vmem>>, vector<8x16xf32>
      %221 = vector.extract_strided_slice %219 {offsets = [0, 0], sizes = [8, 1], strides = [1, 1]} : vector<8x8xf32> to vector<8x1xf32>
      %222 = vector.broadcast %221 : vector<8x1xf32> to vector<8x16xf32>
      %223 = arith.mulf %220, %222 : vector<8x16xf32>
      %c0_141 = arith.constant 0 : index
      %c16_142 = arith.constant 16 : index
      %224 = vector.load %arg10[%c0_141, %c16_142] : memref<8x128xf32, #tpu.memory_space<vmem>>, vector<8x16xf32>
      %225 = vector.extract_strided_slice %219 {offsets = [0, 1], sizes = [8, 1], strides = [1, 1]} : vector<8x8xf32> to vector<8x1xf32>
      %226 = vector.broadcast %225 : vector<8x1xf32> to vector<8x16xf32>
      %227 = arith.mulf %224, %226 : vector<8x16xf32>
      %c0_143 = arith.constant 0 : index
      %c32_144 = arith.constant 32 : index
      %228 = vector.load %arg10[%c0_143, %c32_144] : memref<8x128xf32, #tpu.memory_space<vmem>>, vector<8x16xf32>
      %229 = vector.extract_strided_slice %219 {offsets = [0, 2], sizes = [8, 1], strides = [1, 1]} : vector<8x8xf32> to vector<8x1xf32>
      %230 = vector.broadcast %229 : vector<8x1xf32> to vector<8x16xf32>
      %231 = arith.mulf %228, %230 : vector<8x16xf32>
      %c0_145 = arith.constant 0 : index
      %c48_146 = arith.constant 48 : index
      %232 = vector.load %arg10[%c0_145, %c48_146] : memref<8x128xf32, #tpu.memory_space<vmem>>, vector<8x16xf32>
      %233 = vector.extract_strided_slice %219 {offsets = [0, 3], sizes = [8, 1], strides = [1, 1]} : vector<8x8xf32> to vector<8x1xf32>
      %234 = vector.broadcast %233 : vector<8x1xf32> to vector<8x16xf32>
      %235 = arith.mulf %232, %234 : vector<8x16xf32>
      %c0_147 = arith.constant 0 : index
      %c64_148 = arith.constant 64 : index
      %236 = vector.load %arg10[%c0_147, %c64_148] : memref<8x128xf32, #tpu.memory_space<vmem>>, vector<8x16xf32>
      %237 = vector.extract_strided_slice %219 {offsets = [0, 4], sizes = [8, 1], strides = [1, 1]} : vector<8x8xf32> to vector<8x1xf32>
      %238 = vector.broadcast %237 : vector<8x1xf32> to vector<8x16xf32>
      %239 = arith.mulf %236, %238 : vector<8x16xf32>
      %c0_149 = arith.constant 0 : index
      %c80_150 = arith.constant 80 : index
      %240 = vector.load %arg10[%c0_149, %c80_150] : memref<8x128xf32, #tpu.memory_space<vmem>>, vector<8x16xf32>
      %241 = vector.extract_strided_slice %219 {offsets = [0, 5], sizes = [8, 1], strides = [1, 1]} : vector<8x8xf32> to vector<8x1xf32>
      %242 = vector.broadcast %241 : vector<8x1xf32> to vector<8x16xf32>
      %243 = arith.mulf %240, %242 : vector<8x16xf32>
      %c0_151 = arith.constant 0 : index
      %c96_152 = arith.constant 96 : index
      %244 = vector.load %arg10[%c0_151, %c96_152] : memref<8x128xf32, #tpu.memory_space<vmem>>, vector<8x16xf32>
      %245 = vector.extract_strided_slice %219 {offsets = [0, 6], sizes = [8, 1], strides = [1, 1]} : vector<8x8xf32> to vector<8x1xf32>
      %246 = vector.broadcast %245 : vector<8x1xf32> to vector<8x16xf32>
      %247 = arith.mulf %244, %246 : vector<8x16xf32>
      %c0_153 = arith.constant 0 : index
      %c112_154 = arith.constant 112 : index
      %248 = vector.load %arg10[%c0_153, %c112_154] : memref<8x128xf32, #tpu.memory_space<vmem>>, vector<8x16xf32>
      %249 = vector.extract_strided_slice %219 {offsets = [0, 7], sizes = [8, 1], strides = [1, 1]} : vector<8x8xf32> to vector<8x1xf32>
      %250 = vector.broadcast %249 : vector<8x1xf32> to vector<8x16xf32>
      %251 = arith.mulf %248, %250 : vector<8x16xf32>
      %252 = tpu.concatenate %223, %227, %231, %235, %239, %243, %247, %251 in 1 : vector<8x16xf32>, vector<8x16xf32>, vector<8x16xf32>, vector<8x16xf32>, vector<8x16xf32>, vector<8x16xf32>, vector<8x16xf32>, vector<8x16xf32> -> vector<8x128xf32>
      %c0_155 = arith.constant 0 : index
      %c0_156 = arith.constant 0 : index
      %c0_157 = arith.constant 0 : index
      %253 = vector.load %arg6[%c0_155, %c0_156, %c0_157] : memref<1x8x128xf32, #tpu.memory_space<vmem>>, vector<1x8x128xf32>
      %254 = vector.shape_cast %253 : vector<1x8x128xf32> to vector<8x128xf32>
      %255 = vector.shape_cast %252 : vector<8x128xf32> to vector<1x8x128xf32>
      tpu.vector_store %arg6[%c0_155, %c0_156, %c0_157], %255 {strides = array<i32>} : memref<1x8x128xf32, #tpu.memory_space<vmem>>, vector<1x8x128xf32>,
    } else {
    }
    return
  }
  func.func @transform_0(%arg0: i32, %arg1: i32, %arg2: i32) -> (i32, i32, i32) {
    %c0_i32 = arith.constant 0 : i32
    %c0_i32_0 = arith.constant 0 : i32
    return %arg0, %arg1, %c0_i32 : i32, i32, i32
  }
  func.func @transform_1(%arg0: i32, %arg1: i32, %arg2: i32) -> (i32, i32, i32) {
    %c0_i32 = arith.constant 0 : i32
    %c0_i32_0 = arith.constant 0 : i32
    return %arg0, %arg2, %c0_i32 : i32, i32, i32
  }
  func.func @transform_2(%arg0: i32, %arg1: i32, %arg2: i32) -> (i32, i32, i32) {
    %c0_i32 = arith.constant 0 : i32
    %c0_i32_0 = arith.constant 0 : i32
    return %arg0, %arg2, %c0_i32 : i32, i32, i32
  }
  func.func @transform_3(%arg0: i32, %arg1: i32, %arg2: i32) -> (i32, i32, i32) {
    %c0_i32 = arith.constant 0 : i32
    %c0_i32_0 = arith.constant 0 : i32
    return %arg0, %arg1, %c0_i32 : i32, i32, i32
  }
}

module attributes {stable_mosaic.version = 11 : i64} {
  func.func @_epilogue_kernel(%arg0: i32, %arg1: memref<8x128xf32, #tpu.memory_space<vmem>>, %arg2: memref<8x128xf32, #tpu.memory_space<vmem>>, %arg3: memref<128x128xf32, #tpu.memory_space<vmem>>, %arg4: memref<1x128xf32, #tpu.memory_space<vmem>>, %arg5: memref<128x128xf32, #tpu.memory_space<vmem>>, %arg6: memref<1x128xf32, #tpu.memory_space<vmem>>, %arg7: memref<1x128xf32, #tpu.memory_space<vmem>>, %arg8: memref<1x128xf32, #tpu.memory_space<vmem>>, %arg9: memref<1x128xf32, #tpu.memory_space<vmem>>, %arg10: memref<1x128xf32, #tpu.memory_space<vmem>>, %arg11: memref<8x128xf32, #tpu.memory_space<vmem>>) attributes {dimension_semantics = [#tpu.dimension_semantics<parallel>], iteration_bounds = array<i64: 2>, scalar_prefetch = 0 : i64, scratch_operands = 0 : i64, tpu.core_type = #tpu.core_type<tc>, window_params = [{transform_indices = @transform_0, window_bounds = array<i64: 8, 128>}, {transform_indices = @transform_1, window_bounds = array<i64: 8, 128>}, {pipeline_mode = #tpu.pipeline_mode<synchronous>, transform_indices = @transform_2, window_bounds = array<i64: 128, 128>}, {pipeline_mode = #tpu.pipeline_mode<synchronous>, transform_indices = @transform_3, window_bounds = array<i64: 1, 128>}, {pipeline_mode = #tpu.pipeline_mode<synchronous>, transform_indices = @transform_4, window_bounds = array<i64: 128, 128>}, {pipeline_mode = #tpu.pipeline_mode<synchronous>, transform_indices = @transform_5, window_bounds = array<i64: 1, 128>}, {pipeline_mode = #tpu.pipeline_mode<synchronous>, transform_indices = @transform_6, window_bounds = array<i64: 1, 128>}, {pipeline_mode = #tpu.pipeline_mode<synchronous>, transform_indices = @transform_7, window_bounds = array<i64: 1, 128>}, {pipeline_mode = #tpu.pipeline_mode<synchronous>, transform_indices = @transform_8, window_bounds = array<i64: 1, 128>}, {pipeline_mode = #tpu.pipeline_mode<synchronous>, transform_indices = @transform_9, window_bounds = array<i64: 1, 128>}, {transform_indices = @transform_10, window_bounds = array<i64: 8, 128>}]} {
    %c0 = arith.constant 0 : index
    %c0_0 = arith.constant 0 : index
    %0 = vector.load %arg1[%c0, %c0_0] : memref<8x128xf32, #tpu.memory_space<vmem>>, vector<8x128xf32>
    %c0_1 = arith.constant 0 : index
    %c0_2 = arith.constant 0 : index
    %1 = vector.load %arg3[%c0_1, %c0_2] : memref<128x128xf32, #tpu.memory_space<vmem>>, vector<128x128xf32>
    %cst = arith.constant dense<0.000000e+00> : vector<8x128xf32>
    %2 = tpu.matmul %0, %1, %cst {dimension_numbers = #tpu.dot_dimension_numbers<[1], [0], [0], [1], [0, 0, 1, 1], [], []>} : vector<8x128xf32>, vector<128x128xf32>, vector<8x128xf32> -> vector<8x128xf32>
    %c0_3 = arith.constant 0 : index
    %c0_4 = arith.constant 0 : index
    %3 = vector.load %arg4[%c0_3, %c0_4] : memref<1x128xf32, #tpu.memory_space<vmem>>, vector<1x128xf32>
    %4 = vector.broadcast %3 : vector<1x128xf32> to vector<8x128xf32>
    %5 = arith.addf %2, %4 : vector<8x128xf32>
    %c0_5 = arith.constant 0 : index
    %c0_6 = arith.constant 0 : index
    %6 = vector.load %arg2[%c0_5, %c0_6] : memref<8x128xf32, #tpu.memory_space<vmem>>, vector<8x128xf32>
    %7 = arith.addf %5, %6 : vector<8x128xf32>
    %c0_7 = arith.constant 0 : index
    %c0_8 = arith.constant 0 : index
    %8 = vector.load %arg7[%c0_7, %c0_8] : memref<1x128xf32, #tpu.memory_space<vmem>>, vector<1x128xf32>
    %c0_9 = arith.constant 0 : index
    %c0_10 = arith.constant 0 : index
    %9 = vector.load %arg8[%c0_9, %c0_10] : memref<1x128xf32, #tpu.memory_space<vmem>>, vector<1x128xf32>
    %cst_11 = arith.constant dense<0.000000e+00> : vector<8xf32>
    %10 = vector.multi_reduction <add>, %7, %cst_11 [1] : vector<8x128xf32> to vector<8xf32>
    %11 = vector.shape_cast %10 : vector<8xf32> to vector<8x1xf32>
    %cst_12 = arith.constant 1.280000e+02 : f32
    %12 = vector.broadcast %cst_12 : f32 to vector<8x1xf32>
    %13 = arith.divf %11, %12 : vector<8x1xf32>
    %14 = vector.broadcast %13 : vector<8x1xf32> to vector<8x128xf32>
    %15 = arith.subf %7, %14 : vector<8x128xf32>
    %16 = arith.mulf %15, %15 : vector<8x128xf32>
    %cst_13 = arith.constant dense<0.000000e+00> : vector<8xf32>
    %17 = vector.multi_reduction <add>, %16, %cst_13 [1] : vector<8x128xf32> to vector<8xf32>
    %18 = vector.shape_cast %17 : vector<8xf32> to vector<8x1xf32>
    %cst_14 = arith.constant 1.280000e+02 : f32
    %19 = vector.broadcast %cst_14 : f32 to vector<8x1xf32>
    %20 = arith.divf %18, %19 : vector<8x1xf32>
    %cst_15 = arith.constant 9.99999974E-6 : f32
    %21 = vector.broadcast %cst_15 : f32 to vector<8x1xf32>
    %22 = arith.addf %20, %21 : vector<8x1xf32>
    %23 = math.rsqrt %22 : vector<8x1xf32>
    %24 = vector.broadcast %23 : vector<8x1xf32> to vector<8x128xf32>
    %25 = arith.mulf %15, %24 : vector<8x128xf32>
    %26 = vector.broadcast %8 : vector<1x128xf32> to vector<8x128xf32>
    %27 = arith.mulf %25, %26 : vector<8x128xf32>
    %28 = vector.broadcast %9 : vector<1x128xf32> to vector<8x128xf32>
    %29 = arith.addf %27, %28 : vector<8x128xf32>
    %c0_16 = arith.constant 0 : index
    %c0_17 = arith.constant 0 : index
    %30 = vector.load %arg5[%c0_16, %c0_17] : memref<128x128xf32, #tpu.memory_space<vmem>>, vector<128x128xf32>
    %cst_18 = arith.constant dense<0.000000e+00> : vector<8x128xf32>
    %31 = tpu.matmul %29, %30, %cst_18 {dimension_numbers = #tpu.dot_dimension_numbers<[1], [0], [0], [1], [0, 0, 1, 1], [], []>} : vector<8x128xf32>, vector<128x128xf32>, vector<8x128xf32> -> vector<8x128xf32>
    %c0_19 = arith.constant 0 : index
    %c0_20 = arith.constant 0 : index
    %32 = vector.load %arg6[%c0_19, %c0_20] : memref<1x128xf32, #tpu.memory_space<vmem>>, vector<1x128xf32>
    %33 = vector.broadcast %32 : vector<1x128xf32> to vector<8x128xf32>
    %34 = arith.addf %31, %33 : vector<8x128xf32>
    %35 = arith.addf %29, %34 : vector<8x128xf32>
    %c0_21 = arith.constant 0 : index
    %c0_22 = arith.constant 0 : index
    %36 = vector.load %arg9[%c0_21, %c0_22] : memref<1x128xf32, #tpu.memory_space<vmem>>, vector<1x128xf32>
    %c0_23 = arith.constant 0 : index
    %c0_24 = arith.constant 0 : index
    %37 = vector.load %arg10[%c0_23, %c0_24] : memref<1x128xf32, #tpu.memory_space<vmem>>, vector<1x128xf32>
    %cst_25 = arith.constant dense<0.000000e+00> : vector<8xf32>
    %38 = vector.multi_reduction <add>, %35, %cst_25 [1] : vector<8x128xf32> to vector<8xf32>
    %39 = vector.shape_cast %38 : vector<8xf32> to vector<8x1xf32>
    %cst_26 = arith.constant 1.280000e+02 : f32
    %40 = vector.broadcast %cst_26 : f32 to vector<8x1xf32>
    %41 = arith.divf %39, %40 : vector<8x1xf32>
    %42 = vector.broadcast %41 : vector<8x1xf32> to vector<8x128xf32>
    %43 = arith.subf %35, %42 : vector<8x128xf32>
    %44 = arith.mulf %43, %43 : vector<8x128xf32>
    %cst_27 = arith.constant dense<0.000000e+00> : vector<8xf32>
    %45 = vector.multi_reduction <add>, %44, %cst_27 [1] : vector<8x128xf32> to vector<8xf32>
    %46 = vector.shape_cast %45 : vector<8xf32> to vector<8x1xf32>
    %cst_28 = arith.constant 1.280000e+02 : f32
    %47 = vector.broadcast %cst_28 : f32 to vector<8x1xf32>
    %48 = arith.divf %46, %47 : vector<8x1xf32>
    %cst_29 = arith.constant 9.99999974E-6 : f32
    %49 = vector.broadcast %cst_29 : f32 to vector<8x1xf32>
    %50 = arith.addf %48, %49 : vector<8x1xf32>
    %51 = math.rsqrt %50 : vector<8x1xf32>
    %52 = vector.broadcast %51 : vector<8x1xf32> to vector<8x128xf32>
    %53 = arith.mulf %43, %52 : vector<8x128xf32>
    %54 = vector.broadcast %36 : vector<1x128xf32> to vector<8x128xf32>
    %55 = arith.mulf %53, %54 : vector<8x128xf32>
    %56 = vector.broadcast %37 : vector<1x128xf32> to vector<8x128xf32>
    %57 = arith.addf %55, %56 : vector<8x128xf32>
    %c0_30 = arith.constant 0 : index
    %c0_31 = arith.constant 0 : index
    %58 = vector.load %arg11[%c0_30, %c0_31] : memref<8x128xf32, #tpu.memory_space<vmem>>, vector<8x128xf32>
    tpu.vector_store %arg11[%c0_30, %c0_31], %57 {strides = array<i32>} : memref<8x128xf32, #tpu.memory_space<vmem>>, vector<8x128xf32>,
    return
  }
  func.func @transform_0(%arg0: i32) -> (i32, i32) {
    %c0_i32 = arith.constant 0 : i32
    %c0_i32_0 = arith.constant 0 : i32
    return %arg0, %c0_i32 : i32, i32
  }
  func.func @transform_1(%arg0: i32) -> (i32, i32) {
    %c0_i32 = arith.constant 0 : i32
    %c0_i32_0 = arith.constant 0 : i32
    return %arg0, %c0_i32 : i32, i32
  }
  func.func @transform_2(%arg0: i32) -> (i32, i32) {
    %c0_i32 = arith.constant 0 : i32
    %c0_i32_0 = arith.constant 0 : i32
    %c0_i32_1 = arith.constant 0 : i32
    return %c0_i32, %c0_i32_0 : i32, i32
  }
  func.func @transform_3(%arg0: i32) -> (i32, i32) {
    %c0_i32 = arith.constant 0 : i32
    %c0_i32_0 = arith.constant 0 : i32
    %c0_i32_1 = arith.constant 0 : i32
    return %c0_i32, %c0_i32_0 : i32, i32
  }
  func.func @transform_4(%arg0: i32) -> (i32, i32) {
    %c0_i32 = arith.constant 0 : i32
    %c0_i32_0 = arith.constant 0 : i32
    %c0_i32_1 = arith.constant 0 : i32
    return %c0_i32, %c0_i32_0 : i32, i32
  }
  func.func @transform_5(%arg0: i32) -> (i32, i32) {
    %c0_i32 = arith.constant 0 : i32
    %c0_i32_0 = arith.constant 0 : i32
    %c0_i32_1 = arith.constant 0 : i32
    return %c0_i32, %c0_i32_0 : i32, i32
  }
  func.func @transform_6(%arg0: i32) -> (i32, i32) {
    %c0_i32 = arith.constant 0 : i32
    %c0_i32_0 = arith.constant 0 : i32
    %c0_i32_1 = arith.constant 0 : i32
    return %c0_i32, %c0_i32_0 : i32, i32
  }
  func.func @transform_7(%arg0: i32) -> (i32, i32) {
    %c0_i32 = arith.constant 0 : i32
    %c0_i32_0 = arith.constant 0 : i32
    %c0_i32_1 = arith.constant 0 : i32
    return %c0_i32, %c0_i32_0 : i32, i32
  }
  func.func @transform_8(%arg0: i32) -> (i32, i32) {
    %c0_i32 = arith.constant 0 : i32
    %c0_i32_0 = arith.constant 0 : i32
    %c0_i32_1 = arith.constant 0 : i32
    return %c0_i32, %c0_i32_0 : i32, i32
  }
  func.func @transform_9(%arg0: i32) -> (i32, i32) {
    %c0_i32 = arith.constant 0 : i32
    %c0_i32_0 = arith.constant 0 : i32
    %c0_i32_1 = arith.constant 0 : i32
    return %c0_i32, %c0_i32_0 : i32, i32
  }
  func.func @transform_10(%arg0: i32) -> (i32, i32) {
    %c0_i32 = arith.constant 0 : i32
    %c0_i32_0 = arith.constant 0 : i32
    return %arg0, %c0_i32 : i32, i32
  }
}

</mosaic_0001>

<bundles_post_ra>
// kernel: cross_attention_forward.5
= control target key start
LH: loop header
LB: loop body
LE: loop exit
PB: predicated region body
PF: predicated region fallthrough
CT: control target
= control target key end

     0   :  { %11 = vsyncpa [#allocation3], 0  ;;  %s804_s21 = smov 0   ;;  %s940_s0 = inlined_call_operand.vmem [shape: f32[16,1], index: 0, kind: input, shape index: {}]   ;;  %s941_s1 = inlined_call_operand.vmem [shape: f32[1,128], index: 1, kind: input, shape index: {}]   ;;  %s942_s2 = inlined_call_operand.vmem [shape: f32[1,128], index: 2, kind: input, shape index: {}]   ;;  %s943_s3 = inlined_call_operand.vmem [shape: f32[128,128], index: 3, kind: input, shape index: {}]   ;;  %s944_s4 = inlined_call_operand.vmem [shape: f32[1,128], index: 4, kind: input, shape index: {}]   ;;  %s945_s5 = inlined_call_operand.hbm [shape: f32[128,128], index: 5, kind: input, shape index: {}]   ;;  %s946_s6 = inlined_call_operand.vmem [shape: f32[16,128], index: 6, kind: output, shape index: {}]  }
   0x1 LB: > { %s810_s22 = sadd.s32 4294967295, %s760_s21   ;;  %p532_p0 = scmp.ge.s32.totalorder %s760_s21, 1  ;;  %s760_s21 = sphi %s804_s21, %s17_s21  }
   0x2   : > { %p179_p1 = scmp.lt.s32.totalorder %s760_s21, 3  ;;  %s762_s23 = smov [#allocation2]  }
   0x3   : > { %s203_s24 = sshll.u32 %s762_s23, 4  ;;  %p947_p3 = scmp.eq.s32.totalorder %s810_s22, 0  ;;  %s204_s24 = int_to_ptr.vmem [resolvable:$true] %s203_s24 }
   0x4   : > { %p814_p2 = pnand %p532_p0, %p179_p1  ;;  %s722_s29 = scalar_lea.hbm %s945_s5, 2048 }
   0x5   : > { %p723_p6 = scmp.ne.s32.totalorder %s945_s5, %s722_s29  ;;  %p729_p10 = scmp.lt.u32.totalorder %s722_s29, %s945_s5 }
   0x6   : > { %s949_s25 = scalar_select %p814_p2, 1, 0 }
   0x7   : > { %p700_p4 = pneg %p814_p2 }
   0x9   : > { %p823_p5 = pnand %p947_p3, %p700_p4 }
   0xb   : > { %p724_p7 = pneg %p823_p5 }
   0xd   : > { %p725_p8 = pnand %p724_p7, %p723_p6 }
   0xf   : > { %p726_p9 = pneg %p725_p8 }
  0x11   : > { %p731_p11 = pnand %p729_p10, %p726_p9 }
  0x13   : > { %734 = shalt.err (!%p731_p11)
}
  0x14   : > { %s735_s10 = scalar_lea.vmem %s204_s24, 2048  ;;  %p743_p1 = scmp.lt.s32.totalorder %s204_s24, %s204_s24 }
  0x15   : > { %p736_p12 = scmp.ne.s32.totalorder %s204_s24, %s735_s10  ;;  %p744_p4 = scmp.lt.s32.totalorder %s735_s10, %s735_s10 }
  0x17   : > { %p738_p13 = pnand %p736_p12, %p724_p7  ;;  %p745_p3 = por %p744_p4, %p743_p1 }
  0x19   : > { %p739_p0 = pneg %p738_p13 }
  0x1b   : > { %p746_p2 = pnand %p745_p3, %p739_p0 }
  0x1d   : > { %749 = shalt.err (!%p746_p2)
}
  0x1e   : > { %s763_s11 = smov 128   ;;  %s764_s12 = smov 8  }
  0x1f   : > { %703 = dma.hbm_to_vmem [thread:$0]  (!%p823_p5), %s945_s5, 2048, %s204_s24, [#allocation3], %s763_s11, %s763_s11, %s764_s12  }
  0x20   : > { %p951_p6 = scmp.ne.s32.totalorder %s949_s25, 0 }
  0x21   : > { %p952_p8 = scmp.eq.s32.totalorder (!%p951_p6), %s810_s22, 0 }
  0x22   : > { %226 = sbr.rel (%p951_p6) target bundleno = 609 (0x261), region = 44 }
  0x29   : > { %755 = dma.done.wait (%p952_p8), [#allocation3], 2048   ;;  %p953_p7 = pmov %p952_p8 }
  0x2a   : > { %p254_p2 = scmp.lt.s32.totalorder %s810_s22, 1  ;;  %v765_v0 = vmov 0   ;;  %v766_v1 = vmov 0.0|0.0   ;;  %v285_v3 = vld [vmem:[%s943_s3] sm:$0xff]  ;;  %v286_v4 = vld [vmem:[%s943_s3 + $0x8] sm:$0xff]  ;;  %v287_v6 = vld [vmem:[%s943_s3 + $0x10] sm:$0xff] }
  0x2b   : > { %757 = vsyncadd (%p953_p7), [#allocation3], 4294965248  ;;  %721 = vset.pattern.permute.xlu0 %v765_v0  ;;  %648 = vmatprep.subr.bf16.mxu0 %v766_v1  ;;  %v649_v5 = vpack.c.bf16 %v286_v4, %v285_v3  ;;  %v288_v7 = vld [vmem:[%s943_s3 + $0x18] sm:$0xff]  ;;  %v289_v9 = vld [vmem:[%s943_s3 + $0x20] sm:$0xff]  ;;  %vm767_vm0 = vmmov 0   ;;  %v768_v12 = vmov 0.0  }
  0x2c   : > { %s955_s22 = smov (!%p254_p2, %s810_s22), 1  ;;  %672 = vmatprep.subr.bf16.mxu1 %v766_v1  ;;  %v652_v8 = vpack.c.bf16 %v288_v7, %v287_v6  ;;  %v290_v10 = vld [vmem:[%s943_s3 + $0x28] sm:$0xff]  ;;  %610 = vmatprep.mubr.msk.f32.mxu0 %vm767_vm0, %v768_v12  ;;  %v378_v13 = vld [vmem:[#allocation2] sm:$0xff]  ;;  %v380_v15 = vld [vmem:[#allocation2 + $0x10] sm:$0xff] }
  0x2d   : > { %s537_s15 = sshll.u32 %s955_s22, 3  ;;  %650 = vmatpush3.bf16.msra.mxu0 %v649_v5  ;;  %v655_v11 = vpack.c.bf16 %v290_v10, %v289_v9  ;;  %v379_v14 = vld [vmem:[#allocation2 + $0x8] sm:$0xff]  ;;  %v291_v16 = vld [vmem:[%s943_s3 + $0x30] sm:$0xff]  ;;  %v292_v17 = vld [vmem:[%s943_s3 + $0x38] sm:$0xff]  ;;  %645 = vmatprep.mubr.msk.f32.mxu1 %vm767_vm0, %v768_v12 }
  0x2e   : > { %s257_s18 = scalar_lea.vmem %s940_s0, %s537_s15  ;;  %651 = vmatprep.subr.bf16.mxu0 %v766_v1  ;;  %v673_v18 = vpack.c.bf16 %v379_v14, %v378_v13  ;;  %v381_v19 = vld [vmem:[#allocation2 + $0x18] sm:$0xff]  ;;  %v658_v21 = vpack.c.bf16 %v292_v17, %v291_v16  ;;  %v382_v22 = vld [vmem:[#allocation2 + $0x20] sm:$0xff]  ;;  %v383_v23 = vld [vmem:[#allocation2 + $0x28] sm:$0xff]  ;;  %s261_s17 = scalar_lea.vmem %s946_s6, %s537_s15 }
  0x2f   : > { %v262_v2 = vld [vmem:[%s257_s18] sm:$0xff]  ;;  %v676_v20 = vpack.c.bf16 %v381_v19, %v380_v15  ;;  %v294_v25 = vld [vmem:[%s943_s3 + $0x48] sm:$0xff]  ;;  %v679_v26 = vpack.c.bf16 %v383_v23, %v382_v22  ;;  %v384_v28 = vld [vmem:[#allocation2 + $0x30] sm:$0xff] }
  0x30   : > { %267 = vperm.xlu0 %721, %v262_v2   ;;  %674 = vmatpush3.bf16.msra.mxu1 %v673_v18  ;;  %v293_v24 = vld [vmem:[%s943_s3 + $0x40] sm:$0xff]  ;;  %v385_v29 = vld [vmem:[#allocation2 + $0x38] sm:$0xff]  ;;  %v295_v30 = vld [vmem:[%s943_s3 + $0x50] sm:$0xff] }
  0x31   : > { %653 = vmatpush3.bf16.msra.mxu0 %v652_v8  ;;  %675 = vmatprep.subr.bf16.mxu1 %v766_v1  ;;  %v661_v27 = vpack.c.bf16 %v294_v25, %v293_v24  ;;  %v296_v31 = vld [vmem:[%s943_s3 + $0x58] sm:$0xff]  ;;  %v682_v32 = vpack.c.bf16 %v385_v29, %v384_v28  ;;  %v386_v34 = vld [vmem:[#allocation2 + $0x40] sm:$0xff]  ;;  %v387_v35 = vld [vmem:[#allocation2 + $0x48] sm:$0xff] }
  0x32   : > { %654 = vmatprep.subr.bf16.mxu0 %v766_v1  ;;  %v664_v33 = vpack.c.bf16 %v296_v31, %v295_v30  ;;  %v297_v36 = vld [vmem:[%s943_s3 + $0x60] sm:$0xff]  ;;  %v298_v37 = vld [vmem:[%s943_s3 + $0x68] sm:$0xff]  ;;  %v685_v38 = vpack.c.bf16 %v387_v35, %v386_v34  ;;  %v388_v40 = vld [vmem:[#allocation2 + $0x50] sm:$0xff] }
  0x33   : > { %v667_v39 = vpack.c.bf16 %v298_v37, %v297_v36  ;;  %v389_v41 = vld [vmem:[#allocation2 + $0x58] sm:$0xff]  ;;  %v299_v42 = vld [vmem:[%s943_s3 + $0x70] sm:$0xff]  ;;  %v390_v46 = vld [vmem:[#allocation2 + $0x60] sm:$0xff] }
  0x34   : > { %677 = vmatpush3.bf16.msra.mxu1 %v676_v20  ;;  %v300_v43 = vld [vmem:[%s943_s3 + $0x78] sm:$0xff]  ;;  %v688_v44 = vpack.c.bf16 %v389_v41, %v388_v40  ;;  %v391_v47 = vld [vmem:[#allocation2 + $0x68] sm:$0xff]  ;;  %v539_v49 = vld [vmem:[%s941_s1] ss:$0 sm:$0xff] }
  0x35   : > { %656 = vmatpush3.bf16.msra.mxu0 %v655_v11  ;;  %678 = vmatprep.subr.bf16.mxu1 %v766_v1  ;;  %v670_v45 = vpack.c.bf16 %v300_v43, %v299_v42  ;;  %v691_v48 = vpack.c.bf16 %v391_v47, %v390_v46  ;;  %v540_v50 = vld [vmem:[%s942_s2] ss:$0 sm:$0xff]  ;;  %v392_v55 = vld [vmem:[#allocation2 + $0x70] sm:$0xff]  ;;  %v393_v56 = vld [vmem:[#allocation2 + $0x78] sm:$0xff] }
  0x36   : > { %657 = vmatprep.subr.bf16.mxu0 %v766_v1  ;;  %v694_v57 = vpack.c.bf16 %v393_v56, %v392_v55  ;;  %v541_v58 = vld [vmem:[%s944_s4] ss:$0 sm:$0xff] }
  0x38   : > { %680 = vmatpush3.bf16.msra.mxu1 %v679_v26 }
  0x39   : > { %659 = vmatpush3.bf16.msra.mxu0 %v658_v21  ;;  %681 = vmatprep.subr.bf16.mxu1 %v766_v1 }
  0x3a   : > { %660 = vmatprep.subr.bf16.mxu0 %v766_v1 }
  0x3c   : > { %683 = vmatpush3.bf16.msra.mxu1 %v682_v32 }
  0x3d   : > { %662 = vmatpush3.bf16.msra.mxu0 %v661_v27  ;;  %684 = vmatprep.subr.bf16.mxu1 %v766_v1 }
  0x3e   : > { %663 = vmatprep.subr.bf16.mxu0 %v766_v1 }
  0x40   : > { %686 = vmatpush3.bf16.msra.mxu1 %v685_v38 }
  0x41   : > { %665 = vmatpush3.bf16.msra.mxu0 %v664_v33  ;;  %687 = vmatprep.subr.bf16.mxu1 %v766_v1 }
  0x42   : > { %666 = vmatprep.subr.bf16.mxu0 %v766_v1 }
  0x44   : > { %689 = vmatpush3.bf16.msra.mxu1 %v688_v44 }
  0x45   : > { %668 = vmatpush3.bf16.msra.mxu0 %v667_v39  ;;  %690 = vmatprep.subr.bf16.mxu1 %v766_v1 }
  0x46   : > { %669 = vmatprep.subr.bf16.mxu0 %v766_v1 }
  0x48   : > { %692 = vmatpush3.bf16.msra.mxu1 %v691_v48 }
  0x49   : > { %671 = vmatpush3.bf16.msra.mxu0 %v670_v45  ;;  %693 = vmatprep.subr.bf16.mxu1 %v766_v1 }
  0x4c   : > { %695 = vmatpush3.bf16.msra.mxu1 %v694_v57 }
  0xaf   : > { %v268_v51 = vpop.permute.xlu0 %267 }
  0xb0   : > { %v276_v52 = vmul.f32 %v539_v49, %v268_v51 }
  0xb2   : > { %v283_v53 = vadd.f32 %v540_v50, %v276_v52 }
  0xb4   : > { %v284_v54 = vmax.f32 %v283_v53, 0.0 }
  0xb6   : > { %611 = vmatmul.mubr.f32.vlgmr.msra.gmra.mrb[0].mxu0 %v284_v54 }
 0x189   : > { %v374_v59 = vpop.f32.mrb[0].mxu0 }
 0x18a   : > { %v375_v60 = vadd.f32 %v541_v58, %v374_v59  ;;  %v612_v61 = vpop.f32.mrb[1].mxu0 }
 0x18c   : > { %646 = vmatmul.mubr.f32.vlgmr.msra.gmra.mrb[0].mxu1 %v375_v60 }
 0x25f   : > { %v460_v62 = vpop.f32.mrb[0].mxu1 }
 0x260   : > { %464 = vst [vmem:[%s261_s17] sm:$0xff] %v460_v62  ;;  %v647_v63 = vpop.f32.mrb[1].mxu1 }
 0x261 PF: > { %s17_s21 = sadd.s32 1, %s760_s21  }
 0x262   : > { %p14_p3 = scmp.ge.s32.totalorder %s17_s21, 4  }
 0x264   :  { %16 = sbr.rel (!%p14_p3) target bundleno = 1 (0x1), region = 79 }
 0x26b   :  { %484 = vsyncpa [#allocation3], 1 }
 0x26c   :  { %486 = vsyncpa [#allocation3 + $0x1], 1 }

// kernel: cross_attention_forward.7
= control target key start
LH: loop header
LB: loop body
LE: loop exit
PB: predicated region body
PF: predicated region fallthrough
CT: control target
= control target key end

     0   :  { %s402_s9 = smov 0   ;;  %s471_s0 = inlined_call_operand.vmem [shape: f32[16,128], index: 0, kind: input, shape index: {}]   ;;  %s472_s1 = inlined_call_operand.vmem [shape: f32[128,128], index: 1, kind: input, shape index: {}]   ;;  %s473_s2 = inlined_call_operand.vmem [shape: f32[16,128], index: 2, kind: output, shape index: {}]  }
   0x1 LB: > { %s280_s10 = sadd.s32 4294967295, %s382_s9   ;;  %p284_p0 = scmp.ge.s32.totalorder %s382_s9, 1  ;;  %s382_s9 = sphi %s402_s9, %s12_s9  }
   0x2   : > { %p111_p1 = scmp.lt.s32.totalorder %s382_s9, 3 }
   0x4   : > { %p112_p2 = pnand %p284_p0, %p111_p1 }
   0x5   : > { %v140_v0 = vld [vmem:[%s472_s1] sm:$0xff] (!%p112_p2)  ;;  %v141_v1 = vld [vmem:[%s472_s1 + $0x8] sm:$0xff] (!%p112_p2)  ;;  %v142_v2 = vld [vmem:[%s472_s1 + $0x10] sm:$0xff] (!%p112_p2)  ;;  %v384_v3 = vmov (!%p112_p2), 0.0|0.0   ;;  %vm385_vm0 = vmmov (!%p112_p2), 0   ;;  %v386_v6 = vmov (!%p112_p2), 0.0  }
   0x6   : > { %115 = sbr.rel (%p112_p2) target bundleno = 252 (0xfc), region = 28  ;;  %341 = vmatprep.subr.bf16.mxu0 (!%p112_p2), %v384_v3  ;;  %v342_v4 = vpack.c.bf16 (!%p112_p2), %v141_v1, %v140_v0  ;;  %v143_v5 = vld [vmem:[%s472_s1 + $0x18] sm:$0xff] (!%p112_p2)  ;;  %338 = vmatprep.mubr.msk.f32.mxu0 (!%p112_p2), %vm385_vm0, %v386_v6  ;;  %v144_v8 = vld [vmem:[%s472_s1 + $0x20] sm:$0xff] (!%p112_p2)  ;;  %v145_v9 = vld [vmem:[%s472_s1 + $0x28] sm:$0xff] (!%p112_p2)  ;;  %p131_p3 = scmp.lt.s32.totalorder (!%p112_p2), %s280_s10, 1 }
   0x7   : > { %v345_v7 = vpack.c.bf16 (!%p112_p2), %v143_v5, %v142_v2  ;;  %v348_v10 = vpack.c.bf16 (!%p112_p2), %v145_v9, %v144_v8  ;;  %v146_v11 = vld [vmem:[%s472_s1 + $0x30] sm:$0xff] (!%p112_p2)  ;;  %v147_v12 = vld [vmem:[%s472_s1 + $0x38] sm:$0xff] (!%p112_p2)  ;;  %v148_v14 = vld [vmem:[%s472_s1 + $0x40] sm:$0xff] (!%p112_p2) }
   0x8   : > { %343 = vmatpush3.bf16.msra.mxu0 (!%p112_p2), %v342_v4  ;;  %v351_v13 = vpack.c.bf16 (!%p112_p2), %v147_v12, %v146_v11  ;;  %v149_v15 = vld [vmem:[%s472_s1 + $0x48] sm:$0xff] (!%p112_p2)  ;;  %v150_v17 = vld [vmem:[%s472_s1 + $0x50] sm:$0xff] (!%p112_p2)  ;;  %v151_v18 = vld [vmem:[%s472_s1 + $0x58] sm:$0xff] (!%p112_p2) }
   0x9   : > { %344 = vmatprep.subr.bf16.mxu0 (!%p112_p2), %v384_v3  ;;  %v354_v16 = vpack.c.bf16 (!%p112_p2), %v149_v15, %v148_v14  ;;  %v357_v19 = vpack.c.bf16 (!%p112_p2), %v151_v18, %v150_v17  ;;  %v152_v20 = vld [vmem:[%s472_s1 + $0x60] sm:$0xff] (!%p112_p2)  ;;  %v153_v21 = vld [vmem:[%s472_s1 + $0x68] sm:$0xff] (!%p112_p2)  ;;  %v154_v23 = vld [vmem:[%s472_s1 + $0x70] sm:$0xff] (!%p112_p2) }
   0xa   : > { %v360_v22 = vpack.c.bf16 (!%p112_p2), %v153_v21, %v152_v20  ;;  %v155_v24 = vld [vmem:[%s472_s1 + $0x78] sm:$0xff] (!%p112_p2) }
   0xb   : > { %v363_v25 = vpack.c.bf16 (!%p112_p2), %v155_v24, %v154_v23 }
   0xc   : > { %346 = vmatpush3.bf16.msra.mxu0 (!%p112_p2), %v345_v7 }
   0xd   : > { %347 = vmatprep.subr.bf16.mxu0 %v384_v3  ;;  %s475_s10 = smov (!%p131_p3, %s280_s10), 1 }
   0xe   : > { %s285_s17 = sshll.u32 %s475_s10, 3 }
   0xf   : > { %s134_s20 = scalar_lea.vmem %s471_s0, %s285_s17  ;;  %s138_s23 = scalar_lea.vmem %s473_s2, %s285_s17 }
  0x10   : > { %349 = vmatpush3.bf16.msra.mxu0 %v348_v10  ;;  %v139_v26 = vld [vmem:[%s134_s20] sm:$0xff] }
  0x11   : > { %350 = vmatprep.subr.bf16.mxu0 %v384_v3 }
  0x14   : > { %352 = vmatpush3.bf16.msra.mxu0 %v351_v13 }
  0x15   : > { %353 = vmatprep.subr.bf16.mxu0 %v384_v3 }
  0x18   : > { %355 = vmatpush3.bf16.msra.mxu0 %v354_v16 }
  0x19   : > { %356 = vmatprep.subr.bf16.mxu0 %v384_v3 }
  0x1c   : > { %358 = vmatpush3.bf16.msra.mxu0 %v357_v19 }
  0x1d   : > { %359 = vmatprep.subr.bf16.mxu0 %v384_v3 }
  0x20   : > { %361 = vmatpush3.bf16.msra.mxu0 %v360_v22 }
  0x21   : > { %362 = vmatprep.subr.bf16.mxu0 %v384_v3 }
  0x24   : > { %364 = vmatpush3.bf16.msra.mxu0 %v363_v25 }
  0x27   : > { %339 = vmatmul.mubr.f32.vlgmr.msra.gmra.mrb[0].mxu0 %v139_v26 }
  0xfa   : > { %v222_v27 = vpop.f32.mrb[0].mxu0 }
  0xfb   : > { %226 = vst [vmem:[%s138_s23] sm:$0xff] %v222_v27  ;;  %v340_v28 = vpop.f32.mrb[1].mxu0 }
  0xfc PF: > { %s12_s9 = sadd.s32 1, %s382_s9  }
  0xfd   : > { %p9_p4 = scmp.ge.s32.totalorder %s12_s9, 4  }
  0xff   :  { %11 = sbr.rel (!%p9_p4) target bundleno = 1 (0x1), region = 58 }

// kernel: cross_attention_forward.6
= control target key start
LH: loop header
LB: loop body
LE: loop exit
PB: predicated region body
PF: predicated region fallthrough
CT: control target
= control target key end

     0   :  { %s803_s24 = smov 0   ;;  %s949_s0 = inlined_call_operand.vmem [shape: f32[16,1], index: 0, kind: input, shape index: {}]   ;;  %s950_s1 = inlined_call_operand.vmem [shape: f32[1,128], index: 1, kind: input, shape index: {}]   ;;  %s951_s2 = inlined_call_operand.vmem [shape: f32[1,128], index: 2, kind: input, shape index: {}]   ;;  %s952_s3 = inlined_call_operand.vmem [shape: f32[128,128], index: 3, kind: input, shape index: {}]   ;;  %s953_s4 = inlined_call_operand.vmem [shape: f32[1,128], index: 4, kind: input, shape index: {}]   ;;  %s954_s5 = inlined_call_operand.vmem [shape: f32[128,128], index: 5, kind: input, shape index: {}]   ;;  %s955_s6 = inlined_call_operand.vmem [shape: f32[16,128], index: 6, kind: output, shape index: {0}]   ;;  %s956_s7 = inlined_call_operand.vmem [shape: f32[16,128], index: 7, kind: output, shape index: {1}]  }
   0x1 LB: > { %s573_s25 = sadd.s32 4294967295, %s757_s24   ;;  %p577_p0 = scmp.ge.s32.totalorder %s757_s24, 1  ;;  %s757_s24 = sphi %s803_s24, %s18_s24  }
   0x2   : > { %p239_p1 = scmp.lt.s32.totalorder %s757_s24, 3 }
   0x4   : > { %p240_p2 = pnand %p577_p0, %p239_p1 }
   0x5   : > { %p273_p3 = scmp.lt.s32.totalorder (!%p240_p2), %s573_s25, 1  ;;  %v308_v0 = vld [vmem:[%s952_s3] sm:$0xff] (!%p240_p2)  ;;  %v309_v1 = vld [vmem:[%s952_s3 + $0x8] sm:$0xff] (!%p240_p2)  ;;  %v310_v2 = vld [vmem:[%s952_s3 + $0x10] sm:$0xff] (!%p240_p2)  ;;  %v759_v3 = vmov (!%p240_p2), 0   ;;  %v760_v4 = vmov (!%p240_p2), 0.0|0.0  }
   0x6   : > { %243 = sbr.rel (%p240_p2) target bundleno = 578 (0x242), region = 44  ;;  %750 = vset.pattern.permute.xlu0 (!%p240_p2), %v759_v3  ;;  %690 = vmatprep.subr.bf16.mxu0 (!%p240_p2), %v760_v4  ;;  %v691_v5 = vpack.c.bf16 (!%p240_p2), %v309_v1, %v308_v0  ;;  %v311_v6 = vld [vmem:[%s952_s3 + $0x18] sm:$0xff] (!%p240_p2)  ;;  %v312_v8 = vld [vmem:[%s952_s3 + $0x20] sm:$0xff] (!%p240_p2)  ;;  %v313_v9 = vld [vmem:[%s952_s3 + $0x28] sm:$0xff] (!%p240_p2)  ;;  %vm761_vm0 = vmmov (!%p240_p2), 0   ;;  %v762_v17 = vmov (!%p240_p2), 0.0  }
   0x7   : > { %714 = vmatprep.subr.bf16.mxu1 (!%p240_p2), %v760_v4  ;;  %v694_v7 = vpack.c.bf16 (!%p240_p2), %v311_v6, %v310_v2  ;;  %v697_v11 = vpack.c.bf16 (!%p240_p2), %v313_v9, %v312_v8  ;;  %v314_v12 = vld [vmem:[%s952_s3 + $0x30] sm:$0xff] (!%p240_p2)  ;;  %v315_v13 = vld [vmem:[%s952_s3 + $0x38] sm:$0xff] (!%p240_p2)  ;;  %v316_v15 = vld [vmem:[%s952_s3 + $0x40] sm:$0xff] (!%p240_p2)  ;;  %652 = vmatprep.mubr.msk.f32.mxu0 (!%p240_p2), %vm761_vm0, %v762_v17 }
   0x8   : > { %692 = vmatpush3.bf16.msra.mxu0 (!%p240_p2), %v691_v5  ;;  %v700_v14 = vpack.c.bf16 (!%p240_p2), %v315_v13, %v314_v12  ;;  %v317_v16 = vld [vmem:[%s952_s3 + $0x48] sm:$0xff] (!%p240_p2)  ;;  %v402_v18 = vld [vmem:[%s954_s5] sm:$0xff] (!%p240_p2)  ;;  %v404_v20 = vld [vmem:[%s954_s5 + $0x10] sm:$0xff] (!%p240_p2)  ;;  %687 = vmatprep.mubr.msk.f32.mxu1 (!%p240_p2), %vm761_vm0, %v762_v17 }
   0x9   : > { %693 = vmatprep.subr.bf16.mxu0 (!%p240_p2), %v760_v4  ;;  %v403_v19 = vld [vmem:[%s954_s5 + $0x8] sm:$0xff] (!%p240_p2)  ;;  %v405_v22 = vld [vmem:[%s954_s5 + $0x18] sm:$0xff] (!%p240_p2)  ;;  %v703_v23 = vpack.c.bf16 (!%p240_p2), %v317_v16, %v316_v15  ;;  %v318_v24 = vld [vmem:[%s952_s3 + $0x50] sm:$0xff] (!%p240_p2) }
   0xa   : > { %v715_v21 = vpack.c.bf16 (!%p240_p2), %v403_v19, %v402_v18  ;;  %v319_v25 = vld [vmem:[%s952_s3 + $0x58] sm:$0xff] (!%p240_p2)  ;;  %v718_v26 = vpack.c.bf16 (!%p240_p2), %v405_v22, %v404_v20  ;;  %v406_v27 = vld [vmem:[%s954_s5 + $0x20] sm:$0xff] (!%p240_p2)  ;;  %v407_v28 = vld [vmem:[%s954_s5 + $0x28] sm:$0xff] (!%p240_p2) }
   0xb   : > { %v706_v29 = vpack.c.bf16 (!%p240_p2), %v319_v25, %v318_v24  ;;  %v320_v30 = vld [vmem:[%s952_s3 + $0x60] sm:$0xff] (!%p240_p2)  ;;  %v321_v31 = vld [vmem:[%s952_s3 + $0x68] sm:$0xff] (!%p240_p2)  ;;  %v721_v32 = vpack.c.bf16 (!%p240_p2), %v407_v28, %v406_v27  ;;  %v408_v33 = vld [vmem:[%s954_s5 + $0x30] sm:$0xff] (!%p240_p2) }
   0xc   : > { %695 = vmatpush3.bf16.msra.mxu0 (!%p240_p2), %v694_v7  ;;  %716 = vmatpush3.bf16.msra.mxu1 (!%p240_p2), %v715_v21  ;;  %v409_v34 = vld [vmem:[%s954_s5 + $0x38] sm:$0xff] (!%p240_p2)  ;;  %v709_v35 = vpack.c.bf16 (!%p240_p2), %v321_v31, %v320_v30  ;;  %v322_v36 = vld [vmem:[%s952_s3 + $0x70] sm:$0xff] (!%p240_p2)  ;;  %v410_v39 = vld [vmem:[%s954_s5 + $0x40] sm:$0xff] (!%p240_p2) }
   0xd   : > { %s958_s25 = smov (!%p273_p3, %s573_s25), 1  ;;  %696 = vmatprep.subr.bf16.mxu0 %v760_v4  ;;  %717 = vmatprep.subr.bf16.mxu1 %v760_v4  ;;  %v323_v37 = vld [vmem:[%s952_s3 + $0x78] sm:$0xff]  ;;  %v724_v38 = vpack.c.bf16 %v409_v34, %v408_v33  ;;  %v411_v40 = vld [vmem:[%s954_s5 + $0x48] sm:$0xff]  ;;  %v412_v43 = vld [vmem:[%s954_s5 + $0x50] sm:$0xff] }
   0xe   : > { %s825_s11 = sshll.u32 %s958_s25, 3  ;;  %v712_v41 = vpack.c.bf16 %v323_v37, %v322_v36  ;;  %v727_v42 = vpack.c.bf16 %v411_v40, %v410_v39  ;;  %v413_v44 = vld [vmem:[%s954_s5 + $0x58] sm:$0xff]  ;;  %v414_v46 = vld [vmem:[%s954_s5 + $0x60] sm:$0xff]  ;;  %v415_v47 = vld [vmem:[%s954_s5 + $0x68] sm:$0xff] }
   0xf   : > { %s276_s18 = scalar_lea.vmem %s949_s0, %s825_s11  ;;  %v730_v45 = vpack.c.bf16 %v413_v44, %v412_v43  ;;  %v733_v48 = vpack.c.bf16 %v415_v47, %v414_v46  ;;  %v581_v49 = vld [vmem:[%s950_s1] ss:$0 sm:$0xff]  ;;  %v416_v55 = vld [vmem:[%s954_s5 + $0x70] sm:$0xff]  ;;  %v417_v56 = vld [vmem:[%s954_s5 + $0x78] sm:$0xff]  ;;  %s280_s16 = scalar_lea.vmem %s955_s6, %s825_s11 }
  0x10   : > { %v285_v10 = vld [vmem:[%s276_s18] sm:$0xff]  ;;  %698 = vmatpush3.bf16.msra.mxu0 %v697_v11  ;;  %719 = vmatpush3.bf16.msra.mxu1 %v718_v26  ;;  %v736_v57 = vpack.c.bf16 %v417_v56, %v416_v55  ;;  %s284_s19 = scalar_lea.vmem %s956_s7, %s825_s11 }
  0x11   : > { %290 = vperm.xlu0 %750, %v285_v10   ;;  %699 = vmatprep.subr.bf16.mxu0 %v760_v4  ;;  %v582_v50 = vld [vmem:[%s951_s2] ss:$0 sm:$0xff] }
  0x12   : > { %720 = vmatprep.subr.bf16.mxu1 %v760_v4  ;;  %v583_v58 = vld [vmem:[%s953_s4] ss:$0 sm:$0xff] }
  0x14   : > { %701 = vmatpush3.bf16.msra.mxu0 %v700_v14  ;;  %722 = vmatpush3.bf16.msra.mxu1 %v721_v32 }
  0x15   : > { %702 = vmatprep.subr.bf16.mxu0 %v760_v4  ;;  %723 = vmatprep.subr.bf16.mxu1 %v760_v4 }
  0x18   : > { %704 = vmatpush3.bf16.msra.mxu0 %v703_v23  ;;  %725 = vmatpush3.bf16.msra.mxu1 %v724_v38 }
  0x19   : > { %705 = vmatprep.subr.bf16.mxu0 %v760_v4  ;;  %726 = vmatprep.subr.bf16.mxu1 %v760_v4 }
  0x1c   : > { %707 = vmatpush3.bf16.msra.mxu0 %v706_v29  ;;  %728 = vmatpush3.bf16.msra.mxu1 %v727_v42 }
  0x1d   : > { %708 = vmatprep.subr.bf16.mxu0 %v760_v4  ;;  %729 = vmatprep.subr.bf16.mxu1 %v760_v4 }
  0x20   : > { %710 = vmatpush3.bf16.msra.mxu0 %v709_v35  ;;  %731 = vmatpush3.bf16.msra.mxu1 %v730_v45 }
  0x21   : > { %711 = vmatprep.subr.bf16.mxu0 %v760_v4  ;;  %732 = vmatprep.subr.bf16.mxu1 %v760_v4 }
  0x24   : > { %713 = vmatpush3.bf16.msra.mxu0 %v712_v41  ;;  %734 = vmatpush3.bf16.msra.mxu1 %v733_v48 }
  0x25   : > { %735 = vmatprep.subr.bf16.mxu1 %v760_v4 }
  0x28   : > { %737 = vmatpush3.bf16.msra.mxu1 %v736_v57 }
  0x90   : > { %v291_v51 = vpop.permute.xlu0 %290 }
  0x91   : > { %v299_v52 = vmul.f32 %v581_v49, %v291_v51 }
  0x93   : > { %v306_v53 = vadd.f32 %v582_v50, %v299_v52 }
  0x95   : > { %v307_v54 = vmax.f32 %v306_v53, 0.0 }
  0x97   : > { %653 = vmatmul.mubr.f32.vlgmr.msra.gmra.mrb[0].mxu0 %v307_v54 }
 0x16a   : > { %v397_v59 = vpop.f32.mrb[0].mxu0 }
 0x16b   : > { %v398_v60 = vadd.f32 %v583_v58, %v397_v59  ;;  %v654_v61 = vpop.f32.mrb[1].mxu0 }
 0x16d   : > { %401 = vst [vmem:[%s280_s16] sm:$0xff] %v398_v60  ;;  %688 = vmatmul.mubr.f32.vlgmr.msra.gmra.mrb[0].mxu1 %v398_v60 }
 0x240   : > { %v484_v62 = vpop.f32.mrb[0].mxu1 }
 0x241   : > { %488 = vst [vmem:[%s284_s19] sm:$0xff] %v484_v62  ;;  %v689_v63 = vpop.f32.mrb[1].mxu1 }
 0x242 PF: > { %s18_s24 = sadd.s32 1, %s757_s24  }
 0x243   : > { %p15_p4 = scmp.ge.s32.totalorder %s18_s24, 4  }
 0x245   :  { %17 = sbr.rel (!%p15_p4) target bundleno = 1 (0x1), region = 86 }

// kernel: cross_attention_forward.9
= control target key start
LH: loop header
LB: loop body
LE: loop exit
PB: predicated region body
PF: predicated region fallthrough
CT: control target
= control target key end

     0   :  { %15 = vsyncpa [#allocation3], 0  ;;  %s1274_s0 = inlined_call_operand.vmem [shape: f32[16,128], index: 0, kind: input, shape index: {}]   ;;  %s1275_s1 = inlined_call_operand.vmem [shape: f32[16,128], index: 1, kind: input, shape index: {}]   ;;  %s1276_s2 = inlined_call_operand.vmem [shape: f32[128,128], index: 2, kind: input, shape index: {}]   ;;  %s1277_s3 = inlined_call_operand.vmem [shape: f32[1,128], index: 3, kind: input, shape index: {}]   ;;  %s1278_s4 = inlined_call_operand.vmem [shape: f32[128,128], index: 4, kind: input, shape index: {}]   ;;  %s1279_s5 = inlined_call_operand.vmem [shape: f32[1,128], index: 5, kind: input, shape index: {}]   ;;  %s1280_s6 = inlined_call_operand.vmem [shape: f32[1,128], index: 6, kind: input, shape index: {}]   ;;  %s1281_s7 = inlined_call_operand.vmem [shape: f32[1,128], index: 7, kind: input, shape index: {}]   ;;  %s1282_s8 = inlined_call_operand.vmem [shape: f32[1,128], index: 8, kind: input, shape index: {}]   ;;  %s1283_s9 = inlined_call_operand.vmem [shape: f32[1,128], index: 9, kind: input, shape index: {}]   ;;  %s1284_s10 = inlined_call_operand.hbm [shape: f32[16,128], index: 10, kind: output, shape index: {}]  }
   0x1   :  { %17 = vsyncpa [#allocation3 + $0x1], 0  ;;  %s1041_s13 = smov 0   ;;  %s1043_s14 = smov 0  }
   0x2   :  { %s1045_s15 = smov 0   ;;  %s1047_s16 = smov 0  }
   0x3 LB: > { %s1062_s17 = sadd.s32 4294967295, %s980_s16   ;;  %s703_s18 = sadd.s32 4294967294, %s980_s16   ;;  %s980_s16 = sphi %s1047_s16, %s1292_s16   ;;  %s976_s15 = sphi %s1045_s15, %s1291_s15   ;;  %s972_s14 = sphi %s1043_s14, %s1290_s14   ;;  %s968_s13 = sphi %s1041_s13, %s1289_s13  }
   0x4   : > { %s1066_s19 = sadd.s32 1, %s980_s16   ;;  %s250_s20 = sadd.s32 1, %s976_s15 }
   0x5   : > { %s247_s21 = ssub.s32 %s980_s16, %s1066_s19  ;;  %p260_p0 = scmp.ne.s32.totalorder %s976_s15, %s972_s14 }
   0x6   : > { %p248_p1 = scmp.eq.s32.totalorder %s247_s21, 0  ;;  %p261_p2 = scmp.eq.s32.totalorder %s1062_s17, 1 }
   0x7   : > { %p266_p3 = scmp.ne.s32.totalorder %s972_s14, %s968_s13  ;;  %p267_p4 = scmp.eq.s32.totalorder %s703_s18, 1 }
   0x8   : > { %s1077_s22 = scalar_select %p248_p1, %s976_s15, %s250_s20  }
   0x9   : > { %p1079_p5 = por %p261_p2, %p260_p0  ;;  %p1083_p6 = por %p267_p4, %p266_p3 }
   0xa   : > { %1285 = sst [smem:[#allocation5_spill]] %s1077_s22  ;;  %p706_p7 = scmp.ge.s32.totalorder %s980_s16, 1 }
   0xb   : > { %p323_p8 = scmp.lt.s32.totalorder %s980_s16, 3 }
   0xd   : > { %p324_p9 = pnand %p706_p7, %p323_p8 }
   0xe   : > { %v373_v0 = vld [vmem:[%s1276_s2] sm:$0xff] (!%p324_p9)  ;;  %v374_v1 = vld [vmem:[%s1276_s2 + $0x8] sm:$0xff] (!%p324_p9)  ;;  %v375_v2 = vld [vmem:[%s1276_s2 + $0x10] sm:$0xff] (!%p324_p9)  ;;  %v982_v3 = vmov (!%p324_p9), 0.0|0.0   ;;  %vm983_vm0 = vmmov (!%p324_p9), 0   ;;  %v984_v6 = vmov (!%p324_p9), 0.0  }
   0xf   : > { %327 = sbr.rel (%p324_p9) target bundleno = 1116 (0x45c), region = 60  ;;  %824 = vmatprep.subr.bf16.mxu0 (!%p324_p9), %v982_v3  ;;  %v825_v4 = vpack.c.bf16 (!%p324_p9), %v374_v1, %v373_v0  ;;  %v376_v5 = vld [vmem:[%s1276_s2 + $0x18] sm:$0xff] (!%p324_p9)  ;;  %786 = vmatprep.mubr.msk.f32.mxu0 (!%p324_p9), %vm983_vm0, %v984_v6  ;;  %v377_v8 = vld [vmem:[%s1276_s2 + $0x20] sm:$0xff] (!%p324_p9)  ;;  %v378_v9 = vld [vmem:[%s1276_s2 + $0x28] sm:$0xff] (!%p324_p9)  ;;  %p364_p10 = scmp.lt.s32.totalorder (!%p324_p9), %s1062_s17, 1 }
  0x10   : > { %848 = vmatprep.subr.bf16.mxu1 (!%p324_p9), %v982_v3  ;;  %821 = vmatprep.mubr.msk.f32.mxu1 (!%p324_p9), %vm983_vm0, %v984_v6  ;;  %v828_v7 = vpack.c.bf16 (!%p324_p9), %v376_v5, %v375_v2  ;;  %v831_v10 = vpack.c.bf16 (!%p324_p9), %v378_v9, %v377_v8  ;;  %v379_v11 = vld [vmem:[%s1276_s2 + $0x30] sm:$0xff] (!%p324_p9)  ;;  %v380_v12 = vld [vmem:[%s1276_s2 + $0x38] sm:$0xff] (!%p324_p9)  ;;  %v381_v14 = vld [vmem:[%s1276_s2 + $0x40] sm:$0xff] (!%p324_p9)  ;;  %s361_s21 = sand.u32 (!%p324_p9), 1, %s972_s14   ;;  %s717_s29 = sshll.u32 (!%p324_p9), %s1062_s17, 7 }
  0x11   : > { %826 = vmatpush3.bf16.msra.mxu0 (!%p324_p9), %v825_v4  ;;  %v834_v13 = vpack.c.bf16 (!%p324_p9), %v380_v12, %v379_v11  ;;  %v382_v15 = vld [vmem:[%s1276_s2 + $0x48] sm:$0xff] (!%p324_p9)  ;;  %v383_v17 = vld [vmem:[%s1276_s2 + $0x50] sm:$0xff] (!%p324_p9)  ;;  %v384_v18 = vld [vmem:[%s1276_s2 + $0x58] sm:$0xff] (!%p324_p9)  ;;  %s707_s26 = sshll.u32 (!%p324_p9), %s361_s21, 3  ;;  %s1232_s20 = scalar_lea.hbm (!%p324_p9), %s1284_s10, %s717_s29 }
  0x12   : > { %827 = vmatprep.subr.bf16.mxu0 (!%p324_p9), %v982_v3  ;;  %v837_v16 = vpack.c.bf16 (!%p324_p9), %v382_v15, %v381_v14  ;;  %v840_v19 = vpack.c.bf16 (!%p324_p9), %v384_v18, %v383_v17  ;;  %v385_v20 = vld [vmem:[%s1276_s2 + $0x60] sm:$0xff] (!%p324_p9)  ;;  %v386_v21 = vld [vmem:[%s1276_s2 + $0x68] sm:$0xff] (!%p324_p9)  ;;  %v387_v23 = vld [vmem:[%s1276_s2 + $0x70] sm:$0xff] (!%p324_p9)  ;;  %s363_s30 = scalar_lea.vmem (!%p324_p9), [#allocation2], %s707_s26  ;;  %s619_s27 = scalar_lea.sflag (!%p324_p9), [#allocation3], %s361_s21 }
  0x13   : > { %v843_v22 = vpack.c.bf16 (!%p324_p9), %v386_v21, %v385_v20  ;;  %v388_v24 = vld [vmem:[%s1276_s2 + $0x78] sm:$0xff] (!%p324_p9)  ;;  %v710_v27 = vld [vmem:[%s1277_s3] ss:$0 sm:$0xff] (!%p324_p9)  ;;  %v497_v34 = vld [vmem:[%s1278_s4 + $0x8] sm:$0xff] (!%p324_p9) }
  0x14   : > { %v846_v25 = vpack.c.bf16 (!%p324_p9), %v388_v24, %v387_v23  ;;  %v496_v33 = vld [vmem:[%s1278_s4] sm:$0xff] (!%p324_p9)  ;;  %v498_v35 = vld [vmem:[%s1278_s4 + $0x10] sm:$0xff] (!%p324_p9)  ;;  %v499_v37 = vld [vmem:[%s1278_s4 + $0x18] sm:$0xff] (!%p324_p9) }
  0x15   : > { %829 = vmatpush3.bf16.msra.mxu0 (!%p324_p9), %v828_v7  ;;  %v849_v36 = vpack.c.bf16 (!%p324_p9), %v497_v34, %v496_v33  ;;  %v852_v38 = vpack.c.bf16 (!%p324_p9), %v499_v37, %v498_v35  ;;  %v500_v39 = vld [vmem:[%s1278_s4 + $0x20] sm:$0xff] (!%p324_p9)  ;;  %v501_v40 = vld [vmem:[%s1278_s4 + $0x28] sm:$0xff] (!%p324_p9)  ;;  %v502_v46 = vld [vmem:[%s1278_s4 + $0x30] sm:$0xff] (!%p324_p9) }
  0x16   : > { %830 = vmatprep.subr.bf16.mxu0 %v982_v3  ;;  %s365_s11 = scalar_select %p364_p10, %s1062_s17, 1  ;;  %v855_v41 = vpack.c.bf16 %v501_v40, %v500_v39  ;;  %v503_v47 = vld [vmem:[%s1278_s4 + $0x38] sm:$0xff]  ;;  %v504_v49 = vld [vmem:[%s1278_s4 + $0x40] sm:$0xff]  ;;  %v505_v50 = vld [vmem:[%s1278_s4 + $0x48] sm:$0xff] }
  0x17   : > { %850 = vmatpush3.bf16.msra.mxu1 %v849_v36  ;;  %v858_v48 = vpack.c.bf16 %v503_v47, %v502_v46  ;;  %v861_v51 = vpack.c.bf16 %v505_v50, %v504_v49  ;;  %v506_v52 = vld [vmem:[%s1278_s4 + $0x50] sm:$0xff]  ;;  %v507_v53 = vld [vmem:[%s1278_s4 + $0x58] sm:$0xff]  ;;  %v508_v55 = vld [vmem:[%s1278_s4 + $0x60] sm:$0xff]  ;;  %s985_s17 = smov [#allocation2]  }
  0x18   : > { %s708_s25 = sshll.u32 %s365_s11, 3  ;;  %851 = vmatprep.subr.bf16.mxu1 %v982_v3  ;;  %v864_v54 = vpack.c.bf16 %v507_v53, %v506_v52  ;;  %v509_v56 = vld [vmem:[%s1278_s4 + $0x68] sm:$0xff]  ;;  %v510_v58 = vld [vmem:[%s1278_s4 + $0x70] sm:$0xff]  ;;  %v511_v59 = vld [vmem:[%s1278_s4 + $0x78] sm:$0xff]  ;;  %s922_s26 = sshll.u32 %s985_s17, 4  ;;  %s923_s26 = int_to_ptr.vmem [resolvable:$false] %s922_s26 }
  0x19   : > { %832 = vmatpush3.bf16.msra.mxu0 %v831_v10  ;;  %s367_s28 = scalar_lea.vmem %s1274_s0, %s708_s25  ;;  %s371_s12 = scalar_lea.vmem %s1275_s1, %s708_s25  ;;  %v867_v57 = vpack.c.bf16 %v509_v56, %v508_v55  ;;  %v870_v60 = vpack.c.bf16 %v511_v59, %v510_v58  ;;  %v711_v1 = vld [vmem:[%s1280_s6] ss:$0 sm:$0xff] }
  0x1a   : > { %833 = vmatprep.subr.bf16.mxu0 %v982_v3  ;;  %v372_v26 = vld [vmem:[%s367_s28] sm:$0xff]  ;;  %s924_s22 = scalar_lea.vmem %s923_s26, 256 }
  0x1b   : > { %v466_v29 = vld [vmem:[%s371_s12] sm:$0xff]  ;;  %853 = vmatpush3.bf16.msra.mxu1 %v852_v38  ;;  %s632_s12 = sshll.u32 %s363_s30, 4  ;;  %s1234_s12 = int_to_ptr.vmem [resolvable:$true] %s632_s12 }
  0x1c   : > { %854 = vmatprep.subr.bf16.mxu1 %v982_v3  ;;  %v712_v4 = vld [vmem:[%s1281_s7] ss:$0 sm:$0xff]  ;;  %s918_s25 = scalar_lea.vmem %s1234_s12, 128  ;;  %p925_p0 = scmp.lt.s32.totalorder %s1234_s12, %s923_s26 }
  0x1d   : > { %835 = vmatpush3.bf16.msra.mxu0 %v834_v13  ;;  %v715_v21 = vld [vmem:[%s1283_s9] ss:$0 sm:$0xff]  ;;  %p919_p11 = scmp.ne.s32.totalorder %s1234_s12, %s918_s25  ;;  %p926_p1 = scmp.lt.s32.totalorder %s924_s22, %s918_s25 }
  0x1e   : > { %836 = vmatprep.subr.bf16.mxu0 %v982_v3 }
  0x1f   : > { %856 = vmatpush3.bf16.msra.mxu1 %v855_v41  ;;  %p920_p12 = pnand %p919_p11, %p1079_p5  ;;  %p927_p2 = por %p926_p1, %p925_p0 }
  0x20   : > { %857 = vmatprep.subr.bf16.mxu1 %v982_v3 }
  0x21   : > { %838 = vmatpush3.bf16.msra.mxu0 %v837_v16  ;;  %p921_p13 = pneg %p920_p12 }
  0x22   : > { %839 = vmatprep.subr.bf16.mxu0 %v982_v3 }
  0x23   : > { %859 = vmatpush3.bf16.msra.mxu1 %v858_v48  ;;  %p928_p3 = pnand %p927_p2, %p921_p13 }
  0x24   : > { %860 = vmatprep.subr.bf16.mxu1 %v982_v3 }
  0x25   : > { %841 = vmatpush3.bf16.msra.mxu0 %v840_v19  ;;  %v714_v19 = vld [vmem:[%s1282_s8] ss:$0 sm:$0xff] }
  0x26   : > { %842 = vmatprep.subr.bf16.mxu0 %v982_v3 }
  0x27   : > { %862 = vmatpush3.bf16.msra.mxu1 %v861_v51 }
  0x28   : > { %863 = vmatprep.subr.bf16.mxu1 %v982_v3 }
  0x29   : > { %844 = vmatpush3.bf16.msra.mxu0 %v843_v22 }
  0x2a   : > { %845 = vmatprep.subr.bf16.mxu0 %v982_v3 }
  0x2b   : > { %865 = vmatpush3.bf16.msra.mxu1 %v864_v54 }
  0x2c   : > { %866 = vmatprep.subr.bf16.mxu1 %v982_v3 }
  0x2d   : > { %847 = vmatpush3.bf16.msra.mxu0 %v846_v25 }
  0x2f   : > { %868 = vmatpush3.bf16.msra.mxu1 %v867_v57 }
  0x30   : > { %787 = vmatmul.mubr.f32.vlgmr.msra.gmra.mrb[0].mxu0 %v372_v26  ;;  %869 = vmatprep.subr.bf16.mxu1 %v982_v3  ;;  %v713_v3 = vld [vmem:[%s1279_s5] ss:$0 sm:$0xff] }
  0x33   : > { %871 = vmatpush3.bf16.msra.mxu1 %v870_v60 }
 0x103   : > { %v462_v28 = vpop.f32.mrb[0].mxu0 }
 0x104   : > { %v463_v30 = vadd.f32 %v710_v27, %v462_v28  ;;  %v788_v31 = vpop.f32.mrb[1].mxu0 }
 0x106   : > { %v467_v32 = vadd.f32 %v466_v29, %v463_v30 }
 0x108   : > { %470 = vadd.xlane.f32.xlu0 %v467_v32 }
 0x195   : > { %v471_v42 = vpop.xlane.xlu0 %470 }
 0x196   : > { %v473_v43 = vmul.f32 0.0078125, %v471_v42 }
 0x198   : > { %v474_v44 = vsub.f32 %v467_v32, %v473_v43 }
 0x19a   : > { %v475_v45 = vmul.f32 %v474_v44, %v474_v44 }
 0x19c   : > { %476 = vadd.xlane.f32.xlu0 %v475_v45 }
 0x229   : > { %v477_v61 = vpop.xlane.xlu0 %476 }
 0x22a   : > { %v478_v62 = vmul.f32 0.0078125, %v477_v61 }
 0x22c   : > { %v479_v63 = vadd.f32 1e-05, %v478_v62 }
 0x22e   : > { %914 = vrsqrt.f32 %v479_v63 }
 0x238   : > { %v915_v0 = vpop.eup %914 }
 0x239   : > { %v481_v2 = vmul.f32 %v915_v0, %v474_v44 }
 0x23b   : > { %v488_v5 = vmul.f32 %v711_v1, %v481_v2 }
 0x23d   : > { %v495_v6 = vadd.f32 %v712_v4, %v488_v5 }
 0x23f   : > { %822 = vmatmul.mubr.f32.vlgmr.msra.gmra.mrb[0].mxu1 %v495_v6 }
 0x312   : > { %v585_v7 = vpop.f32.mrb[0].mxu1 }
 0x313   : > { %v586_v8 = vadd.f32 %v713_v3, %v585_v7  ;;  %v823_v9 = vpop.f32.mrb[1].mxu1 }
 0x315   : > { %v589_v10 = vadd.f32 %v586_v8, %v495_v6 }
 0x317   : > { %592 = vadd.xlane.f32.xlu1 %v589_v10 }
 0x3a4   : > { %v593_v11 = vpop.xlane.xlu1 %592 }
 0x3a5   : > { %v594_v12 = vmul.f32 0.0078125, %v593_v11 }
 0x3a7   : > { %v595_v13 = vsub.f32 %v589_v10, %v594_v12 }
 0x3a9   : > { %v596_v14 = vmul.f32 %v595_v13, %v595_v13 }
 0x3ab   : > { %597 = vadd.xlane.f32.xlu1 %v596_v14 }
 0x438   : > { %v598_v15 = vpop.xlane.xlu1 %597 }
 0x439   : > { %v599_v16 = vmul.f32 0.0078125, %v598_v15 }
 0x43b   : > { %v600_v17 = vadd.f32 1e-05, %v599_v16 }
 0x43d   : > { %916 = vrsqrt.f32 %v600_v17 }
 0x447   : > { %v917_v18 = vpop.eup %916 }
 0x448   : > { %v602_v20 = vmul.f32 %v917_v18, %v595_v13 }
 0x44a   : > { %v609_v22 = vmul.f32 %v714_v19, %v602_v20 }
 0x44c   : > { %v616_v23 = vadd.f32 %v715_v21, %v609_v22 }
 0x44e   : > { %617 = vst [vmem:[%s363_s30] sm:$0xff] %v616_v23 }
 0x44f   : > { %931 = shalt.err (!%p928_p3)
}
 0x450   : > { %s932_s21 = scalar_lea.hbm %s1232_s20, 128  ;;  %s936_s30 = scalar_lea.hbm %s1284_s10, 256 }
 0x451   : > { %p933_p4 = scmp.ne.s32.totalorder %s1232_s20, %s932_s21  ;;  %p937_p9 = scmp.lt.u32.totalorder %s1232_s20, %s1284_s10 }
 0x452   : > { %p938_p10 = scmp.lt.u32.totalorder %s936_s30, %s932_s21  ;;  %p940_p12 = scmp.lt.u32.totalorder %s932_s21, %s1232_s20 }
 0x453   : > { %p934_p7 = pnand %p933_p4, %p1079_p5 }
 0x454   : > { %p939_p11 = por %p938_p10, %p937_p9 }
 0x455   : > { %p935_p8 = pneg %p934_p7 }
 0x456   : > { %p941_p13 = por %p940_p12, %p939_p11 }
 0x458   : > { %p942_p0 = pnand %p941_p13, %p935_p8 }
 0x45a   : > { %945 = shalt.err (!%p942_p0)
}
 0x45b   : > { %872 = dma.vmem_to_hbm [thread:$0]  (%p1079_p5), %s1234_s12, 128, %s1232_s20, %s619_s27  }
 0x45c PF: > { %p878_p1 = scmp.ge.s32.totalorder %s980_s16, 2  ;;  %s644_s25 = sand.u32 1, %s968_s13  }
 0x45d   : > { %s645_s17 = scalar_lea.sflag [#allocation3], %s644_s25 }
 0x45e   : > { %p875_p2 = pnand %p878_p1, %p1083_p6 }
 0x460   : > { %963 = dma.done.wait (!%p875_p2), %s645_s17, 128  }
 0x461   : > { %965 = vsyncadd (!%p875_p2), %s645_s17, 4294967168  ;;  %s1288_s26 = sld [smem:[#allocation5_spill]]  ;;  %p20_p3 = scmp.ge.s32.totalorder %s1066_s19, 4  }
 0x462   : > { %s1289_s13 = smov %s972_s14  ;;  %s1290_s14 = smov %s976_s15 }
 0x463   : > { %s1292_s16 = smov %s1066_s19  ;;  %22 = sbr.rel (!%p20_p3) target bundleno = 3 (0x3), region = 98 }
 0x467   : > { %s1291_s15 = smov %s1288_s26 }
 0x46a   :  { %650 = vsyncpa [#allocation3], 1 }
 0x46b   :  { %652 = vsyncpa [#allocation3 + $0x1], 1 }

// kernel: cross_attention_forward.8
= control target key start
LH: loop header
LB: loop body
LE: loop exit
PB: predicated region body
PF: predicated region fallthrough
CT: control target
= control target key end

     0   :  { %s2303_s12 = smov 0   ;;  %s2305_s13 = smov 0   ;;  %s2618_s0 = inlined_call_operand.vmem [shape: f32[2,8,128], index: 0, kind: input, shape index: {}]   ;;  %s2619_s1 = inlined_call_operand.vmem [shape: f32[2,8,128], index: 1, kind: input, shape index: {}]   ;;  %s2620_s2 = inlined_call_operand.vmem [shape: f32[2,8,128], index: 2, kind: input, shape index: {}]   ;;  %s2621_s3 = inlined_call_operand.vmem [shape: f32[2,8,128], index: 3, kind: output, shape index: {}]  }
   0x1   :  { %s2307_s14 = smov 0  }
   0x2 LB: > { %s32_s15 = sadd.s32 1, %s2259_s13  ;;  %p1997_p0 = scmp.ge.s32.totalorder %s2263_s14, 1  ;;  %s2263_s14 = sphi %s2307_s14, %s13_s14   ;;  %s2259_s13 = sphi %s2305_s13, %s2623_s13   ;;  %s2255_s12 = sphi %s2303_s12, %s2622_s12  }
   0x3   : > { %p34_p1 = scmp.ge.s32.totalorder %s32_s15, 2  ;;  %p190_p2 = scmp.lt.s32.totalorder %s2263_s14, 3 }
   0x5   : > { %s2625_s15 = smov (%p34_p1, %s32_s15), 0  ;;  %p191_p3 = pnand %p1997_p0, %p190_p2 }
   0x6   : > { %p232_p4 = scmp.lt.s32.totalorder (!%p191_p3), %s2255_s12, 1  ;;  %v2265_v0 = vmov (!%p191_p3), 0.0   ;;  %vm2266_vm0 = vmmov (!%p191_p3), 0   ;;  %vm274_vm1 = vcmask (!%p191_p3), 130048   ;;  %vm267_vm2 = vcmask (!%p191_p3), 64512   ;;  %s2267_s23 = smov (!%p191_p3), 112  }
   0x7   : > { %194 = sbr.rel (%p191_p3) target bundleno = 1666 (0x682), region = 32  ;;  %2060 = vmatprep.subr.mxu0 (!%p191_p3), %v2265_v0  ;;  %270 = vst [vmem:[#allocation5] sm:$0xff] (!%p191_p3), %v2265_v0  ;;  %2062 = vmatprep.mubr.msk.f32.mxu0 (!%p191_p3), %vm2266_vm0, %v2265_v0  ;;  %269 = vst.msk [vmem:[#allocation4] sm:$0xff] (!%p191_p3), %vm267_vm2, %v2265_v0  ;;  %v2268_v4 = vmov (!%p191_p3), -inf   ;;  %s2269_s24 = smov (!%p191_p3), 96   ;;  %v2273_v8 = vmov (!%p191_p3), 0  }
   0x8   : > { %2065 = vmatprep.subr.mxu1 (!%p191_p3), %v2265_v0  ;;  %2067 = vmatprep.mubr.msk.f32.mxu1 (!%p191_p3), %vm2266_vm0, %v2265_v0  ;;  %268 = vst.msk [vmem:[#allocation3] sm:$0xff] (!%p191_p3), %vm267_vm2, %v2268_v4  ;;  %s2270_s25 = smov (!%p191_p3), 80   ;;  %s2271_s26 = smov (!%p191_p3), 64   ;;  %vm374_vm3 = vcmask (!%p191_p3), 7168   ;;  %v2276_v58 = vmov (!%p191_p3), 1   ;;  %vm561_vm4 = vcmask (!%p191_p3), 15368  }
   0x9   : > { %s2272_s27 = smov (!%p191_p3), 48   ;;  %2182 = vset.pattern.permute.xlu0 (!%p191_p3), %v2273_v8  ;;  %2183 = vset.pattern.permute.xlu1 (!%p191_p3), %v2273_v8  ;;  %s2274_s28 = smov (!%p191_p3), 32   ;;  %vm757_vm5 = vcmask (!%p191_p3), 23568   ;;  %vm952_vm6 = vcmask (!%p191_p3), 31768   ;;  %vm1147_vm7 = vcmask (!%p191_p3), 39968   ;;  %vm1342_vm8 = vcmask (!%p191_p3), 48168  }
   0xa   : > { %s2275_s29 = smov (!%p191_p3), 16   ;;  %vm1537_vm9 = vcmask (!%p191_p3), 56368   ;;  %vm1732_vm10 = vcmask (!%p191_p3), 64568   ;;  %vm652_vm11 = vcmask (!%p191_p3), 261248   ;;  %vm847_vm12 = vcmask (!%p191_p3), 392448  }
   0xb   : > { %vm1042_vm13 = vcmask (!%p191_p3), 523648   ;;  %vm1237_vm14 = vcmask (!%p191_p3), 654848   ;;  %vm1432_vm15 = vcmask (!%p191_p3), 786048  }
   0xe   : > { %s2627_s12 = smov (!%p232_p4, %s2255_s12), 1  ;;  %v368_v35 = vld [vmem:[#allocation4] sm:$0xff] }
   0xf   : > { %s2328_s16 = sshll.u32 %s2627_s12, 3  ;;  %v351_v9 = vld [vmem:[#allocation3] sm:$0xff] }
  0x10   : > { %s238_s19 = scalar_lea.vmem %s2618_s0, %s2328_s16  ;;  %s245_s22 = scalar_lea.vmem %s2619_s1, %s2328_s16 }
  0x11   : > { %v264_v1 = vld [vmem:[%s238_s19] sm:$0xff]  ;;  %s252_s5 = scalar_lea.vmem %s2620_s2, %s2328_s16  ;;  %s259_s8 = scalar_lea.vmem %s2621_s3, %s2328_s16 }
  0x12   : > { %v271_v2 = vld [vmem:[%s245_s22] sm:$0xff]  ;;  %v265_v3 = vmul.f32 0.25, %v264_v1 }
  0x13   : > { %2061 = vmatpush3.xpose.msk.msra.mxu0 %vm274_vm1, %v271_v2  ;;  %463 = vrot.lane.b32.xlu1 %v271_v2, %s2267_s23  ;;  %v2368_v14 = vld [vmem:[%s252_s5] sm:$0xff] }
  0x14   : > { %2075 = vmatprep.subr.mxu0 %v2265_v0  ;;  %2066 = vmatpush3.msra.mxu1 %v2368_v14 }
  0x15   : > { %2070 = vmatprep.subr.mxu1 %v2265_v0 }
  0x16   : > { %2063 = vmatmul.mubr.msk.f32.vlgmr.msra.gmra.mrb[0].mxu0 %vm274_vm1, %v265_v3 }
  0x17   : > { %2077 = vmatprep.mubr.msk.f32.mxu0 %vm2266_vm0, %v2265_v0  ;;  %461 = vrot.lane.b32.xlu1 %v265_v3, %s2267_s23 }
  0x1b   : > { %659 = vrot.lane.b32.xlu1 %v271_v2, %s2269_s24 }
  0x1f   : > { %657 = vrot.lane.b32.xlu1 %v265_v3, %s2269_s24 }
  0x23   : > { %854 = vrot.lane.b32.xlu1 %v271_v2, %s2270_s25 }
  0x27   : > { %852 = vrot.lane.b32.xlu1 %v265_v3, %s2270_s25 }
  0x2b   : > { %1049 = vrot.lane.b32.xlu1 %v271_v2, %s2271_s26 }
  0x2f   : > { %1047 = vrot.lane.b32.xlu1 %v265_v3, %s2271_s26 }
  0x33   : > { %1244 = vrot.lane.b32.xlu1 %v271_v2, %s2272_s27 }
  0x37   : > { %1242 = vrot.lane.b32.xlu1 %v265_v3, %s2272_s27 }
  0x3b   : > { %1439 = vrot.lane.b32.xlu1 %v271_v2, %s2274_s28 }
  0x3f   : > { %1437 = vrot.lane.b32.xlu1 %v265_v3, %s2274_s28 }
  0x43   : > { %1632 = vrot.lane.b32.xlu1 %v265_v3, %s2275_s29 }
  0x85   : > { %v464_v16 = vpop.permute.xlu1 %463 }
  0x89   : > { %v462_v17 = vpop.permute.xlu1 %461 }
  0x8d   : > { %v660_v18 = vpop.permute.xlu1 %659 }
  0x91   : > { %v658_v19 = vpop.permute.xlu1 %657 }
  0x95   : > { %v855_v20 = vpop.permute.xlu1 %854 }
  0x99   : > { %v853_v22 = vpop.permute.xlu1 %852 }
  0x9d   : > { %v1050_v25 = vpop.permute.xlu1 %1049 }
  0xa1   : > { %v1048_v26 = vpop.permute.xlu1 %1047 }
  0xa5   : > { %v1245_v29 = vpop.permute.xlu1 %1244 }
  0xa9   : > { %v1243_v30 = vpop.permute.xlu1 %1242 }
  0xad   : > { %v1440_v31 = vpop.permute.xlu1 %1439 }
  0xb1   : > { %v1438_v32 = vpop.permute.xlu1 %1437 }
  0xb5   : > { %v1633_v34 = vpop.permute.xlu1 %1632 }
  0xe9   : > { %v347_v5 = vpop.f32.mrb[0].mxu0 }
  0xea   : > { %v2064_v6 = vpop.f32.mrb[1].mxu0  ;;  %v353_v7 = vsel %vm267_vm2, %v347_v5, -inf }
  0xeb   : > { %354 = vmax.xlane.f32.xlu0 %v353_v7 }
 0x178   : > { %v355_v10 = vpop.xlane.xlu0 %354 }
 0x179   : > { %v356_v11 = vmax.f32 %v351_v9, %v355_v10 }
 0x17b   : > { %v357_v12 = vsub.f32 %v351_v9, %v356_v11  ;;  %458 = vst.msk [vmem:[#allocation3] sm:$0xff] %vm374_vm3, %v356_v11  ;;  %362 = vperm.xlu0 %2182, %v356_v11   ;;  %v2277_v9 = vmov 2  }
 0x17d   : > { %v358_v13 = vmul.f32 1.442695, %v357_v12 }
 0x17f   : > { %2207 = vpow2.f32 %v358_v13  ;;  %1634 = vrot.lane.b32.xlu0 %v271_v2, %s2275_s29 }
 0x180   : > { %2184 = vset.pattern.permute.xlu0 %v2276_v58 }
 0x182   : > { %v539_v2 = vld [vmem:[#allocation3] sm:$0xff] }
 0x189   : > { %v2208_v15 = vpop.eup %2207 }
 0x18a   : > { %452 = vperm.xlu1 %2183, %v2208_v15   ;;  %v369_v36 = vmul.f32 %v2208_v15, %v368_v35 }
 0x18e   : > { %2186 = vset.pattern.permute.xlu1 %v2276_v58 }
 0x1fa   : > { %v363_v21 = vpop.permute.xlu0 %362 }
 0x1fb   : > { %v365_v23 = vsub.f32 %v347_v5, %v363_v21 }
 0x1fd   : > { %v366_v24 = vmul.f32 1.442695, %v365_v23 }
 0x1fe   : > { %v1635_v33 = vpop.permute.xlu0 %1634 }
 0x1ff   : > { %2209 = vpow2.f32 %v366_v24 }
 0x209   : > { %v2210_v27 = vpop.eup %2209  ;;  %v453_v39 = vpop.permute.xlu1 %452 }
 0x20a   : > { %2068 = vmatmul.mubr.msk.f32.vlgmr.msra.gmra.mrb[0].mxu1 %vm267_vm2, %v2210_v27  ;;  %v370_v28 = vsel %vm267_vm2, %v2210_v27, 0.0  ;;  %v455_v40 = vmul.f32 0.0, %v453_v39 }
 0x20b   : > { %2071 = vmatpush3.xpose.msk.msra.mxu1 %vm274_vm1, %v464_v16  ;;  %371 = vadd.xlane.f32.xlu0 %v370_v28 }
 0x20c   : > { %2072 = vmatprep.mubr.msk.f32.mxu1 %vm2266_vm0, %v2265_v0  ;;  %2080 = vmatprep.subr.mxu1 %v2265_v0 }
 0x20e   : > { %2073 = vmatmul.mubr.msk.f32.vlgmr.msra.gmra.mrb[2].mxu1 %vm274_vm1, %v462_v17 }
 0x20f   : > { %2081 = vmatpush3.xpose.msk.msra.mxu1 %vm274_vm1, %v660_v18  ;;  %2082 = vmatprep.mubr.msk.f32.mxu1 %vm2266_vm0, %v2265_v0 }
 0x210   : > { %2090 = vmatprep.subr.mxu1 %v2265_v0 }
 0x212   : > { %2083 = vmatmul.mubr.msk.f32.vlgmr.msra.gmra.mrb[4].mxu1 %vm274_vm1, %v658_v19  ;;  %v2278_v19 = vmov 3  }
 0x213   : > { %2091 = vmatpush3.xpose.msk.msra.mxu1 %vm274_vm1, %v855_v20  ;;  %2092 = vmatprep.mubr.msk.f32.mxu1 %vm2266_vm0, %v2265_v0  ;;  %v2279_v20 = vmov 4  }
 0x214   : > { %2100 = vmatprep.subr.mxu1 %v2265_v0 }
 0x216   : > { %2093 = vmatmul.mubr.msk.f32.vlgmr.msra.gmra.mrb[6].mxu1 %vm274_vm1, %v853_v22 }
 0x217   : > { %2101 = vmatpush3.xpose.msk.msra.mxu1 %vm274_vm1, %v1050_v25  ;;  %2102 = vmatprep.mubr.msk.f32.mxu1 %vm2266_vm0, %v2265_v0  ;;  %v2280_v25 = vmov 7  }
 0x218   : > { %2110 = vmatprep.subr.mxu1 %v2265_v0 }
 0x21a   : > { %2103 = vmatmul.mubr.msk.f32.vlgmr.msra.gmra.mrb[8].mxu1 %vm274_vm1, %v1048_v26  ;;  %v2281_v26 = vmov 5  }
 0x21b   : > { %2111 = vmatpush3.xpose.msk.msra.mxu1 %vm274_vm1, %v1245_v29  ;;  %2112 = vmatprep.mubr.msk.f32.mxu1 %vm2266_vm0, %v2265_v0 }
 0x21c   : > { %2120 = vmatprep.subr.mxu1 %v2265_v0 }
 0x21e   : > { %2113 = vmatmul.mubr.msk.f32.vlgmr.msra.gmra.mrb[10].mxu1 %vm274_vm1, %v1243_v30 }
 0x21f   : > { %2121 = vmatpush3.xpose.msk.msra.mxu1 %vm274_vm1, %v1440_v31  ;;  %2122 = vmatprep.mubr.msk.f32.mxu1 %vm2266_vm0, %v2265_v0 }
 0x220   : > { %2130 = vmatprep.subr.mxu1 %v2265_v0 }
 0x222   : > { %2123 = vmatmul.mubr.msk.f32.vlgmr.msra.gmra.mrb[12].mxu1 %vm274_vm1, %v1438_v32  ;;  %v2282_v32 = vmov 6  }
 0x223   : > { %2131 = vmatpush3.xpose.msk.msra.mxu1 %vm274_vm1, %v1635_v33  ;;  %2132 = vmatprep.mubr.msk.f32.mxu1 %vm2266_vm0, %v2265_v0 }
 0x226   : > { %2133 = vmatmul.mubr.msk.f32.vlgmr.msra.gmra.mrb[14].mxu1 %vm274_vm1, %v1633_v34 }
 0x298   : > { %v372_v37 = vpop.xlane.xlu0 %371 }
 0x299   : > { %v373_v38 = vadd.f32 %v372_v37, %v369_v36 }
 0x29b   : > { %375 = vst.msk [vmem:[#allocation4] sm:$0xff] %vm374_vm3, %v373_v38  ;;  %vm1873_vm3 = vcmask 261120  }
 0x2dd   : > { %v445_v41 = vpop.f32.mrb[0].mxu1 }
 0x2de   : > { %v456_v42 = vadd.f32 %v455_v40, %v445_v41  ;;  %v2069_v43 = vpop.f32.mrb[1].mxu1 }
 0x2e0   : > { %457 = vst.msk [vmem:[#allocation5] sm:$0xff] %vm274_vm1, %v456_v42 }
 0x2e1   : > { %v2410_v44 = vpop.f32.mrb[2].mxu1 }
 0x2e2   : > { %v2074_v45 = vpop.f32.mrb[3].mxu1  ;;  %v540_v46 = vsel %vm267_vm2, %v2410_v44, -inf }
 0x2e3   : > { %541 = vmax.xlane.f32.xlu1 %v540_v46 }
 0x2e5   : > { %v2414_v47 = vpop.f32.mrb[4].mxu1 }
 0x2e6   : > { %v2084_v48 = vpop.f32.mrb[5].mxu1  ;;  %v736_v49 = vsel %vm267_vm2, %v2414_v47, -inf }
 0x2e7   : > { %737 = vmax.xlane.f32.xlu1 %v736_v49 }
 0x2e9   : > { %v2418_v50 = vpop.f32.mrb[6].mxu1 }
 0x2ea   : > { %v2094_v51 = vpop.f32.mrb[7].mxu1  ;;  %v931_v52 = vsel %vm267_vm2, %v2418_v50, -inf }
 0x2eb   : > { %932 = vmax.xlane.f32.xlu1 %v931_v52 }
 0x2ed   : > { %v2422_v53 = vpop.f32.mrb[8].mxu1 }
 0x2ee   : > { %v2104_v54 = vpop.f32.mrb[9].mxu1  ;;  %v1126_v55 = vsel %vm267_vm2, %v2422_v53, -inf }
 0x2ef   : > { %1127 = vmax.xlane.f32.xlu1 %v1126_v55 }
 0x2f1   : > { %v2426_v56 = vpop.f32.mrb[10].mxu1 }
 0x2f2   : > { %v2114_v57 = vpop.f32.mrb[11].mxu1  ;;  %v1321_v1 = vsel %vm267_vm2, %v2426_v56, -inf }
 0x2f5   : > { %v2430_v59 = vpop.f32.mrb[12].mxu1 }
 0x2f6   : > { %v2124_v60 = vpop.f32.mrb[13].mxu1  ;;  %v1516_v61 = vsel %vm267_vm2, %v2430_v59, -inf }
 0x2f7   : > { %1517 = vmax.xlane.f32.xlu0 %v1516_v61 }
 0x2f9   : > { %v2436_v62 = vpop.f32.mrb[14].mxu1 }
 0x2fa   : > { %v2134_v63 = vpop.f32.mrb[15].mxu1  ;;  %v1711_v23 = vsel %vm267_vm2, %v2436_v62, -inf }
 0x300   : > { %564 = vrot.lane.b32.xlu1 %v2368_v14, %s2267_s23 }
 0x324   : > { %1322 = vmax.xlane.f32.xlu1 %v1321_v1 }
 0x370   : > { %v542_v3 = vpop.xlane.xlu1 %541 }
 0x371   : > { %v543_v4 = vmax.f32 %v539_v2, %v542_v3 }
 0x373   : > { %v544_v5 = vsub.f32 %v539_v2, %v543_v4  ;;  %654 = vst.msk [vmem:[#allocation3] sm:$0xff] %vm561_vm4, %v543_v4  ;;  %549 = vperm.xlu0 %2184, %v543_v4  }
 0x374   : > { %v738_v6 = vpop.xlane.xlu1 %737 }
 0x375   : > { %v545_v7 = vmul.f32 1.442695, %v544_v5 }
 0x377   : > { %2211 = vpow2.f32 %v545_v7  ;;  %2185 = vset.pattern.permute.xlu0 %v2277_v9 }
 0x378   : > { %v933_v10 = vpop.xlane.xlu1 %932 }
 0x37a   : > { %v735_v11 = vld [vmem:[#allocation3] sm:$0xff] }
 0x37b   : > { %v739_v12 = vmax.f32 %v735_v11, %v738_v6 }
 0x37c   : > { %v1128_v13 = vpop.xlane.xlu1 %1127 }
 0x37d   : > { %849 = vst.msk [vmem:[#allocation3] sm:$0xff] %vm757_vm5, %v739_v12  ;;  %v740_v30 = vsub.f32 %v735_v11, %v739_v12 }
 0x37f   : > { %v741_v33 = vmul.f32 1.442695, %v740_v30 }
 0x380   : > { %v565_v15 = vpop.permute.xlu1 %564 }
 0x381   : > { %v2443_v16 = vpop.eup %2211  ;;  %2076 = vmatpush3.msra.mxu0 %v565_v15  ;;  %2213 = vpow2.f32 %v741_v33 }
 0x382   : > { %643 = vperm.xlu1 %2186, %v2443_v16   ;;  %2085 = vmatprep.subr.mxu0 %v2265_v0 }
 0x384   : > { %v930_v17 = vld [vmem:[#allocation3] sm:$0xff]  ;;  %v1518_v31 = vpop.xlane.xlu0 %1517 }
 0x385   : > { %v934_v18 = vmax.f32 %v930_v17, %v933_v10 }
 0x386   : > { %2187 = vset.pattern.permute.xlu1 %v2278_v19 }
 0x387   : > { %1044 = vst.msk [vmem:[#allocation3] sm:$0xff] %vm952_vm6, %v934_v18  ;;  %940 = vperm.xlu1 %2187, %v934_v18   ;;  %v935_v37 = vsub.f32 %v930_v17, %v934_v18 }
 0x389   : > { %v936_v38 = vmul.f32 1.442695, %v935_v37 }
 0x38b   : > { %759 = vrot.lane.b32.xlu1 %v2368_v14, %s2269_s24  ;;  %2215 = vpow2.f32 %v936_v38  ;;  %v2487_v41 = vpop.eup %2213 }
 0x38c   : > { %2188 = vset.pattern.permute.xlu1 %v2279_v20 }
 0x38e   : > { %v2452_v21 = vld [vmem:[#allocation3] sm:$0xff] }
 0x38f   : > { %v2455_v22 = vmax.f32 %v2452_v21, %v1128_v13 }
 0x391   : > { %v1130_v24 = vsub.f32 %v2452_v21, %v2455_v22  ;;  %1239 = vst.msk [vmem:[#allocation3] sm:$0xff] %vm1147_vm7, %v2455_v22  ;;  %1135 = vperm.xlu1 %2188, %v2455_v22  }
 0x392   : > { %1712 = vmax.xlane.f32.xlu0 %v1711_v23 }
 0x395   : > { %2191 = vset.pattern.permute.xlu1 %v2280_v25  ;;  %v2493_v42 = vpop.eup %2215 }
 0x398   : > { %v1320_v27 = vld [vmem:[#allocation3] sm:$0xff] }
 0x3a8   : > { %745 = vperm.xlu0 %2185, %v739_v12  }
 0x3ac   : > { %954 = vrot.lane.b32.xlu0 %v2368_v14, %s2270_s25 }
 0x3ad   : > { %2189 = vset.pattern.permute.xlu0 %v2281_v26 }
 0x3b1   : > { %v1323_v28 = vpop.xlane.xlu1 %1322 }
 0x3b2   : > { %v1324_v29 = vmax.f32 %v1320_v27, %v1323_v28  ;;  %v1131_v28 = vmul.f32 1.442695, %v1130_v24 }
 0x3b4   : > { %1434 = vst.msk [vmem:[#allocation3] sm:$0xff] %vm1342_vm8, %v1324_v29  ;;  %1330 = vperm.xlu0 %2189, %v1324_v29   ;;  %v1325_v39 = vsub.f32 %v1320_v27, %v1324_v29 }
 0x3b6   : > { %v1326_v40 = vmul.f32 1.442695, %v1325_v39 }
 0x3b8   : > { %1149 = vrot.lane.b32.xlu0 %v2368_v14, %s2271_s26  ;;  %2217 = vpow2.f32 %v1326_v40 }
 0x3b9   : > { %2190 = vset.pattern.permute.xlu0 %v2282_v32 }
 0x3bb   : > { %v2472_v34 = vld [vmem:[#allocation3] sm:$0xff] }
 0x3bc   : > { %v2475_v35 = vmax.f32 %v2472_v34, %v1518_v31 }
 0x3be   : > { %v1520_v36 = vsub.f32 %v2472_v34, %v2475_v35  ;;  %1629 = vst.msk [vmem:[#allocation3] sm:$0xff] %vm1537_vm9, %v2475_v35  ;;  %1525 = vperm.xlu0 %2190, %v2475_v35  }
 0x3c2   : > { %1344 = vrot.lane.b32.xlu0 %v2368_v14, %s2272_s27  ;;  %v2496_v43 = vpop.eup %2217 }
 0x3c3   : > { %2192 = vset.pattern.permute.xlu0 %v2277_v9 }
 0x3c5   : > { %v2509_v61 = vld [vmem:[#allocation3] sm:$0xff] }
 0x3c6   : > { %1539 = vrot.lane.b32.xlu0 %v2368_v14, %s2274_s28 }
 0x3ca   : > { %838 = vperm.xlu0 %2192, %v2487_v41  }
 0x3ce   : > { %1734 = vrot.lane.b32.xlu0 %v2368_v14, %s2275_s29 }
 0x3cf   : > { %2193 = vset.pattern.permute.xlu0 %v2278_v19 }
 0x3d2   : > { %1033 = vperm.xlu0 %2193, %v2493_v42  }
 0x3d6   : > { %2195 = vset.pattern.permute.xlu0 %v2281_v26 }
 0x3d7   : > { %1423 = vperm.xlu0 %2195, %v2496_v43  }
 0x3db   : > { %2197 = vset.pattern.permute.xlu0 %v2280_v25 }
 0x3f2   : > { %v550_v45 = vpop.permute.xlu0 %549 }
 0x3f3   : > { %v552_v46 = vsub.f32 %v2410_v44, %v550_v45  ;;  %v555_v45 = vld [vmem:[#allocation4] sm:$0xff] }
 0x3f5   : > { %v553_v48 = vmul.f32 1.442695, %v552_v46  ;;  %v556_v46 = vmul.f32 %v2443_v16, %v555_v45 }
 0x3f7   : > { %2219 = vpow2.f32 %v553_v48 }
 0x401   : > { %v2220_v14 = vpop.eup %2219  ;;  %v2502_v49 = vpop.permute.xlu1 %643 }
 0x402   : > { %2078 = vmatmul.mubr.msk.f32.vlgmr.msra.gmra.mrb[2].mxu0 %vm267_vm2, %v2220_v14 }
 0x403   : > { %2087 = vmatprep.mubr.msk.f32.mxu0 %vm2266_vm0, %v2265_v0 }
 0x406   : > { %v941_v51 = vpop.permute.xlu1 %940 }
 0x407   : > { %v943_v3 = vsub.f32 %v2418_v50, %v941_v51 }
 0x409   : > { %v944_v6 = vmul.f32 1.442695, %v943_v3 }
 0x40a   : > { %v760_v52 = vpop.permute.xlu1 %759 }
 0x40b   : > { %2086 = vmatpush3.msra.mxu0 %v760_v52 }
 0x40c   : > { %2095 = vmatprep.subr.mxu0 %v2265_v0 }
 0x410   : > { %v1136_v54 = vpop.permute.xlu1 %1135 }
 0x411   : > { %v1138_v55 = vsub.f32 %v2422_v53, %v1136_v54 }
 0x413   : > { %v1139_v57 = vmul.f32 1.442695, %v1138_v55 }
 0x415   : > { %2221 = vpow2.f32 %v1139_v57 }
 0x41f   : > { %v2222_v44 = vpop.eup %2221  ;;  %v1713_v60 = vpop.xlane.xlu0 %1712 }
 0x420   : > { %v2512_v63 = vmax.f32 %v2509_v61, %v1713_v60  ;;  %v1143_v1 = vsel %vm267_vm2, %v2222_v44, 0.0 }
 0x421   : > { %1144 = vadd.xlane.f32.xlu0 %v1143_v1 }
 0x422   : > { %v1715_v2 = vsub.f32 %v2509_v61, %v2512_v63  ;;  %1824 = vst.msk [vmem:[#allocation3] sm:$0xff] %vm1732_vm10, %v2512_v63  ;;  %1720 = vperm.xlu1 %2191, %v2512_v63  }
 0x426   : > { %2194 = vset.pattern.permute.xlu1 %v2279_v20 }
 0x427   : > { %v746_v53 = vpop.permute.xlu0 %745 }
 0x428   : > { %v748_v4 = vsub.f32 %v2414_v47, %v746_v53 }
 0x42a   : > { %v749_v5 = vmul.f32 1.442695, %v748_v4 }
 0x42b   : > { %v955_v7 = vpop.permute.xlu0 %954 }
 0x42c   : > { %2223 = vpow2.f32 %v749_v5 }
 0x42d   : > { %2225 = vpow2.f32 %v944_v6 }
 0x433   : > { %v1331_v10 = vpop.permute.xlu0 %1330 }
 0x434   : > { %v1333_v11 = vsub.f32 %v2426_v56, %v1331_v10 }
 0x436   : > { %v2224_v12 = vpop.eup %2223  ;;  %v1334_v13 = vmul.f32 1.442695, %v1333_v11 }
 0x437   : > { %2088 = vmatmul.mubr.msk.f32.vlgmr.msra.gmra.mrb[4].mxu0 %vm267_vm2, %v2224_v12  ;;  %v1150_v50 = vpop.permute.xlu0 %1149  ;;  %v2226_v47 = vpop.eup %2225  ;;  %v753_v21 = vsel %vm267_vm2, %v2224_v12, 0.0 }
 0x438   : > { %2227 = vpow2.f32 %v1334_v13  ;;  %2096 = vmatpush3.msra.mxu0 %v955_v7  ;;  %2097 = vmatprep.mubr.msk.f32.mxu0 %vm2266_vm0, %v2265_v0  ;;  %v948_v22 = vsel %vm267_vm2, %v2226_v47, 0.0 }
 0x439   : > { %2105 = vmatprep.subr.mxu0 %v2265_v0 }
 0x43b   : > { %2098 = vmatmul.mubr.msk.f32.vlgmr.msra.gmra.mrb[6].mxu0 %vm267_vm2, %v2226_v47 }
 0x43c   : > { %2106 = vmatpush3.msra.mxu0 %v1150_v50  ;;  %2107 = vmatprep.mubr.msk.f32.mxu0 %vm2266_vm0, %v2265_v0 }
 0x43d   : > { %v1526_v56 = vpop.permute.xlu0 %1525  ;;  %2115 = vmatprep.subr.mxu0 %v2265_v0 }
 0x43e   : > { %v1528_v15 = vsub.f32 %v2430_v59, %v1526_v56  ;;  %v557_v59 = vsel %vm267_vm2, %v2220_v14, 0.0 }
 0x43f   : > { %2108 = vmatmul.mubr.msk.f32.vlgmr.msra.gmra.mrb[8].mxu0 %vm267_vm2, %v2222_v44 }
 0x440   : > { %v1529_v17 = vmul.f32 1.442695, %v1528_v15  ;;  %2117 = vmatprep.mubr.msk.f32.mxu0 %vm2266_vm0, %v2265_v0 }
 0x441   : > { %v1345_v18 = vpop.permute.xlu0 %1344 }
 0x442   : > { %v2228_v23 = vpop.eup %2227  ;;  %2229 = vpow2.f32 %v1529_v17  ;;  %2116 = vmatpush3.msra.mxu0 %v1345_v18 }
 0x443   : > { %2118 = vmatmul.mubr.msk.f32.vlgmr.msra.gmra.mrb[10].mxu0 %vm267_vm2, %v2228_v23  ;;  %2125 = vmatprep.subr.mxu0 %v2265_v0  ;;  %2231 = vpow2.f32 %v1131_v28  ;;  %v1338_v24 = vsel %vm267_vm2, %v2228_v23, 0.0  ;;  %v640_v28 = vld [vmem:[#allocation5] sm:$0xff] }
 0x444   : > { %2127 = vmatprep.mubr.msk.f32.mxu0 %vm2266_vm0, %v2265_v0 }
 0x445   : > { %v1540_v27 = vpop.permute.xlu0 %1539 }
 0x446   : > { %558 = vadd.xlane.f32.xlu1 %v557_v59  ;;  %2126 = vmatpush3.msra.mxu0 %v1540_v27  ;;  %v1716_v59 = vmul.f32 1.442695, %v1715_v2 }
 0x447   : > { %2135 = vmatprep.subr.mxu0 %v2265_v0 }
 0x449   : > { %v2545_v29 = vpop.permute.xlu0 %838 }
 0x44c   : > { %v2547_v30 = vpop.eup %2229 }
 0x44d   : > { %v1735_v31 = vpop.permute.xlu0 %1734  ;;  %2128 = vmatmul.mubr.msk.f32.vlgmr.msra.gmra.mrb[12].mxu0 %vm267_vm2, %v2547_v30  ;;  %v2232_v33 = vpop.eup %2231  ;;  %v1533_v27 = vsel %vm267_vm2, %v2547_v30, 0.0 }
 0x44e   : > { %2136 = vmatpush3.msra.mxu0 %v1735_v31  ;;  %2137 = vmatprep.mubr.msk.f32.mxu0 %vm2266_vm0, %v2265_v0  ;;  %v1521_v0 = vmul.f32 1.442695, %v1520_v36  ;;  %v646_v31 = vmul.f32 %v2502_v49, %v640_v28  ;;  %vm1627_vm0 = vcmask 917248  }
 0x451   : > { %v1034_v6 = vpop.permute.xlu0 %1033 }
 0x456   : > { %v1424_v11 = vpop.permute.xlu0 %1423 }
 0x457   : > { %1228 = vperm.xlu1 %2194, %v2232_v33  }
 0x45b   : > { %2196 = vset.pattern.permute.xlu1 %v2282_v32 }
 0x47b   : > { %754 = vadd.xlane.f32.xlu1 %v753_v21 }
 0x47f   : > { %949 = vadd.xlane.f32.xlu1 %v948_v22 }
 0x483   : > { %1339 = vadd.xlane.f32.xlu1 %v1338_v24 }
 0x4a1   : > { %v1721_v37 = vpop.permute.xlu1 %1720 }
 0x4a2   : > { %v1723_v38 = vsub.f32 %v2436_v62, %v1721_v37 }
 0x4a4   : > { %v1724_v39 = vmul.f32 1.442695, %v1723_v38 }
 0x4a6   : > { %2233 = vpow2.f32 %v1724_v39 }
 0x4a7   : > { %2235 = vpow2.f32 %v1521_v0 }
 0x4a8   : > { %2237 = vpow2.f32 %v1716_v59 }
 0x4ae   : > { %v1145_v50 = vpop.xlane.xlu0 %1144 }
 0x4b0   : > { %v2234_v40 = vpop.eup %2233 }
 0x4b1   : > { %2138 = vmatmul.mubr.msk.f32.vlgmr.msra.gmra.mrb[14].mxu0 %vm267_vm2, %v2234_v40  ;;  %v2565_v52 = vpop.eup %2235  ;;  %v1728_v34 = vsel %vm267_vm2, %v2234_v40, 0.0  ;;  %vm1822_vm2 = vcmask 1048448  }
 0x4d3   : > { %v559_v48 = vpop.xlane.xlu1 %558 }
 0x4d4   : > { %v560_v14 = vadd.f32 %v559_v48, %v556_v46 }
 0x4d5   : > { %v636_v51 = vpop.f32.mrb[2].mxu0 }
 0x4d6   : > { %562 = vst.msk [vmem:[#allocation4] sm:$0xff] %vm561_vm4, %v560_v14  ;;  %648 = vrot.lane.b32.xlu1 %v636_v51, %s2275_s29  ;;  %v2079_v62 = vpop.f32.mrb[3].mxu0  ;;  %vm1875_vm4 = vcmask 392192  }
 0x4d7   : > { %v2570_v35 = vpop.permute.xlu1 %1228 }
 0x4da   : > { %1618 = vperm.xlu1 %2196, %v2565_v52  }
 0x4dd   : > { %v751_v16 = vld [vmem:[#allocation4] sm:$0xff] }
 0x4de   : > { %2199 = vset.pattern.permute.xlu1 %v2276_v58  ;;  %v752_v36 = vmul.f32 %v2487_v41, %v751_v16 }
 0x4fe   : > { %1729 = vadd.xlane.f32.xlu1 %v1728_v34 }
 0x508   : > { %v755_v54 = vpop.xlane.xlu1 %754 }
 0x509   : > { %v756_v55 = vadd.f32 %v755_v54, %v752_v36 }
 0x50a   : > { %v831_v57 = vpop.f32.mrb[4].mxu0 }
 0x50b   : > { %758 = vst.msk [vmem:[#allocation4] sm:$0xff] %vm757_vm5, %v756_v55  ;;  %843 = vrot.lane.b32.xlu0 %v831_v57, %s2274_s28  ;;  %v2089_v44 = vpop.f32.mrb[5].mxu0  ;;  %vm1877_vm5 = vcmask 523264  }
 0x50c   : > { %v950_v41 = vpop.xlane.xlu1 %949 }
 0x50e   : > { %v1026_v60 = vpop.f32.mrb[6].mxu0 }
 0x50f   : > { %1038 = vrot.lane.b32.xlu0 %v1026_v60, %s2272_s27  ;;  %v2099_v58 = vpop.f32.mrb[7].mxu0 }
 0x510   : > { %v1340_v18 = vpop.xlane.xlu1 %1339 }
 0x512   : > { %v946_v1 = vld [vmem:[#allocation4] sm:$0xff]  ;;  %v1221_v53 = vpop.f32.mrb[8].mxu0 }
 0x513   : > { %v947_v3 = vmul.f32 %v2493_v42, %v946_v1  ;;  %1233 = vrot.lane.b32.xlu0 %v1221_v53, %s2271_s26  ;;  %v2109_v4 = vpop.f32.mrb[9].mxu0 }
 0x515   : > { %v951_v5 = vadd.f32 %v950_v41, %v947_v3 }
 0x516   : > { %v1416_v7 = vpop.f32.mrb[10].mxu0 }
 0x517   : > { %953 = vst.msk [vmem:[#allocation4] sm:$0xff] %vm952_vm6, %v951_v5  ;;  %1428 = vrot.lane.b32.xlu0 %v1416_v7, %s2270_s25  ;;  %v2119_v10 = vpop.f32.mrb[11].mxu0  ;;  %vm1879_vm6 = vcmask 654336  }
 0x51e   : > { %v1141_v12 = vld [vmem:[#allocation4] sm:$0xff] }
 0x51f   : > { %v1142_v13 = vmul.f32 %v2232_v33, %v1141_v12 }
 0x520   : > { %v1611_v47 = vpop.f32.mrb[12].mxu0 }
 0x521   : > { %v1146_v56 = vadd.f32 %v1145_v50, %v1142_v13  ;;  %1623 = vrot.lane.b32.xlu1 %v1611_v47, %s2269_s24  ;;  %v2129_v42 = vpop.f32.mrb[13].mxu0 }
 0x523   : > { %1148 = vst.msk [vmem:[#allocation4] sm:$0xff] %vm1147_vm7, %v1146_v56  ;;  %vm1881_vm7 = vcmask 785408  }
 0x52a   : > { %v1336_v15 = vld [vmem:[#allocation4] sm:$0xff] }
 0x52b   : > { %v1337_v17 = vmul.f32 %v2496_v43, %v1336_v15  ;;  %v2238_v43 = vpop.eup %2237 }
 0x52d   : > { %v1341_v23 = vadd.f32 %v1340_v18, %v1337_v17 }
 0x52f   : > { %1343 = vst.msk [vmem:[#allocation4] sm:$0xff] %vm1342_vm8, %v1341_v23  ;;  %vm1883_vm8 = vcmask 916480  }
 0x536   : > { %1534 = vadd.xlane.f32.xlu0 %v1533_v27  ;;  %v1531_v55 = vld [vmem:[#allocation4] sm:$0xff] }
 0x548   : > { %v649_v33 = vpop.permute.xlu1 %648 }
 0x549   : > { %v651_v21 = vadd.f32 %v649_v33, %v646_v31 }
 0x54b   : > { %653 = vst.msk [vmem:[#allocation5] sm:$0xff] %vm652_vm11, %v651_v21 }
 0x54c   : > { %1813 = vperm.xlu0 %2197, %v2238_v43  }
 0x550   : > { %2198 = vset.pattern.permute.xlu0 %v2273_v8 }
 0x552   : > { %v835_v22 = vld [vmem:[#allocation5] sm:$0xff] }
 0x553   : > { %v841_v30 = vmul.f32 %v2545_v29, %v835_v22 }
 0x559   : > { %v1619_v51 = vpop.permute.xlu1 %1618 }
 0x57d   : > { %v844_v24 = vpop.permute.xlu0 %843 }
 0x57e   : > { %v846_v37 = vadd.f32 %v844_v24, %v841_v30 }
 0x580   : > { %848 = vst.msk [vmem:[#allocation5] sm:$0xff] %vm847_vm12, %v846_v37 }
 0x581   : > { %v1039_v49 = vpop.permute.xlu0 %1038 }
 0x584   : > { %v1806_v61 = vpop.f32.mrb[14].mxu0 }
 0x585   : > { %v2139_v63 = vpop.f32.mrb[15].mxu0  ;;  %v1234_v8 = vpop.permute.xlu0 %1233 }
 0x587   : > { %v1030_v2 = vld [vmem:[#allocation5] sm:$0xff] }
 0x588   : > { %v1036_v38 = vmul.f32 %v1034_v6, %v1030_v2 }
 0x589   : > { %v1429_v48 = vpop.permute.xlu0 %1428 }
 0x58a   : > { %v1041_v39 = vadd.f32 %v1039_v49, %v1036_v38 }
 0x58b   : > { %v1730_v62 = vpop.xlane.xlu1 %1729 }
 0x58c   : > { %1043 = vst.msk [vmem:[#allocation5] sm:$0xff] %vm1042_vm13, %v1041_v39 }
 0x593   : > { %v1225_v40 = vld [vmem:[#allocation5] sm:$0xff]  ;;  %v1624_v36 = vpop.permute.xlu1 %1623 }
 0x594   : > { %v1231_v0 = vmul.f32 %v2570_v35, %v1225_v40  ;;  %v1532_v35 = vmul.f32 %v2565_v52, %v1531_v55 }
 0x596   : > { %v1236_v45 = vadd.f32 %v1234_v8, %v1231_v0 }
 0x598   : > { %1238 = vst.msk [vmem:[#allocation5] sm:$0xff] %vm1237_vm14, %v1236_v45 }
 0x59f   : > { %v1420_v29 = vld [vmem:[#allocation5] sm:$0xff] }
 0x5a0   : > { %v1426_v46 = vmul.f32 %v1424_v11, %v1420_v29 }
 0x5a2   : > { %v1431_v14 = vadd.f32 %v1429_v48, %v1426_v46 }
 0x5a4   : > { %1433 = vst.msk [vmem:[#allocation5] sm:$0xff] %vm1432_vm15, %v1431_v14 }
 0x5ab   : > { %v1615_v34 = vld [vmem:[#allocation5] sm:$0xff] }
 0x5ac   : > { %v1621_v16 = vmul.f32 %v1619_v51, %v1615_v34 }
 0x5ae   : > { %v1626_v54 = vadd.f32 %v1624_v36, %v1621_v16 }
 0x5b0   : > { %1628 = vst.msk [vmem:[#allocation5] sm:$0xff] %vm1627_vm0, %v1626_v54 }
 0x5b7   : > { %v1810_v4 = vld [vmem:[#allocation5] sm:$0xff] }
 0x5c3   : > { %v1535_v57 = vpop.xlane.xlu0 %1534 }
 0x5c4   : > { %v1536_v44 = vadd.f32 %v1535_v57, %v1532_v35 }
 0x5c6   : > { %1538 = vst.msk [vmem:[#allocation4] sm:$0xff] %vm1537_vm9, %v1536_v44 }
 0x5cd   : > { %v1726_v60 = vld [vmem:[#allocation4] sm:$0xff] }
 0x5ce   : > { %v1727_v58 = vmul.f32 %v2238_v43, %v1726_v60 }
 0x5d0   : > { %v1731_v1 = vadd.f32 %v1730_v62, %v1727_v58 }
 0x5d2   : > { %1733 = vst.msk [vmem:[#allocation4] sm:$0xff] %vm1732_vm10, %v1731_v1 }
 0x5d9   : > { %v1828_v53 = vld [vmem:[#allocation4] sm:$0xff] }
 0x5da   : > { %2239 = vrcp.f32 %v1828_v53 }
 0x5e4   : > { %v2240_v3 = vpop.eup %2239 }
 0x5e5   : > { %1833 = vperm.xlu0 %2198, %v2240_v3   ;;  %1838 = vperm.xlu1 %2199, %v2240_v3  }
 0x5e9   : > { %2200 = vset.pattern.permute.xlu0 %v2277_v9  ;;  %2201 = vset.pattern.permute.xlu1 %v2278_v19  ;;  %v1814_v19 = vpop.permute.xlu0 %1813 }
 0x5ea   : > { %1843 = vperm.xlu0 %2200, %v2240_v3   ;;  %1848 = vperm.xlu1 %2201, %v2240_v3   ;;  %v1816_v41 = vmul.f32 %v1814_v19, %v1810_v4 }
 0x5ee   : > { %2203 = vset.pattern.permute.xlu0 %v2281_v26  ;;  %1818 = vrot.lane.b32.xlu1 %v1806_v61, %s2267_s23 }
 0x5ef   : > { %1858 = vperm.xlu0 %2203, %v2240_v3   ;;  %2202 = vset.pattern.permute.xlu1 %v2279_v20 }
 0x5f2   : > { %1853 = vperm.xlu1 %2202, %v2240_v3  }
 0x5f3   : > { %2206 = vset.pattern.permute.xlu0 %v2280_v25 }
 0x5f6   : > { %2204 = vset.pattern.permute.xlu1 %v2282_v32 }
 0x5f7   : > { %1863 = vperm.xlu1 %2204, %v2240_v3  }
 0x5fb   : > { %2205 = vset.pattern.permute.xlu1 %v2280_v25 }
 0x5fc   : > { %1868 = vperm.xlu1 %2205, %v2240_v3  }
 0x664   : > { %v1839_v9 = vpop.permute.xlu1 %1838  ;;  %v1834_v6 = vpop.permute.xlu0 %1833 }
 0x669   : > { %v1849_v52 = vpop.permute.xlu1 %1848  ;;  %v1844_v7 = vpop.permute.xlu0 %1843 }
 0x66d   : > { %v1819_v26 = vpop.permute.xlu1 %1818 }
 0x66e   : > { %v1821_v5 = vadd.f32 %v1819_v26, %v1816_v41  ;;  %v1859_v47 = vpop.permute.xlu0 %1858 }
 0x670   : > { %1823 = vst.msk [vmem:[#allocation5] sm:$0xff] %vm1822_vm2, %v1821_v5 }
 0x671   : > { %v1854_v20 = vpop.permute.xlu1 %1853 }
 0x676   : > { %v1864_v10 = vpop.permute.xlu1 %1863 }
 0x677   : > { %v1830_v11 = vld [vmem:[#allocation5] sm:$0xff] }
 0x678   : > { %v1836_v12 = vmul.f32 %v1834_v6, %v1830_v11  ;;  %v1841_v32 = vmul.f32 %v1839_v9, %v1830_v11  ;;  %v1846_v13 = vmul.f32 %v1844_v7, %v1830_v11  ;;  %v1851_v25 = vmul.f32 %v1849_v52, %v1830_v11 }
 0x679   : > { %v1856_v42 = vmul.f32 %v1854_v20, %v1830_v11  ;;  %v1861_v17 = vmul.f32 %v1859_v47, %v1830_v11  ;;  %v1866_v27 = vmul.f32 %v1864_v10, %v1830_v11 }
 0x67a   : > { %v1872_v50 = vsel %vm274_vm1, %v1836_v12, %v1841_v32 }
 0x67b   : > { %v1874_v56 = vsel %vm1873_vm3, %v1872_v50, %v1846_v13  ;;  %v1869_v15 = vpop.permute.xlu1 %1868 }
 0x67c   : > { %v1876_v18 = vsel %vm1875_vm4, %v1874_v56, %v1851_v25  ;;  %v1871_v28 = vmul.f32 %v1869_v15, %v1830_v11 }
 0x67d   : > { %v1878_v23 = vsel %vm1877_vm5, %v1876_v18, %v1856_v42 }
 0x67e   : > { %v1880_v59 = vsel %vm1879_vm6, %v1878_v23, %v1861_v17 }
 0x67f   : > { %v1882_v31 = vsel %vm1881_vm7, %v1880_v59, %v1866_v27 }
 0x680   : > { %v1884_v33 = vsel %vm1883_vm8, %v1882_v31, %v1871_v28 }
 0x681   : > { %1885 = vst [vmem:[%s259_s8] sm:$0xff] %v1884_v33 }
 0x682 PF: > { %s13_s14 = sadd.s32 1, %s2263_s14   ;;  %s2622_s12 = smov %s2259_s13 }
 0x683   : > { %p10_p5 = scmp.ge.s32.totalorder %s13_s14, 4   ;;  %s2623_s13 = smov %s2625_s15 }
 0x685   :  { %12 = sbr.rel (!%p10_p5) target bundleno = 2 (0x2), region = 76 }

</bundles_post_ra>
